<compile_context>
chip_gen: v6e
topology: v6e:2x2x1
jax: 0.10.0
libtpu: 0.0.40
codegen_flags: <defaults>
</compile_context>

<pallas_src>
import functools

import jax
import jax.numpy as jnp
from jax.experimental import pallas as pl
from jax.experimental.pallas import tpu as pltpu

BN_EPS = 1e-5


# ------------------------------- small helpers ------------------------------ #

def _vmem_limit_bytes():
    # Generation-aware scoped-VMEM budget: ~half the physical VMEM, floored at
    # the 32 MiB default (v7x has 64 MiB/TC, v5e/v6e have 128 MiB).
    try:
        phys = pltpu.get_tpu_info().vmem_capacity_bytes
        return int(min(max(phys // 2, 32 * 1024 * 1024), 96 * 1024 * 1024))
    except Exception:
        return 32 * 1024 * 1024


def bn_affine(gamma, beta, mean, var):
    scale = gamma / jnp.sqrt(var + BN_EPS)
    shift = beta - mean * scale
    return scale, shift


def _pick_th(ho, wo, n_images, target_rows=512):
    """Output-row tile height: ~target_rows rows of (rows*wo, C) work per grid
    step, dividing ho exactly, with >=4 total grid steps when possible (so both
    v7x TensorCores get work and DMA/compute overlap)."""
    th = max(1, min(ho, target_rows // max(wo, 1)))
    while ho % th:
        th -= 1
    while n_images * (ho // th) < 4 and th > 1:
        th -= 1
        while th > 1 and ho % th:
            th -= 1
    return max(th, 1)


def _hwio(w_oihw):
    return jnp.transpose(w_oihw, (2, 3, 1, 0))


# ----------------------------- Pallas conv kernel --------------------------- #

def _make_conv_kernel(*, kh, kw, th, wo, hp, wp, cin_eff, cout,
                      prologue, s2d, group, epilogue_bn, has_sc, sc_tap,
                      has_res):
    """Stride-1 kh x kw conv over a per-image resident (1, hp, wp, cin_eff)
    input block.  One (th, wo) output-row tile per grid step, im2col done in
    VMEM via shifted slices, bf16 MXU dots with f32 accumulation.

    Optional fusions: bn1+relu1 prologue (with spatial-pad re-zeroing mask),
    bn2+relu2 epilogue, 1x1 shortcut conv (second output), residual add."""
    m = th * wo

    def kernel(*refs):
        it = iter(refs)
        x_ref = next(it)
        w_ref = next(it)
        s1_ref = b1_ref = wsc_ref = s2_ref = b2_ref = res_ref = None
        if prologue:
            s1_ref = next(it)
            b1_ref = next(it)
        if has_sc:
            wsc_ref = next(it)
        if epilogue_bn:
            s2_ref = next(it)
            b2_ref = next(it)
        if has_res:
            res_ref = next(it)
        out_ref = next(it)
        out_sc_ref = next(it) if has_sc else None

        row0 = pl.multiple_of(pl.program_id(1) * th, th)
        nrows = th + kh - 1
        slab = x_ref[0, pl.ds(row0, nrows), :, :].astype(jnp.float32)

        if prologue:
            # inference BN + ReLU on the loaded tile (f32 on the VPU), then
            # re-zero the positions that are spatial zero-padding of the conv
            # input (PyTorch pads AFTER bn+relu).
            y = jnp.maximum(slab * s1_ref[...] + b1_ref[...], 0.0)
            rid = jax.lax.broadcasted_iota(jnp.int32, (nrows, wp, cin_eff), 0) + row0
            cid = jax.lax.broadcasted_iota(jnp.int32, (nrows, wp, cin_eff), 1)
            if s2d:
                # space-to-depth layout: channel group g = ch // group encodes
                # the intra-2x2 offsets (p, q) = (g // 2, g % 2).
                ch = jax.lax.broadcasted_iota(jnp.int32, (nrows, wp, cin_eff), 2)
                p_hi = ch >= 2 * group
                q_hi = ((ch >= group) & (ch < 2 * group)) | (ch >= 3 * group)
                row_pad = (((rid == 0) & jnp.logical_not(p_hi)) |
                           ((rid == hp - 1) & p_hi))
                col_pad = (((cid == 0) & jnp.logical_not(q_hi)) |
                           ((cid == wp - 1) & q_hi))
            else:
                row_pad = (rid == 0) | (rid == hp - 1)
                col_pad = (cid == 0) | (cid == wp - 1)
            y = jnp.where(row_pad | col_pad, 0.0, y)
        else:
            y = slab

        acc = jnp.zeros((m, cout), jnp.float32)
        acc_sc = jnp.zeros((m, cout), jnp.float32) if has_sc else None
        t = 0
        for dh in range(kh):
            for dw in range(kw):
                patch = y[dh:dh + th, dw:dw + wo, :].reshape(m, cin_eff)
                patch = patch.astype(jnp.bfloat16)
                acc = acc + jnp.dot(patch, w_ref[t],
                                    preferred_element_type=jnp.float32)
                if has_sc and t == sc_tap:
                    acc_sc = acc_sc + jnp.dot(patch, wsc_ref[...],
                                              preferred_element_type=jnp.float32)
                t += 1

        if epilogue_bn:
            acc = jnp.maximum(acc * s2_ref[...] + b2_ref[...], 0.0)
        if has_res:
            acc = acc + res_ref[...].astype(jnp.float32)
        out_ref[...] = acc.astype(out_ref.dtype)
        if has_sc:
            out_sc_ref[...] = acc_sc.astype(out_sc_ref.dtype)

    return kernel


def _conv_call(x_pad, w_taps, *, kh, kw, ho, wo, cout, th,
               prologue=None, s2d=False, group=0,
               epilogue_bn=None, shortcut=None, residual=None,
               out_dtype=jnp.float32):
    """Run the fused conv kernel.  Outputs (and the optional residual input)
    are flat (N*Ho*Wo, Cout) so the kernel writes lane-dense 2-D tiles and the
    NHWC reshape stays a free XLA metadata op."""
    n, hp, wp, cin_eff = x_pad.shape
    nh = ho // th
    m = th * wo                         # multiple of 8 for all shapes used here
    mtot = n * ho * wo

    def row_block(i, j, nh=nh):
        return (i * nh + j, 0)

    in_specs = [
        # per-image resident input block: DMA'd once per image (index only
        # depends on the outer grid axis).
        pl.BlockSpec((1, hp, wp, cin_eff), lambda i, j: (i, 0, 0, 0)),
        pl.BlockSpec(w_taps.shape, lambda i, j: (0, 0, 0)),
    ]
    args = [x_pad, w_taps]
    sc_tap = -1
    if prologue is not None:
        s1, b1 = prologue
        in_specs += [pl.BlockSpec(s1.shape, lambda i, j: (0, 0, 0)),
                     pl.BlockSpec(b1.shape, lambda i, j: (0, 0, 0))]
        args += [s1, b1]
    if shortcut is not None:
        wsc, sc_tap = shortcut
        in_specs.append(pl.BlockSpec(wsc.shape, lambda i, j: (0, 0)))
        args.append(wsc)
    if epilogue_bn is not None:
        s2, b2 = epilogue_bn
        in_specs += [pl.BlockSpec(s2.shape, lambda i, j: (0, 0)),
                     pl.BlockSpec(b2.shape, lambda i, j: (0, 0))]
        args += [s2, b2]
    if residual is not None:
        in_specs.append(pl.BlockSpec((m, cout), row_block))
        args.append(residual)

    out_specs = [pl.BlockSpec((m, cout), row_block)]
    out_shape = [jax.ShapeDtypeStruct((mtot, cout), out_dtype)]
    if shortcut is not None:
        out_specs.append(pl.BlockSpec((m, cout), row_block))
        out_shape.append(jax.ShapeDtypeStruct((mtot, cout), jnp.bfloat16))

    kernel = _make_conv_kernel(
        kh=kh, kw=kw, th=th, wo=wo, hp=hp, wp=wp, cin_eff=cin_eff, cout=cout,
        prologue=prologue is not None, s2d=s2d, group=group,
        epilogue_bn=epilogue_bn is not None,
        has_sc=shortcut is not None, sc_tap=sc_tap,
        has_res=residual is not None)

    single = len(out_shape) == 1
    return pl.pallas_call(
        kernel,
        out_shape=out_shape[0] if single else tuple(out_shape),
        grid=(n, nh),
        in_specs=in_specs,
        out_specs=out_specs[0] if single else tuple(out_specs),
        compiler_params=pltpu.CompilerParams(
            dimension_semantics=("parallel", "parallel"),
            vmem_limit_bytes=_vmem_limit_bytes()),
    )(*args)


# ------------------------- stride-2 space-to-depth -------------------------- #

def _s2d_input(x_nhwc):
    """Zero-pad H,W by 1 and 2x2 space-to-depth, turning a stride-2 3x3 conv
    into a stride-1 2x2 conv with 4*Cin input channels (one cheap XLA pass,
    no strided loads needed inside the kernel)."""
    n, h, w, c = x_nhwc.shape
    assert h % 2 == 0 and w % 2 == 0, "stride-2 path expects even H, W"
    xp = jnp.pad(x_nhwc, ((0, 0), (1, 1), (1, 1), (0, 0)))
    hs, ws = (h + 2) // 2, (w + 2) // 2
    xs = xp.reshape(n, hs, 2, ws, 2, c)
    xs = jnp.transpose(xs, (0, 1, 3, 2, 4, 5)).reshape(n, hs, ws, 4 * c)
    return xs


def _s2d_conv1_weights(w_oihw):
    """Repack a (Cout, Cin, 3, 3) weight into the (4, 4*Cin, Cout) per-tap
    matrices of the equivalent stride-1 2x2 conv over space-to-depth input."""
    cout, cin = w_oihw.shape[0], w_oihw.shape[1]
    w_hwio = _hwio(w_oihw)                                  # (3, 3, Cin, Cout)
    wt = jnp.zeros((2, 2, 4, cin, cout), w_hwio.dtype)
    for a in range(2):
        for b in range(2):
            for p in range(2):
                for q in range(2):
                    dh, dw = 2 * a + p, 2 * b + q
                    if dh < 3 and dw < 3:
                        wt = wt.at[a, b, 2 * p + q].set(w_hwio[dh, dw])
    return wt.reshape(4, 4 * cin, cout)


# ------------------------------- BasicBlock --------------------------------- #

def basic_block_forward(x_nhwc, p, stride):
    n, h, w, cin = x_nhwc.shape
    cout = p["conv1"].shape[0]
    equal = (cin == cout)
    if equal:
        assert stride == 1, "equal-in/out BasicBlock requires stride 1"
    ho = (h - 1) // stride + 1
    wo = (w - 1) // stride + 1

    scale1, shift1 = bn_affine(p["bn1_g"], p["bn1_b"], p["bn1_m"], p["bn1_v"])
    scale2, shift2 = bn_affine(p["bn2_g"], p["bn2_b"], p["bn2_m"], p["bn2_v"])

    if stride == 1:
        xin = jnp.pad(x_nhwc, ((0, 0), (1, 1), (1, 1), (0, 0))).astype(jnp.bfloat16)
        w1 = _hwio(p["conv1"]).reshape(9, cin, cout).astype(jnp.bfloat16)
        kh = kw = 3
        s2d = False
        cin_eff = cin
        s1 = scale1.reshape(1, 1, cin).astype(jnp.float32)
        b1 = shift1.reshape(1, 1, cin).astype(jnp.float32)
        shortcut = None
        if not equal:
            wsc = _hwio(p["convSC"]).reshape(cin, cout).astype(jnp.bfloat16)
            shortcut = (wsc, 4)          # 1x1 stride-1 == centre tap of the 3x3
    else:
        xin = _s2d_input(x_nhwc).astype(jnp.bfloat16)
        w1 = _s2d_conv1_weights(p["conv1"]).astype(jnp.bfloat16)
        kh = kw = 2
        s2d = True
        cin_eff = 4 * cin
        s1 = jnp.tile(scale1, 4).reshape(1, 1, cin_eff).astype(jnp.float32)
        b1 = jnp.tile(shift1, 4).reshape(1, 1, cin_eff).astype(jnp.float32)
        shortcut = None
        if not equal:
            wsc1x1 = _hwio(p["convSC"]).reshape(cin, cout)
            wsc = jnp.zeros((cin_eff, cout), wsc1x1.dtype).at[3 * cin:].set(wsc1x1)
            shortcut = (wsc.astype(jnp.bfloat16), 0)  # tap (0,0), group (p=1,q=1)

    th = _pick_th(ho, wo, n)
    s2e = (scale2.reshape(1, cout).astype(jnp.float32),
           shift2.reshape(1, cout).astype(jnp.float32))

    # conv1: fused bn1+relu1 prologue, bn2+relu2 epilogue and (if needed) the
    # 1x1 shortcut conv as a second output, all from one pass over the input.
    outs = _conv_call(xin, w1, kh=kh, kw=kw, ho=ho, wo=wo, cout=cout, th=th,
                      prologue=(s1, b1), s2d=s2d, group=cin,
                      epilogue_bn=s2e, shortcut=shortcut,
                      out_dtype=jnp.bfloat16)
    if shortcut is None:
        y1_2d = outs
        res_2d = x_nhwc.reshape(n * h * w, cin)   # equal_in_out: raw x, f32
    else:
        y1_2d, res_2d = outs                      # shortcut conv output, bf16

    # dropRate == 0.0 -> dropout branch is a no-op.

    # conv2 (3x3, stride 1) with the residual add fused at the final write.
    y1p = jnp.pad(y1_2d.reshape(n, ho, wo, cout),
                  ((0, 0), (1, 1), (1, 1), (0, 0)))      # zero pad is correct here
    w2 = _hwio(p["conv2"]).reshape(9, cout, cout).astype(jnp.bfloat16)
    out_2d = _conv_call(y1p, w2, kh=3, kw=3, ho=ho, wo=wo, cout=cout, th=th,
                        residual=res_2d, out_dtype=jnp.float32)
    return out_2d.reshape(n, ho, wo, cout)


# --------------------------- module construction ---------------------------- #

def init_basic_block_params(key, in_planes, out_planes):
    keys = jax.random.split(key, 12)
    p = {}
    p["conv1"] = 0.1 * jax.random.normal(keys[0], (out_planes, in_planes, 3, 3),
                                         jnp.float32)
    p["conv2"] = 0.1 * jax.random.normal(keys[1], (out_planes, out_planes, 3, 3),
                                         jnp.float32)
    p["bn1_g"] = 1.0 + 0.1 * jax.random.normal(keys[2], (in_planes,), jnp.float32)
    p["bn1_b"] = 0.1 * jax.random.normal(keys[3], (in_planes,), jnp.float32)
    p["bn1_m"] = 0.1 * jax.random.normal(keys[4], (in_planes,), jnp.float32)
    p["bn1_v"] = jax.random.uniform(keys[5], (in_planes,), jnp.float32, 0.5, 1.5)
    p["bn2_g"] = 1.0 + 0.1 * jax.random.normal(keys[6], (out_planes,), jnp.float32)
    p["bn2_b"] = 0.1 * jax.random.normal(keys[7], (out_planes,), jnp.float32)
    p["bn2_m"] = 0.1 * jax.random.normal(keys[8], (out_planes,), jnp.float32)
    p["bn2_v"] = jax.random.uniform(keys[9], (out_planes,), jnp.float32, 0.5, 1.5)
    if in_planes != out_planes:
        p["convSC"] = 0.1 * jax.random.normal(keys[10],
                                              (out_planes, in_planes, 1, 1),
                                              jnp.float32)
    return p


def init_network_block_params(key, nb_layers, in_planes, out_planes):
    keys = jax.random.split(key, nb_layers)
    params = []
    for i in range(nb_layers):
        ip = in_planes if i == 0 else out_planes
        params.append(init_basic_block_params(keys[i], ip, out_planes))
    return params


def network_block_forward(x_nchw, params, stride):
    """NetworkBlock.forward: sequential BasicBlocks. Input/output are NCHW."""
    x = jnp.transpose(x_nchw, (0, 2, 3, 1))          # NCHW -> NHWC
    for i, p in enumerate(params):
        s = stride if i == 0 else 1
        x = basic_block_forward(x, p, s)
    return jnp.transpose(x, (0, 3, 1, 2))            # NHWC -> NCHW


# ---------------------------- pure-JAX reference ----------------------------- #

def _ref_bn_relu(x_nhwc, g, b, m, v):
    scale, shift = bn_affine(g, b, m, v)
    return jnp.maximum(x_nhwc * scale + shift, 0.0)


def _ref_conv(x_nhwc, w_oihw, stride, pad):
    w_hwio = jnp.transpose(w_oihw, (2, 3, 1, 0))
    return jax.lax.conv_general_dilated(
        x_nhwc, w_hwio, window_strides=(stride, stride),
        padding=((pad, pad), (pad, pad)),
        dimension_numbers=("NHWC", "HWIO", "NHWC"),
        precision=jax.lax.Precision.HIGHEST)


def network_block_reference(x_nchw, params, stride):
    x = jnp.transpose(x_nchw, (0, 2, 3, 1))
    for i, p in enumerate(params):
        s = stride if i == 0 else 1
        out_planes, in_planes = p["conv1"].shape[0], p["conv1"].shape[1]
        bn1 = _ref_bn_relu(x, p["bn1_g"], p["bn1_b"], p["bn1_m"], p["bn1_v"])
        residual = x if in_planes == out_planes else _ref_conv(bn1, p["convSC"], s, 0)
        out = _ref_conv(bn1, p["conv1"], s, 1)
        out = _ref_bn_relu(out, p["bn2_g"], p["bn2_b"], p["bn2_m"], p["bn2_v"])
        out = _ref_conv(out, p["conv2"], 1, 1)
        x = residual + out
    return jnp.transpose(x, (0, 3, 1, 2))


# ---------------------------------- main ------------------------------------ #

if __name__ == "__main__":
    key = jax.random.PRNGKey(0)
    k_x, k_p = jax.random.split(key)

    # Small shapes consistent with a WRN NetworkBlock:
    nb_layers, in_planes, out_planes, stride = 2, 4, 8, 2
    N, H, W = 2, 16, 16

    x = jax.random.normal(k_x, (N, in_planes, H, W), jnp.float32)   # NCHW like PyTorch
    params = init_network_block_params(k_p, nb_layers, in_planes, out_planes)

    fwd = jax.jit(functools.partial(network_block_forward, stride=stride))
    out = jax.block_until_ready(fwd(x, params))

    expected_shape = (N, out_planes, H // stride, W // stride)
    assert out.shape == expected_shape, (out.shape, expected_shape)
    assert bool(jnp.all(jnp.isfinite(out)))

    # Numerical check against a pure-JAX f32 reference (tolerance covers the
    # intentional bf16 activations / matmul inputs with f32 accumulation).
    ref = network_block_reference(x, params, stride)
    max_err = float(jnp.max(jnp.abs(out - ref)))
    max_ref = float(jnp.max(jnp.abs(ref)))
    assert max_err <= 1e-1 * max(1.0, max_ref), (max_err, max_ref)

    print("KERNEL_OK")
</pallas_src>

<mosaic_0001>
module attributes {stable_mosaic.version = 11 : i64} {
  func.func @kernel(%arg0: i32, %arg1: i32, %arg2: memref<1x9x9x16xbf16, #tpu.memory_space<vmem>>, %arg3: memref<4x16x8xbf16, #tpu.memory_space<vmem>>, %arg4: memref<1x1x16xf32, #tpu.memory_space<vmem>>, %arg5: memref<1x1x16xf32, #tpu.memory_space<vmem>>, %arg6: memref<16x8xbf16, #tpu.memory_space<vmem>>, %arg7: memref<1x8xf32, #tpu.memory_space<vmem>>, %arg8: memref<1x8xf32, #tpu.memory_space<vmem>>, %arg9: memref<32x8xbf16, #tpu.memory_space<vmem>>, %arg10: memref<32x8xbf16, #tpu.memory_space<vmem>>) attributes {dimension_semantics = [#tpu.dimension_semantics<parallel>, #tpu.dimension_semantics<parallel>], iteration_bounds = array<i64: 2, 2>, scalar_prefetch = 0 : i64, scratch_operands = 0 : i64, tpu.core_type = #tpu.core_type<tc>, window_params = [{transform_indices = @transform_0, window_bounds = array<i64: 1, 9, 9, 16>}, {pipeline_mode = #tpu.pipeline_mode<synchronous>, transform_indices = @transform_1, window_bounds = array<i64: 4, 16, 8>}, {pipeline_mode = #tpu.pipeline_mode<synchronous>, transform_indices = @transform_2, window_bounds = array<i64: 1, 1, 16>}, {pipeline_mode = #tpu.pipeline_mode<synchronous>, transform_indices = @transform_3, window_bounds = array<i64: 1, 1, 16>}, {pipeline_mode = #tpu.pipeline_mode<synchronous>, transform_indices = @transform_4, window_bounds = array<i64: 16, 8>}, {pipeline_mode = #tpu.pipeline_mode<synchronous>, transform_indices = @transform_5, window_bounds = array<i64: 1, 8>}, {pipeline_mode = #tpu.pipeline_mode<synchronous>, transform_indices = @transform_6, window_bounds = array<i64: 1, 8>}, {transform_indices = @transform_7, window_bounds = array<i64: 32, 8>}, {transform_indices = @transform_8, window_bounds = array<i64: 32, 8>}]} {
    %c4_i32 = arith.constant 4 : i32
    %0 = arith.muli %arg1, %c4_i32 : i32
    %1 = tpu.assume_multiple %0, 4 : i32
    %c0 = arith.constant 0 : index
    %2 = arith.index_cast %1 : i32 to index
    %c0_0 = arith.constant 0 : index
    %c0_1 = arith.constant 0 : index
    %3 = vector.load %arg2[%c0, %2, %c0_0, %c0_1] : memref<1x9x9x16xbf16, #tpu.memory_space<vmem>>, vector<1x5x9x16xbf16>
    %4 = vector.shape_cast %3 : vector<1x5x9x16xbf16> to vector<5x9x16xbf16>
    %5 = arith.extf %4 : vector<5x9x16xbf16> to vector<5x9x16xf32>
    %c0_2 = arith.constant 0 : index
    %c0_3 = arith.constant 0 : index
    %c0_4 = arith.constant 0 : index
    %6 = vector.load %arg4[%c0_2, %c0_3, %c0_4] : memref<1x1x16xf32, #tpu.memory_space<vmem>>, vector<1x1x16xf32>
    %7 = vector.broadcast %6 : vector<1x1x16xf32> to vector<5x9x16xf32>
    %8 = arith.mulf %5, %7 : vector<5x9x16xf32>
    %c0_5 = arith.constant 0 : index
    %c0_6 = arith.constant 0 : index
    %c0_7 = arith.constant 0 : index
    %9 = vector.load %arg5[%c0_5, %c0_6, %c0_7] : memref<1x1x16xf32, #tpu.memory_space<vmem>>, vector<1x1x16xf32>
    %10 = vector.broadcast %9 : vector<1x1x16xf32> to vector<5x9x16xf32>
    %11 = arith.addf %8, %10 : vector<5x9x16xf32>
    %cst = arith.constant 0.000000e+00 : f32
    %12 = vector.broadcast %cst : f32 to vector<5x9x16xf32>
    %13 = arith.maximumf %11, %12 : vector<5x9x16xf32>
    %14 = tpu.iota {dimensions = array<i32: 0>} : vector<5x9x16xi32>
    %15 = vector.broadcast %1 : i32 to vector<5x9x16xi32>
    %16 = arith.addi %14, %15 : vector<5x9x16xi32>
    %17 = tpu.iota {dimensions = array<i32: 1>} : vector<5x9x16xi32>
    %18 = tpu.iota {dimensions = array<i32: 2>} : vector<5x9x16xi32>
    %c8_i32 = arith.constant 8 : i32
    %19 = vector.broadcast %c8_i32 : i32 to vector<5x9x16xi32>
    %20 = arith.cmpi sge, %18, %19 : vector<5x9x16xi32>
    %c4_i32_8 = arith.constant 4 : i32
    %21 = vector.broadcast %c4_i32_8 : i32 to vector<5x9x16xi32>
    %22 = arith.cmpi sge, %18, %21 : vector<5x9x16xi32>
    %c8_i32_9 = arith.constant 8 : i32
    %23 = vector.broadcast %c8_i32_9 : i32 to vector<5x9x16xi32>
    %24 = arith.cmpi slt, %18, %23 : vector<5x9x16xi32>
    %25 = arith.andi %22, %24 : vector<5x9x16xi1>
    %c12_i32 = arith.constant 12 : i32
    %26 = vector.broadcast %c12_i32 : i32 to vector<5x9x16xi32>
    %27 = arith.cmpi sge, %18, %26 : vector<5x9x16xi32>
    %28 = arith.ori %25, %27 : vector<5x9x16xi1>
    %c0_i32 = arith.constant 0 : i32
    %29 = vector.broadcast %c0_i32 : i32 to vector<5x9x16xi32>
    %30 = arith.cmpi eq, %16, %29 : vector<5x9x16xi32>
    %cst_10 = arith.constant dense<true> : vector<5x9x16xi1>
    %31 = arith.xori %20, %cst_10 : vector<5x9x16xi1>
    %32 = arith.andi %30, %31 : vector<5x9x16xi1>
    %c8_i32_11 = arith.constant 8 : i32
    %33 = vector.broadcast %c8_i32_11 : i32 to vector<5x9x16xi32>
    %34 = arith.cmpi eq, %16, %33 : vector<5x9x16xi32>
    %35 = arith.andi %34, %20 : vector<5x9x16xi1>
    %36 = arith.ori %32, %35 : vector<5x9x16xi1>
    %c0_i32_12 = arith.constant 0 : i32
    %37 = vector.broadcast %c0_i32_12 : i32 to vector<5x9x16xi32>
    %38 = arith.cmpi eq, %17, %37 : vector<5x9x16xi32>
    %cst_13 = arith.constant dense<true> : vector<5x9x16xi1>
    %39 = arith.xori %28, %cst_13 : vector<5x9x16xi1>
    %40 = arith.andi %38, %39 : vector<5x9x16xi1>
    %c8_i32_14 = arith.constant 8 : i32
    %41 = vector.broadcast %c8_i32_14 : i32 to vector<5x9x16xi32>
    %42 = arith.cmpi eq, %17, %41 : vector<5x9x16xi32>
    %43 = arith.andi %42, %28 : vector<5x9x16xi1>
    %44 = arith.ori %40, %43 : vector<5x9x16xi1>
    %45 = arith.ori %36, %44 : vector<5x9x16xi1>
    %cst_15 = arith.constant 0.000000e+00 : f32
    %46 = vector.broadcast %cst_15 : f32 to vector<5x9x16xf32>
    %47 = arith.select %45, %46, %13 : vector<5x9x16xi1>, vector<5x9x16xf32>
    %cst_16 = arith.constant 0.000000e+00 : f32
    %48 = vector.broadcast %cst_16 : f32 to vector<32x8xf32>
    %cst_17 = arith.constant 0.000000e+00 : f32
    %49 = vector.broadcast %cst_17 : f32 to vector<32x8xf32>
    %50 = vector.extract_strided_slice %47 {offsets = [0, 0, 0], sizes = [4, 8, 16], strides = [1, 1, 1]} : vector<5x9x16xf32> to vector<4x8x16xf32>
    %51 = vector.shape_cast %50 : vector<4x8x16xf32> to vector<32x16xf32>
    %52 = arith.truncf %51 : vector<32x16xf32> to vector<32x16xbf16>
    %c0_18 = arith.constant 0 : index
    %c0_19 = arith.constant 0 : index
    %c0_20 = arith.constant 0 : index
    %53 = vector.load %arg3[%c0_18, %c0_19, %c0_20] : memref<4x16x8xbf16, #tpu.memory_space<vmem>>, vector<1x16x8xbf16>
    %54 = vector.shape_cast %53 : vector<1x16x8xbf16> to vector<16x8xbf16>
    %cst_21 = arith.constant dense<0.000000e+00> : vector<32x8xf32>
    %55 = tpu.matmul %52, %54, %cst_21 {dimension_numbers = #tpu.dot_dimension_numbers<[1], [0], [0], [1], [0, 0, 1, 1], [], []>} : vector<32x16xbf16>, vector<16x8xbf16>, vector<32x8xf32> -> vector<32x8xf32>
    %56 = arith.addf %48, %55 : vector<32x8xf32>
    %c0_22 = arith.constant 0 : index
    %c0_23 = arith.constant 0 : index
    %57 = vector.load %arg6[%c0_22, %c0_23] : memref<16x8xbf16, #tpu.memory_space<vmem>>, vector<16x8xbf16>
    %cst_24 = arith.constant dense<0.000000e+00> : vector<32x8xf32>
    %58 = tpu.matmul %52, %57, %cst_24 {dimension_numbers = #tpu.dot_dimension_numbers<[1], [0], [0], [1], [0, 0, 1, 1], [], []>} : vector<32x16xbf16>, vector<16x8xbf16>, vector<32x8xf32> -> vector<32x8xf32>
    %59 = arith.addf %49, %58 : vector<32x8xf32>
    %60 = vector.extract_strided_slice %47 {offsets = [0, 1, 0], sizes = [4, 8, 16], strides = [1, 1, 1]} : vector<5x9x16xf32> to vector<4x8x16xf32>
    %61 = vector.shape_cast %60 : vector<4x8x16xf32> to vector<32x16xf32>
    %62 = arith.truncf %61 : vector<32x16xf32> to vector<32x16xbf16>
    %c1 = arith.constant 1 : index
    %c0_25 = arith.constant 0 : index
    %c0_26 = arith.constant 0 : index
    %63 = vector.load %arg3[%c1, %c0_25, %c0_26] : memref<4x16x8xbf16, #tpu.memory_space<vmem>>, vector<1x16x8xbf16>
    %64 = vector.shape_cast %63 : vector<1x16x8xbf16> to vector<16x8xbf16>
    %cst_27 = arith.constant dense<0.000000e+00> : vector<32x8xf32>
    %65 = tpu.matmul %62, %64, %cst_27 {dimension_numbers = #tpu.dot_dimension_numbers<[1], [0], [0], [1], [0, 0, 1, 1], [], []>} : vector<32x16xbf16>, vector<16x8xbf16>, vector<32x8xf32> -> vector<32x8xf32>
    %66 = arith.addf %56, %65 : vector<32x8xf32>
    %67 = vector.extract_strided_slice %47 {offsets = [1, 0, 0], sizes = [4, 8, 16], strides = [1, 1, 1]} : vector<5x9x16xf32> to vector<4x8x16xf32>
    %68 = vector.shape_cast %67 : vector<4x8x16xf32> to vector<32x16xf32>
    %69 = arith.truncf %68 : vector<32x16xf32> to vector<32x16xbf16>
    %c2 = arith.constant 2 : index
    %c0_28 = arith.constant 0 : index
    %c0_29 = arith.constant 0 : index
    %70 = vector.load %arg3[%c2, %c0_28, %c0_29] : memref<4x16x8xbf16, #tpu.memory_space<vmem>>, vector<1x16x8xbf16>
    %71 = vector.shape_cast %70 : vector<1x16x8xbf16> to vector<16x8xbf16>
    %cst_30 = arith.constant dense<0.000000e+00> : vector<32x8xf32>
    %72 = tpu.matmul %69, %71, %cst_30 {dimension_numbers = #tpu.dot_dimension_numbers<[1], [0], [0], [1], [0, 0, 1, 1], [], []>} : vector<32x16xbf16>, vector<16x8xbf16>, vector<32x8xf32> -> vector<32x8xf32>
    %73 = arith.addf %66, %72 : vector<32x8xf32>
    %74 = vector.extract_strided_slice %47 {offsets = [1, 1, 0], sizes = [4, 8, 16], strides = [1, 1, 1]} : vector<5x9x16xf32> to vector<4x8x16xf32>
    %75 = vector.shape_cast %74 : vector<4x8x16xf32> to vector<32x16xf32>
    %76 = arith.truncf %75 : vector<32x16xf32> to vector<32x16xbf16>
    %c3 = arith.constant 3 : index
    %c0_31 = arith.constant 0 : index
    %c0_32 = arith.constant 0 : index
    %77 = vector.load %arg3[%c3, %c0_31, %c0_32] : memref<4x16x8xbf16, #tpu.memory_space<vmem>>, vector<1x16x8xbf16>
    %78 = vector.shape_cast %77 : vector<1x16x8xbf16> to vector<16x8xbf16>
    %cst_33 = arith.constant dense<0.000000e+00> : vector<32x8xf32>
    %79 = tpu.matmul %76, %78, %cst_33 {dimension_numbers = #tpu.dot_dimension_numbers<[1], [0], [0], [1], [0, 0, 1, 1], [], []>} : vector<32x16xbf16>, vector<16x8xbf16>, vector<32x8xf32> -> vector<32x8xf32>
    %80 = arith.addf %73, %79 : vector<32x8xf32>
    %c0_34 = arith.constant 0 : index
    %c0_35 = arith.constant 0 : index
    %81 = vector.load %arg7[%c0_34, %c0_35] : memref<1x8xf32, #tpu.memory_space<vmem>>, vector<1x8xf32>
    %82 = vector.broadcast %81 : vector<1x8xf32> to vector<32x8xf32>
    %83 = arith.mulf %80, %82 : vector<32x8xf32>
    %c0_36 = arith.constant 0 : index
    %c0_37 = arith.constant 0 : index
    %84 = vector.load %arg8[%c0_36, %c0_37] : memref<1x8xf32, #tpu.memory_space<vmem>>, vector<1x8xf32>
    %85 = vector.broadcast %84 : vector<1x8xf32> to vector<32x8xf32>
    %86 = arith.addf %83, %85 : vector<32x8xf32>
    %cst_38 = arith.constant 0.000000e+00 : f32
    %87 = vector.broadcast %cst_38 : f32 to vector<32x8xf32>
    %88 = arith.maximumf %86, %87 : vector<32x8xf32>
    %89 = arith.truncf %88 : vector<32x8xf32> to vector<32x8xbf16>
    %c0_39 = arith.constant 0 : index
    %c0_40 = arith.constant 0 : index
    %90 = vector.load %arg9[%c0_39, %c0_40] : memref<32x8xbf16, #tpu.memory_space<vmem>>, vector<32x8xbf16>
    tpu.vector_store %arg9[%c0_39, %c0_40], %89 {strides = array<i32>} : memref<32x8xbf16, #tpu.memory_space<vmem>>, vector<32x8xbf16>,
    %91 = arith.truncf %59 : vector<32x8xf32> to vector<32x8xbf16>
    %c0_41 = arith.constant 0 : index
    %c0_42 = arith.constant 0 : index
    %92 = vector.load %arg10[%c0_41, %c0_42] : memref<32x8xbf16, #tpu.memory_space<vmem>>, vector<32x8xbf16>
    tpu.vector_store %arg10[%c0_41, %c0_42], %91 {strides = array<i32>} : memref<32x8xbf16, #tpu.memory_space<vmem>>, vector<32x8xbf16>,
    return
  }
  func.func @transform_0(%arg0: i32, %arg1: i32) -> (i32, i32, i32, i32) {
    %c0_i32 = arith.constant 0 : i32
    %c0_i32_0 = arith.constant 0 : i32
    %c0_i32_1 = arith.constant 0 : i32
    %c0_i32_2 = arith.constant 0 : i32
    return %arg0, %c0_i32, %c0_i32_0, %c0_i32_1 : i32, i32, i32, i32
  }
  func.func @transform_1(%arg0: i32, %arg1: i32) -> (i32, i32, i32) {
    %c0_i32 = arith.constant 0 : i32
    %c0_i32_0 = arith.constant 0 : i32
    %c0_i32_1 = arith.constant 0 : i32
    %c0_i32_2 = arith.constant 0 : i32
    return %c0_i32, %c0_i32_0, %c0_i32_1 : i32, i32, i32
  }
  func.func @transform_2(%arg0: i32, %arg1: i32) -> (i32, i32, i32) {
    %c0_i32 = arith.constant 0 : i32
    %c0_i32_0 = arith.constant 0 : i32
    %c0_i32_1 = arith.constant 0 : i32
    %c0_i32_2 = arith.constant 0 : i32
    return %c0_i32, %c0_i32_0, %c0_i32_1 : i32, i32, i32
  }
  func.func @transform_3(%arg0: i32, %arg1: i32) -> (i32, i32, i32) {
    %c0_i32 = arith.constant 0 : i32
    %c0_i32_0 = arith.constant 0 : i32
    %c0_i32_1 = arith.constant 0 : i32
    %c0_i32_2 = arith.constant 0 : i32
    return %c0_i32, %c0_i32_0, %c0_i32_1 : i32, i32, i32
  }
  func.func @transform_4(%arg0: i32, %arg1: i32) -> (i32, i32) {
    %c0_i32 = arith.constant 0 : i32
    %c0_i32_0 = arith.constant 0 : i32
    %c0_i32_1 = arith.constant 0 : i32
    return %c0_i32, %c0_i32_0 : i32, i32
  }
  func.func @transform_5(%arg0: i32, %arg1: i32) -> (i32, i32) {
    %c0_i32 = arith.constant 0 : i32
    %c0_i32_0 = arith.constant 0 : i32
    %c0_i32_1 = arith.constant 0 : i32
    return %c0_i32, %c0_i32_0 : i32, i32
  }
  func.func @transform_6(%arg0: i32, %arg1: i32) -> (i32, i32) {
    %c0_i32 = arith.constant 0 : i32
    %c0_i32_0 = arith.constant 0 : i32
    %c0_i32_1 = arith.constant 0 : i32
    return %c0_i32, %c0_i32_0 : i32, i32
  }
  func.func @transform_7(%arg0: i32, %arg1: i32) -> (i32, i32) {
    %c2_i32 = arith.constant 2 : i32
    %0 = arith.muli %arg0, %c2_i32 : i32
    %1 = arith.addi %0, %arg1 : i32
    %c0_i32 = arith.constant 0 : i32
    %c0_i32_0 = arith.constant 0 : i32
    return %1, %c0_i32 : i32, i32
  }
  func.func @transform_8(%arg0: i32, %arg1: i32) -> (i32, i32) {
    %c2_i32 = arith.constant 2 : i32
    %0 = arith.muli %arg0, %c2_i32 : i32
    %1 = arith.addi %0, %arg1 : i32
    %c0_i32 = arith.constant 0 : i32
    %c0_i32_0 = arith.constant 0 : i32
    return %1, %c0_i32 : i32, i32
  }
}

module attributes {stable_mosaic.version = 11 : i64} {
  func.func @kernel(%arg0: i32, %arg1: i32, %arg2: memref<1x10x10x8xbf16, #tpu.memory_space<vmem>>, %arg3: memref<9x8x8xbf16, #tpu.memory_space<vmem>>, %arg4: memref<32x8xbf16, #tpu.memory_space<vmem>>, %arg5: memref<32x8xf32, #tpu.memory_space<vmem>>) attributes {dimension_semantics = [#tpu.dimension_semantics<parallel>, #tpu.dimension_semantics<parallel>], iteration_bounds = array<i64: 2, 2>, scalar_prefetch = 0 : i64, scratch_operands = 0 : i64, tpu.core_type = #tpu.core_type<tc>, window_params = [{transform_indices = @transform_0, window_bounds = array<i64: 1, 10, 10, 8>}, {pipeline_mode = #tpu.pipeline_mode<synchronous>, transform_indices = @transform_1, window_bounds = array<i64: 9, 8, 8>}, {transform_indices = @transform_2, window_bounds = array<i64: 32, 8>}, {transform_indices = @transform_3, window_bounds = array<i64: 32, 8>}]} {
    %c4_i32 = arith.constant 4 : i32
    %0 = arith.muli %arg1, %c4_i32 : i32
    %1 = tpu.assume_multiple %0, 4 : i32
    %c0 = arith.constant 0 : index
    %2 = arith.index_cast %1 : i32 to index
    %c0_0 = arith.constant 0 : index
    %c0_1 = arith.constant 0 : index
    %3 = vector.load %arg2[%c0, %2, %c0_0, %c0_1] : memref<1x10x10x8xbf16, #tpu.memory_space<vmem>>, vector<1x6x10x8xbf16>
    %4 = vector.shape_cast %3 : vector<1x6x10x8xbf16> to vector<6x10x8xbf16>
    %5 = arith.extf %4 : vector<6x10x8xbf16> to vector<6x10x8xf32>
    %cst = arith.constant 0.000000e+00 : f32
    %6 = vector.broadcast %cst : f32 to vector<32x8xf32>
    %7 = vector.extract_strided_slice %5 {offsets = [0, 0, 0], sizes = [4, 8, 8], strides = [1, 1, 1]} : vector<6x10x8xf32> to vector<4x8x8xf32>
    %8 = vector.shape_cast %7 : vector<4x8x8xf32> to vector<32x8xf32>
    %9 = arith.truncf %8 : vector<32x8xf32> to vector<32x8xbf16>
    %c0_2 = arith.constant 0 : index
    %c0_3 = arith.constant 0 : index
    %c0_4 = arith.constant 0 : index
    %10 = vector.load %arg3[%c0_2, %c0_3, %c0_4] : memref<9x8x8xbf16, #tpu.memory_space<vmem>>, vector<1x8x8xbf16>
    %11 = vector.shape_cast %10 : vector<1x8x8xbf16> to vector<8x8xbf16>
    %cst_5 = arith.constant dense<0.000000e+00> : vector<32x8xf32>
    %12 = tpu.matmul %9, %11, %cst_5 {dimension_numbers = #tpu.dot_dimension_numbers<[1], [0], [0], [1], [0, 0, 1, 1], [], []>} : vector<32x8xbf16>, vector<8x8xbf16>, vector<32x8xf32> -> vector<32x8xf32>
    %13 = arith.addf %6, %12 : vector<32x8xf32>
    %14 = vector.extract_strided_slice %5 {offsets = [0, 1, 0], sizes = [4, 8, 8], strides = [1, 1, 1]} : vector<6x10x8xf32> to vector<4x8x8xf32>
    %15 = vector.shape_cast %14 : vector<4x8x8xf32> to vector<32x8xf32>
    %16 = arith.truncf %15 : vector<32x8xf32> to vector<32x8xbf16>
    %c1 = arith.constant 1 : index
    %c0_6 = arith.constant 0 : index
    %c0_7 = arith.constant 0 : index
    %17 = vector.load %arg3[%c1, %c0_6, %c0_7] : memref<9x8x8xbf16, #tpu.memory_space<vmem>>, vector<1x8x8xbf16>
    %18 = vector.shape_cast %17 : vector<1x8x8xbf16> to vector<8x8xbf16>
    %cst_8 = arith.constant dense<0.000000e+00> : vector<32x8xf32>
    %19 = tpu.matmul %16, %18, %cst_8 {dimension_numbers = #tpu.dot_dimension_numbers<[1], [0], [0], [1], [0, 0, 1, 1], [], []>} : vector<32x8xbf16>, vector<8x8xbf16>, vector<32x8xf32> -> vector<32x8xf32>
    %20 = arith.addf %13, %19 : vector<32x8xf32>
    %21 = vector.extract_strided_slice %5 {offsets = [0, 2, 0], sizes = [4, 8, 8], strides = [1, 1, 1]} : vector<6x10x8xf32> to vector<4x8x8xf32>
    %22 = vector.shape_cast %21 : vector<4x8x8xf32> to vector<32x8xf32>
    %23 = arith.truncf %22 : vector<32x8xf32> to vector<32x8xbf16>
    %c2 = arith.constant 2 : index
    %c0_9 = arith.constant 0 : index
    %c0_10 = arith.constant 0 : index
    %24 = vector.load %arg3[%c2, %c0_9, %c0_10] : memref<9x8x8xbf16, #tpu.memory_space<vmem>>, vector<1x8x8xbf16>
    %25 = vector.shape_cast %24 : vector<1x8x8xbf16> to vector<8x8xbf16>
    %cst_11 = arith.constant dense<0.000000e+00> : vector<32x8xf32>
    %26 = tpu.matmul %23, %25, %cst_11 {dimension_numbers = #tpu.dot_dimension_numbers<[1], [0], [0], [1], [0, 0, 1, 1], [], []>} : vector<32x8xbf16>, vector<8x8xbf16>, vector<32x8xf32> -> vector<32x8xf32>
    %27 = arith.addf %20, %26 : vector<32x8xf32>
    %28 = vector.extract_strided_slice %5 {offsets = [1, 0, 0], sizes = [4, 8, 8], strides = [1, 1, 1]} : vector<6x10x8xf32> to vector<4x8x8xf32>
    %29 = vector.shape_cast %28 : vector<4x8x8xf32> to vector<32x8xf32>
    %30 = arith.truncf %29 : vector<32x8xf32> to vector<32x8xbf16>
    %c3 = arith.constant 3 : index
    %c0_12 = arith.constant 0 : index
    %c0_13 = arith.constant 0 : index
    %31 = vector.load %arg3[%c3, %c0_12, %c0_13] : memref<9x8x8xbf16, #tpu.memory_space<vmem>>, vector<1x8x8xbf16>
    %32 = vector.shape_cast %31 : vector<1x8x8xbf16> to vector<8x8xbf16>
    %cst_14 = arith.constant dense<0.000000e+00> : vector<32x8xf32>
    %33 = tpu.matmul %30, %32, %cst_14 {dimension_numbers = #tpu.dot_dimension_numbers<[1], [0], [0], [1], [0, 0, 1, 1], [], []>} : vector<32x8xbf16>, vector<8x8xbf16>, vector<32x8xf32> -> vector<32x8xf32>
    %34 = arith.addf %27, %33 : vector<32x8xf32>
    %35 = vector.extract_strided_slice %5 {offsets = [1, 1, 0], sizes = [4, 8, 8], strides = [1, 1, 1]} : vector<6x10x8xf32> to vector<4x8x8xf32>
    %36 = vector.shape_cast %35 : vector<4x8x8xf32> to vector<32x8xf32>
    %37 = arith.truncf %36 : vector<32x8xf32> to vector<32x8xbf16>
    %c4 = arith.constant 4 : index
    %c0_15 = arith.constant 0 : index
    %c0_16 = arith.constant 0 : index
    %38 = vector.load %arg3[%c4, %c0_15, %c0_16] : memref<9x8x8xbf16, #tpu.memory_space<vmem>>, vector<1x8x8xbf16>
    %39 = vector.shape_cast %38 : vector<1x8x8xbf16> to vector<8x8xbf16>
    %cst_17 = arith.constant dense<0.000000e+00> : vector<32x8xf32>
    %40 = tpu.matmul %37, %39, %cst_17 {dimension_numbers = #tpu.dot_dimension_numbers<[1], [0], [0], [1], [0, 0, 1, 1], [], []>} : vector<32x8xbf16>, vector<8x8xbf16>, vector<32x8xf32> -> vector<32x8xf32>
    %41 = arith.addf %34, %40 : vector<32x8xf32>
    %42 = vector.extract_strided_slice %5 {offsets = [1, 2, 0], sizes = [4, 8, 8], strides = [1, 1, 1]} : vector<6x10x8xf32> to vector<4x8x8xf32>
    %43 = vector.shape_cast %42 : vector<4x8x8xf32> to vector<32x8xf32>
    %44 = arith.truncf %43 : vector<32x8xf32> to vector<32x8xbf16>
    %c5 = arith.constant 5 : index
    %c0_18 = arith.constant 0 : index
    %c0_19 = arith.constant 0 : index
    %45 = vector.load %arg3[%c5, %c0_18, %c0_19] : memref<9x8x8xbf16, #tpu.memory_space<vmem>>, vector<1x8x8xbf16>
    %46 = vector.shape_cast %45 : vector<1x8x8xbf16> to vector<8x8xbf16>
    %cst_20 = arith.constant dense<0.000000e+00> : vector<32x8xf32>
    %47 = tpu.matmul %44, %46, %cst_20 {dimension_numbers = #tpu.dot_dimension_numbers<[1], [0], [0], [1], [0, 0, 1, 1], [], []>} : vector<32x8xbf16>, vector<8x8xbf16>, vector<32x8xf32> -> vector<32x8xf32>
    %48 = arith.addf %41, %47 : vector<32x8xf32>
    %49 = vector.extract_strided_slice %5 {offsets = [2, 0, 0], sizes = [4, 8, 8], strides = [1, 1, 1]} : vector<6x10x8xf32> to vector<4x8x8xf32>
    %50 = vector.shape_cast %49 : vector<4x8x8xf32> to vector<32x8xf32>
    %51 = arith.truncf %50 : vector<32x8xf32> to vector<32x8xbf16>
    %c6 = arith.constant 6 : index
    %c0_21 = arith.constant 0 : index
    %c0_22 = arith.constant 0 : index
    %52 = vector.load %arg3[%c6, %c0_21, %c0_22] : memref<9x8x8xbf16, #tpu.memory_space<vmem>>, vector<1x8x8xbf16>
    %53 = vector.shape_cast %52 : vector<1x8x8xbf16> to vector<8x8xbf16>
    %cst_23 = arith.constant dense<0.000000e+00> : vector<32x8xf32>
    %54 = tpu.matmul %51, %53, %cst_23 {dimension_numbers = #tpu.dot_dimension_numbers<[1], [0], [0], [1], [0, 0, 1, 1], [], []>} : vector<32x8xbf16>, vector<8x8xbf16>, vector<32x8xf32> -> vector<32x8xf32>
    %55 = arith.addf %48, %54 : vector<32x8xf32>
    %56 = vector.extract_strided_slice %5 {offsets = [2, 1, 0], sizes = [4, 8, 8], strides = [1, 1, 1]} : vector<6x10x8xf32> to vector<4x8x8xf32>
    %57 = vector.shape_cast %56 : vector<4x8x8xf32> to vector<32x8xf32>
    %58 = arith.truncf %57 : vector<32x8xf32> to vector<32x8xbf16>
    %c7 = arith.constant 7 : index
    %c0_24 = arith.constant 0 : index
    %c0_25 = arith.constant 0 : index
    %59 = vector.load %arg3[%c7, %c0_24, %c0_25] : memref<9x8x8xbf16, #tpu.memory_space<vmem>>, vector<1x8x8xbf16>
    %60 = vector.shape_cast %59 : vector<1x8x8xbf16> to vector<8x8xbf16>
    %cst_26 = arith.constant dense<0.000000e+00> : vector<32x8xf32>
    %61 = tpu.matmul %58, %60, %cst_26 {dimension_numbers = #tpu.dot_dimension_numbers<[1], [0], [0], [1], [0, 0, 1, 1], [], []>} : vector<32x8xbf16>, vector<8x8xbf16>, vector<32x8xf32> -> vector<32x8xf32>
    %62 = arith.addf %55, %61 : vector<32x8xf32>
    %63 = vector.extract_strided_slice %5 {offsets = [2, 2, 0], sizes = [4, 8, 8], strides = [1, 1, 1]} : vector<6x10x8xf32> to vector<4x8x8xf32>
    %64 = vector.shape_cast %63 : vector<4x8x8xf32> to vector<32x8xf32>
    %65 = arith.truncf %64 : vector<32x8xf32> to vector<32x8xbf16>
    %c8 = arith.constant 8 : index
    %c0_27 = arith.constant 0 : index
    %c0_28 = arith.constant 0 : index
    %66 = vector.load %arg3[%c8, %c0_27, %c0_28] : memref<9x8x8xbf16, #tpu.memory_space<vmem>>, vector<1x8x8xbf16>
    %67 = vector.shape_cast %66 : vector<1x8x8xbf16> to vector<8x8xbf16>
    %cst_29 = arith.constant dense<0.000000e+00> : vector<32x8xf32>
    %68 = tpu.matmul %65, %67, %cst_29 {dimension_numbers = #tpu.dot_dimension_numbers<[1], [0], [0], [1], [0, 0, 1, 1], [], []>} : vector<32x8xbf16>, vector<8x8xbf16>, vector<32x8xf32> -> vector<32x8xf32>
    %69 = arith.addf %62, %68 : vector<32x8xf32>
    %c0_30 = arith.constant 0 : index
    %c0_31 = arith.constant 0 : index
    %70 = vector.load %arg4[%c0_30, %c0_31] : memref<32x8xbf16, #tpu.memory_space<vmem>>, vector<32x8xbf16>
    %71 = arith.extf %70 : vector<32x8xbf16> to vector<32x8xf32>
    %72 = arith.addf %69, %71 : vector<32x8xf32>
    %c0_32 = arith.constant 0 : index
    %c0_33 = arith.constant 0 : index
    %73 = vector.load %arg5[%c0_32, %c0_33] : memref<32x8xf32, #tpu.memory_space<vmem>>, vector<32x8xf32>
    tpu.vector_store %arg5[%c0_32, %c0_33], %72 {strides = array<i32>} : memref<32x8xf32, #tpu.memory_space<vmem>>, vector<32x8xf32>,
    return
  }
  func.func @transform_0(%arg0: i32, %arg1: i32) -> (i32, i32, i32, i32) {
    %c0_i32 = arith.constant 0 : i32
    %c0_i32_0 = arith.constant 0 : i32
    %c0_i32_1 = arith.constant 0 : i32
    %c0_i32_2 = arith.constant 0 : i32
    return %arg0, %c0_i32, %c0_i32_0, %c0_i32_1 : i32, i32, i32, i32
  }
  func.func @transform_1(%arg0: i32, %arg1: i32) -> (i32, i32, i32) {
    %c0_i32 = arith.constant 0 : i32
    %c0_i32_0 = arith.constant 0 : i32
    %c0_i32_1 = arith.constant 0 : i32
    %c0_i32_2 = arith.constant 0 : i32
    return %c0_i32, %c0_i32_0, %c0_i32_1 : i32, i32, i32
  }
  func.func @transform_2(%arg0: i32, %arg1: i32) -> (i32, i32) {
    %c2_i32 = arith.constant 2 : i32
    %0 = arith.muli %arg0, %c2_i32 : i32
    %1 = arith.addi %0, %arg1 : i32
    %c0_i32 = arith.constant 0 : i32
    %c0_i32_0 = arith.constant 0 : i32
    return %1, %c0_i32 : i32, i32
  }
  func.func @transform_3(%arg0: i32, %arg1: i32) -> (i32, i32) {
    %c2_i32 = arith.constant 2 : i32
    %0 = arith.muli %arg0, %c2_i32 : i32
    %1 = arith.addi %0, %arg1 : i32
    %c0_i32 = arith.constant 0 : i32
    %c0_i32_0 = arith.constant 0 : i32
    return %1, %c0_i32 : i32, i32
  }
}

module attributes {stable_mosaic.version = 11 : i64} {
  func.func @kernel(%arg0: i32, %arg1: i32, %arg2: memref<1x10x10x8xbf16, #tpu.memory_space<vmem>>, %arg3: memref<9x8x8xbf16, #tpu.memory_space<vmem>>, %arg4: memref<32x8xf32, #tpu.memory_space<vmem>>, %arg5: memref<32x8xf32, #tpu.memory_space<vmem>>) attributes {dimension_semantics = [#tpu.dimension_semantics<parallel>, #tpu.dimension_semantics<parallel>], iteration_bounds = array<i64: 2, 2>, scalar_prefetch = 0 : i64, scratch_operands = 0 : i64, tpu.core_type = #tpu.core_type<tc>, window_params = [{transform_indices = @transform_0, window_bounds = array<i64: 1, 10, 10, 8>}, {pipeline_mode = #tpu.pipeline_mode<synchronous>, transform_indices = @transform_1, window_bounds = array<i64: 9, 8, 8>}, {transform_indices = @transform_2, window_bounds = array<i64: 32, 8>}, {transform_indices = @transform_3, window_bounds = array<i64: 32, 8>}]} {
    %c4_i32 = arith.constant 4 : i32
    %0 = arith.muli %arg1, %c4_i32 : i32
    %1 = tpu.assume_multiple %0, 4 : i32
    %c0 = arith.constant 0 : index
    %2 = arith.index_cast %1 : i32 to index
    %c0_0 = arith.constant 0 : index
    %c0_1 = arith.constant 0 : index
    %3 = vector.load %arg2[%c0, %2, %c0_0, %c0_1] : memref<1x10x10x8xbf16, #tpu.memory_space<vmem>>, vector<1x6x10x8xbf16>
    %4 = vector.shape_cast %3 : vector<1x6x10x8xbf16> to vector<6x10x8xbf16>
    %5 = arith.extf %4 : vector<6x10x8xbf16> to vector<6x10x8xf32>
    %cst = arith.constant 0.000000e+00 : f32
    %6 = vector.broadcast %cst : f32 to vector<32x8xf32>
    %7 = vector.extract_strided_slice %5 {offsets = [0, 0, 0], sizes = [4, 8, 8], strides = [1, 1, 1]} : vector<6x10x8xf32> to vector<4x8x8xf32>
    %8 = vector.shape_cast %7 : vector<4x8x8xf32> to vector<32x8xf32>
    %9 = arith.truncf %8 : vector<32x8xf32> to vector<32x8xbf16>
    %c0_2 = arith.constant 0 : index
    %c0_3 = arith.constant 0 : index
    %c0_4 = arith.constant 0 : index
    %10 = vector.load %arg3[%c0_2, %c0_3, %c0_4] : memref<9x8x8xbf16, #tpu.memory_space<vmem>>, vector<1x8x8xbf16>
    %11 = vector.shape_cast %10 : vector<1x8x8xbf16> to vector<8x8xbf16>
    %cst_5 = arith.constant dense<0.000000e+00> : vector<32x8xf32>
    %12 = tpu.matmul %9, %11, %cst_5 {dimension_numbers = #tpu.dot_dimension_numbers<[1], [0], [0], [1], [0, 0, 1, 1], [], []>} : vector<32x8xbf16>, vector<8x8xbf16>, vector<32x8xf32> -> vector<32x8xf32>
    %13 = arith.addf %6, %12 : vector<32x8xf32>
    %14 = vector.extract_strided_slice %5 {offsets = [0, 1, 0], sizes = [4, 8, 8], strides = [1, 1, 1]} : vector<6x10x8xf32> to vector<4x8x8xf32>
    %15 = vector.shape_cast %14 : vector<4x8x8xf32> to vector<32x8xf32>
    %16 = arith.truncf %15 : vector<32x8xf32> to vector<32x8xbf16>
    %c1 = arith.constant 1 : index
    %c0_6 = arith.constant 0 : index
    %c0_7 = arith.constant 0 : index
    %17 = vector.load %arg3[%c1, %c0_6, %c0_7] : memref<9x8x8xbf16, #tpu.memory_space<vmem>>, vector<1x8x8xbf16>
    %18 = vector.shape_cast %17 : vector<1x8x8xbf16> to vector<8x8xbf16>
    %cst_8 = arith.constant dense<0.000000e+00> : vector<32x8xf32>
    %19 = tpu.matmul %16, %18, %cst_8 {dimension_numbers = #tpu.dot_dimension_numbers<[1], [0], [0], [1], [0, 0, 1, 1], [], []>} : vector<32x8xbf16>, vector<8x8xbf16>, vector<32x8xf32> -> vector<32x8xf32>
    %20 = arith.addf %13, %19 : vector<32x8xf32>
    %21 = vector.extract_strided_slice %5 {offsets = [0, 2, 0], sizes = [4, 8, 8], strides = [1, 1, 1]} : vector<6x10x8xf32> to vector<4x8x8xf32>
    %22 = vector.shape_cast %21 : vector<4x8x8xf32> to vector<32x8xf32>
    %23 = arith.truncf %22 : vector<32x8xf32> to vector<32x8xbf16>
    %c2 = arith.constant 2 : index
    %c0_9 = arith.constant 0 : index
    %c0_10 = arith.constant 0 : index
    %24 = vector.load %arg3[%c2, %c0_9, %c0_10] : memref<9x8x8xbf16, #tpu.memory_space<vmem>>, vector<1x8x8xbf16>
    %25 = vector.shape_cast %24 : vector<1x8x8xbf16> to vector<8x8xbf16>
    %cst_11 = arith.constant dense<0.000000e+00> : vector<32x8xf32>
    %26 = tpu.matmul %23, %25, %cst_11 {dimension_numbers = #tpu.dot_dimension_numbers<[1], [0], [0], [1], [0, 0, 1, 1], [], []>} : vector<32x8xbf16>, vector<8x8xbf16>, vector<32x8xf32> -> vector<32x8xf32>
    %27 = arith.addf %20, %26 : vector<32x8xf32>
    %28 = vector.extract_strided_slice %5 {offsets = [1, 0, 0], sizes = [4, 8, 8], strides = [1, 1, 1]} : vector<6x10x8xf32> to vector<4x8x8xf32>
    %29 = vector.shape_cast %28 : vector<4x8x8xf32> to vector<32x8xf32>
    %30 = arith.truncf %29 : vector<32x8xf32> to vector<32x8xbf16>
    %c3 = arith.constant 3 : index
    %c0_12 = arith.constant 0 : index
    %c0_13 = arith.constant 0 : index
    %31 = vector.load %arg3[%c3, %c0_12, %c0_13] : memref<9x8x8xbf16, #tpu.memory_space<vmem>>, vector<1x8x8xbf16>
    %32 = vector.shape_cast %31 : vector<1x8x8xbf16> to vector<8x8xbf16>
    %cst_14 = arith.constant dense<0.000000e+00> : vector<32x8xf32>
    %33 = tpu.matmul %30, %32, %cst_14 {dimension_numbers = #tpu.dot_dimension_numbers<[1], [0], [0], [1], [0, 0, 1, 1], [], []>} : vector<32x8xbf16>, vector<8x8xbf16>, vector<32x8xf32> -> vector<32x8xf32>
    %34 = arith.addf %27, %33 : vector<32x8xf32>
    %35 = vector.extract_strided_slice %5 {offsets = [1, 1, 0], sizes = [4, 8, 8], strides = [1, 1, 1]} : vector<6x10x8xf32> to vector<4x8x8xf32>
    %36 = vector.shape_cast %35 : vector<4x8x8xf32> to vector<32x8xf32>
    %37 = arith.truncf %36 : vector<32x8xf32> to vector<32x8xbf16>
    %c4 = arith.constant 4 : index
    %c0_15 = arith.constant 0 : index
    %c0_16 = arith.constant 0 : index
    %38 = vector.load %arg3[%c4, %c0_15, %c0_16] : memref<9x8x8xbf16, #tpu.memory_space<vmem>>, vector<1x8x8xbf16>
    %39 = vector.shape_cast %38 : vector<1x8x8xbf16> to vector<8x8xbf16>
    %cst_17 = arith.constant dense<0.000000e+00> : vector<32x8xf32>
    %40 = tpu.matmul %37, %39, %cst_17 {dimension_numbers = #tpu.dot_dimension_numbers<[1], [0], [0], [1], [0, 0, 1, 1], [], []>} : vector<32x8xbf16>, vector<8x8xbf16>, vector<32x8xf32> -> vector<32x8xf32>
    %41 = arith.addf %34, %40 : vector<32x8xf32>
    %42 = vector.extract_strided_slice %5 {offsets = [1, 2, 0], sizes = [4, 8, 8], strides = [1, 1, 1]} : vector<6x10x8xf32> to vector<4x8x8xf32>
    %43 = vector.shape_cast %42 : vector<4x8x8xf32> to vector<32x8xf32>
    %44 = arith.truncf %43 : vector<32x8xf32> to vector<32x8xbf16>
    %c5 = arith.constant 5 : index
    %c0_18 = arith.constant 0 : index
    %c0_19 = arith.constant 0 : index
    %45 = vector.load %arg3[%c5, %c0_18, %c0_19] : memref<9x8x8xbf16, #tpu.memory_space<vmem>>, vector<1x8x8xbf16>
    %46 = vector.shape_cast %45 : vector<1x8x8xbf16> to vector<8x8xbf16>
    %cst_20 = arith.constant dense<0.000000e+00> : vector<32x8xf32>
    %47 = tpu.matmul %44, %46, %cst_20 {dimension_numbers = #tpu.dot_dimension_numbers<[1], [0], [0], [1], [0, 0, 1, 1], [], []>} : vector<32x8xbf16>, vector<8x8xbf16>, vector<32x8xf32> -> vector<32x8xf32>
    %48 = arith.addf %41, %47 : vector<32x8xf32>
    %49 = vector.extract_strided_slice %5 {offsets = [2, 0, 0], sizes = [4, 8, 8], strides = [1, 1, 1]} : vector<6x10x8xf32> to vector<4x8x8xf32>
    %50 = vector.shape_cast %49 : vector<4x8x8xf32> to vector<32x8xf32>
    %51 = arith.truncf %50 : vector<32x8xf32> to vector<32x8xbf16>
    %c6 = arith.constant 6 : index
    %c0_21 = arith.constant 0 : index
    %c0_22 = arith.constant 0 : index
    %52 = vector.load %arg3[%c6, %c0_21, %c0_22] : memref<9x8x8xbf16, #tpu.memory_space<vmem>>, vector<1x8x8xbf16>
    %53 = vector.shape_cast %52 : vector<1x8x8xbf16> to vector<8x8xbf16>
    %cst_23 = arith.constant dense<0.000000e+00> : vector<32x8xf32>
    %54 = tpu.matmul %51, %53, %cst_23 {dimension_numbers = #tpu.dot_dimension_numbers<[1], [0], [0], [1], [0, 0, 1, 1], [], []>} : vector<32x8xbf16>, vector<8x8xbf16>, vector<32x8xf32> -> vector<32x8xf32>
    %55 = arith.addf %48, %54 : vector<32x8xf32>
    %56 = vector.extract_strided_slice %5 {offsets = [2, 1, 0], sizes = [4, 8, 8], strides = [1, 1, 1]} : vector<6x10x8xf32> to vector<4x8x8xf32>
    %57 = vector.shape_cast %56 : vector<4x8x8xf32> to vector<32x8xf32>
    %58 = arith.truncf %57 : vector<32x8xf32> to vector<32x8xbf16>
    %c7 = arith.constant 7 : index
    %c0_24 = arith.constant 0 : index
    %c0_25 = arith.constant 0 : index
    %59 = vector.load %arg3[%c7, %c0_24, %c0_25] : memref<9x8x8xbf16, #tpu.memory_space<vmem>>, vector<1x8x8xbf16>
    %60 = vector.shape_cast %59 : vector<1x8x8xbf16> to vector<8x8xbf16>
    %cst_26 = arith.constant dense<0.000000e+00> : vector<32x8xf32>
    %61 = tpu.matmul %58, %60, %cst_26 {dimension_numbers = #tpu.dot_dimension_numbers<[1], [0], [0], [1], [0, 0, 1, 1], [], []>} : vector<32x8xbf16>, vector<8x8xbf16>, vector<32x8xf32> -> vector<32x8xf32>
    %62 = arith.addf %55, %61 : vector<32x8xf32>
    %63 = vector.extract_strided_slice %5 {offsets = [2, 2, 0], sizes = [4, 8, 8], strides = [1, 1, 1]} : vector<6x10x8xf32> to vector<4x8x8xf32>
    %64 = vector.shape_cast %63 : vector<4x8x8xf32> to vector<32x8xf32>
    %65 = arith.truncf %64 : vector<32x8xf32> to vector<32x8xbf16>
    %c8 = arith.constant 8 : index
    %c0_27 = arith.constant 0 : index
    %c0_28 = arith.constant 0 : index
    %66 = vector.load %arg3[%c8, %c0_27, %c0_28] : memref<9x8x8xbf16, #tpu.memory_space<vmem>>, vector<1x8x8xbf16>
    %67 = vector.shape_cast %66 : vector<1x8x8xbf16> to vector<8x8xbf16>
    %cst_29 = arith.constant dense<0.000000e+00> : vector<32x8xf32>
    %68 = tpu.matmul %65, %67, %cst_29 {dimension_numbers = #tpu.dot_dimension_numbers<[1], [0], [0], [1], [0, 0, 1, 1], [], []>} : vector<32x8xbf16>, vector<8x8xbf16>, vector<32x8xf32> -> vector<32x8xf32>
    %69 = arith.addf %62, %68 : vector<32x8xf32>
    %c0_30 = arith.constant 0 : index
    %c0_31 = arith.constant 0 : index
    %70 = vector.load %arg4[%c0_30, %c0_31] : memref<32x8xf32, #tpu.memory_space<vmem>>, vector<32x8xf32>
    %71 = arith.addf %69, %70 : vector<32x8xf32>
    %c0_32 = arith.constant 0 : index
    %c0_33 = arith.constant 0 : index
    %72 = vector.load %arg5[%c0_32, %c0_33] : memref<32x8xf32, #tpu.memory_space<vmem>>, vector<32x8xf32>
    tpu.vector_store %arg5[%c0_32, %c0_33], %71 {strides = array<i32>} : memref<32x8xf32, #tpu.memory_space<vmem>>, vector<32x8xf32>,
    return
  }
  func.func @transform_0(%arg0: i32, %arg1: i32) -> (i32, i32, i32, i32) {
    %c0_i32 = arith.constant 0 : i32
    %c0_i32_0 = arith.constant 0 : i32
    %c0_i32_1 = arith.constant 0 : i32
    %c0_i32_2 = arith.constant 0 : i32
    return %arg0, %c0_i32, %c0_i32_0, %c0_i32_1 : i32, i32, i32, i32
  }
  func.func @transform_1(%arg0: i32, %arg1: i32) -> (i32, i32, i32) {
    %c0_i32 = arith.constant 0 : i32
    %c0_i32_0 = arith.constant 0 : i32
    %c0_i32_1 = arith.constant 0 : i32
    %c0_i32_2 = arith.constant 0 : i32
    return %c0_i32, %c0_i32_0, %c0_i32_1 : i32, i32, i32
  }
  func.func @transform_2(%arg0: i32, %arg1: i32) -> (i32, i32) {
    %c2_i32 = arith.constant 2 : i32
    %0 = arith.muli %arg0, %c2_i32 : i32
    %1 = arith.addi %0, %arg1 : i32
    %c0_i32 = arith.constant 0 : i32
    %c0_i32_0 = arith.constant 0 : i32
    return %1, %c0_i32 : i32, i32
  }
  func.func @transform_3(%arg0: i32, %arg1: i32) -> (i32, i32) {
    %c2_i32 = arith.constant 2 : i32
    %0 = arith.muli %arg0, %c2_i32 : i32
    %1 = arith.addi %0, %arg1 : i32
    %c0_i32 = arith.constant 0 : i32
    %c0_i32_0 = arith.constant 0 : i32
    return %1, %c0_i32 : i32, i32
  }
}

module attributes {stable_mosaic.version = 11 : i64} {
  func.func @kernel(%arg0: i32, %arg1: i32, %arg2: memref<1x10x10x8xbf16, #tpu.memory_space<vmem>>, %arg3: memref<9x8x8xbf16, #tpu.memory_space<vmem>>, %arg4: memref<1x1x8xf32, #tpu.memory_space<vmem>>, %arg5: memref<1x1x8xf32, #tpu.memory_space<vmem>>, %arg6: memref<1x8xf32, #tpu.memory_space<vmem>>, %arg7: memref<1x8xf32, #tpu.memory_space<vmem>>, %arg8: memref<32x8xbf16, #tpu.memory_space<vmem>>) attributes {dimension_semantics = [#tpu.dimension_semantics<parallel>, #tpu.dimension_semantics<parallel>], iteration_bounds = array<i64: 2, 2>, scalar_prefetch = 0 : i64, scratch_operands = 0 : i64, tpu.core_type = #tpu.core_type<tc>, window_params = [{transform_indices = @transform_0, window_bounds = array<i64: 1, 10, 10, 8>}, {pipeline_mode = #tpu.pipeline_mode<synchronous>, transform_indices = @transform_1, window_bounds = array<i64: 9, 8, 8>}, {pipeline_mode = #tpu.pipeline_mode<synchronous>, transform_indices = @transform_2, window_bounds = array<i64: 1, 1, 8>}, {pipeline_mode = #tpu.pipeline_mode<synchronous>, transform_indices = @transform_3, window_bounds = array<i64: 1, 1, 8>}, {pipeline_mode = #tpu.pipeline_mode<synchronous>, transform_indices = @transform_4, window_bounds = array<i64: 1, 8>}, {pipeline_mode = #tpu.pipeline_mode<synchronous>, transform_indices = @transform_5, window_bounds = array<i64: 1, 8>}, {transform_indices = @transform_6, window_bounds = array<i64: 32, 8>}]} {
    %c4_i32 = arith.constant 4 : i32
    %0 = arith.muli %arg1, %c4_i32 : i32
    %1 = tpu.assume_multiple %0, 4 : i32
    %c0 = arith.constant 0 : index
    %2 = arith.index_cast %1 : i32 to index
    %c0_0 = arith.constant 0 : index
    %c0_1 = arith.constant 0 : index
    %3 = vector.load %arg2[%c0, %2, %c0_0, %c0_1] : memref<1x10x10x8xbf16, #tpu.memory_space<vmem>>, vector<1x6x10x8xbf16>
    %4 = vector.shape_cast %3 : vector<1x6x10x8xbf16> to vector<6x10x8xbf16>
    %5 = arith.extf %4 : vector<6x10x8xbf16> to vector<6x10x8xf32>
    %c0_2 = arith.constant 0 : index
    %c0_3 = arith.constant 0 : index
    %c0_4 = arith.constant 0 : index
    %6 = vector.load %arg4[%c0_2, %c0_3, %c0_4] : memref<1x1x8xf32, #tpu.memory_space<vmem>>, vector<1x1x8xf32>
    %7 = vector.broadcast %6 : vector<1x1x8xf32> to vector<6x10x8xf32>
    %8 = arith.mulf %5, %7 : vector<6x10x8xf32>
    %c0_5 = arith.constant 0 : index
    %c0_6 = arith.constant 0 : index
    %c0_7 = arith.constant 0 : index
    %9 = vector.load %arg5[%c0_5, %c0_6, %c0_7] : memref<1x1x8xf32, #tpu.memory_space<vmem>>, vector<1x1x8xf32>
    %10 = vector.broadcast %9 : vector<1x1x8xf32> to vector<6x10x8xf32>
    %11 = arith.addf %8, %10 : vector<6x10x8xf32>
    %cst = arith.constant 0.000000e+00 : f32
    %12 = vector.broadcast %cst : f32 to vector<6x10x8xf32>
    %13 = arith.maximumf %11, %12 : vector<6x10x8xf32>
    %14 = tpu.iota {dimensions = array<i32: 0>} : vector<6x10x8xi32>
    %15 = vector.broadcast %1 : i32 to vector<6x10x8xi32>
    %16 = arith.addi %14, %15 : vector<6x10x8xi32>
    %17 = tpu.iota {dimensions = array<i32: 1>} : vector<6x10x8xi32>
    %c0_i32 = arith.constant 0 : i32
    %18 = vector.broadcast %c0_i32 : i32 to vector<6x10x8xi32>
    %19 = arith.cmpi eq, %16, %18 : vector<6x10x8xi32>
    %c9_i32 = arith.constant 9 : i32
    %20 = vector.broadcast %c9_i32 : i32 to vector<6x10x8xi32>
    %21 = arith.cmpi eq, %16, %20 : vector<6x10x8xi32>
    %22 = arith.ori %19, %21 : vector<6x10x8xi1>
    %c0_i32_8 = arith.constant 0 : i32
    %23 = vector.broadcast %c0_i32_8 : i32 to vector<6x10x8xi32>
    %24 = arith.cmpi eq, %17, %23 : vector<6x10x8xi32>
    %c9_i32_9 = arith.constant 9 : i32
    %25 = vector.broadcast %c9_i32_9 : i32 to vector<6x10x8xi32>
    %26 = arith.cmpi eq, %17, %25 : vector<6x10x8xi32>
    %27 = arith.ori %24, %26 : vector<6x10x8xi1>
    %28 = arith.ori %22, %27 : vector<6x10x8xi1>
    %cst_10 = arith.constant 0.000000e+00 : f32
    %29 = vector.broadcast %cst_10 : f32 to vector<6x10x8xf32>
    %30 = arith.select %28, %29, %13 : vector<6x10x8xi1>, vector<6x10x8xf32>
    %cst_11 = arith.constant 0.000000e+00 : f32
    %31 = vector.broadcast %cst_11 : f32 to vector<32x8xf32>
    %32 = vector.extract_strided_slice %30 {offsets = [0, 0, 0], sizes = [4, 8, 8], strides = [1, 1, 1]} : vector<6x10x8xf32> to vector<4x8x8xf32>
    %33 = vector.shape_cast %32 : vector<4x8x8xf32> to vector<32x8xf32>
    %34 = arith.truncf %33 : vector<32x8xf32> to vector<32x8xbf16>
    %c0_12 = arith.constant 0 : index
    %c0_13 = arith.constant 0 : index
    %c0_14 = arith.constant 0 : index
    %35 = vector.load %arg3[%c0_12, %c0_13, %c0_14] : memref<9x8x8xbf16, #tpu.memory_space<vmem>>, vector<1x8x8xbf16>
    %36 = vector.shape_cast %35 : vector<1x8x8xbf16> to vector<8x8xbf16>
    %cst_15 = arith.constant dense<0.000000e+00> : vector<32x8xf32>
    %37 = tpu.matmul %34, %36, %cst_15 {dimension_numbers = #tpu.dot_dimension_numbers<[1], [0], [0], [1], [0, 0, 1, 1], [], []>} : vector<32x8xbf16>, vector<8x8xbf16>, vector<32x8xf32> -> vector<32x8xf32>
    %38 = arith.addf %31, %37 : vector<32x8xf32>
    %39 = vector.extract_strided_slice %30 {offsets = [0, 1, 0], sizes = [4, 8, 8], strides = [1, 1, 1]} : vector<6x10x8xf32> to vector<4x8x8xf32>
    %40 = vector.shape_cast %39 : vector<4x8x8xf32> to vector<32x8xf32>
    %41 = arith.truncf %40 : vector<32x8xf32> to vector<32x8xbf16>
    %c1 = arith.constant 1 : index
    %c0_16 = arith.constant 0 : index
    %c0_17 = arith.constant 0 : index
    %42 = vector.load %arg3[%c1, %c0_16, %c0_17] : memref<9x8x8xbf16, #tpu.memory_space<vmem>>, vector<1x8x8xbf16>
    %43 = vector.shape_cast %42 : vector<1x8x8xbf16> to vector<8x8xbf16>
    %cst_18 = arith.constant dense<0.000000e+00> : vector<32x8xf32>
    %44 = tpu.matmul %41, %43, %cst_18 {dimension_numbers = #tpu.dot_dimension_numbers<[1], [0], [0], [1], [0, 0, 1, 1], [], []>} : vector<32x8xbf16>, vector<8x8xbf16>, vector<32x8xf32> -> vector<32x8xf32>
    %45 = arith.addf %38, %44 : vector<32x8xf32>
    %46 = vector.extract_strided_slice %30 {offsets = [0, 2, 0], sizes = [4, 8, 8], strides = [1, 1, 1]} : vector<6x10x8xf32> to vector<4x8x8xf32>
    %47 = vector.shape_cast %46 : vector<4x8x8xf32> to vector<32x8xf32>
    %48 = arith.truncf %47 : vector<32x8xf32> to vector<32x8xbf16>
    %c2 = arith.constant 2 : index
    %c0_19 = arith.constant 0 : index
    %c0_20 = arith.constant 0 : index
    %49 = vector.load %arg3[%c2, %c0_19, %c0_20] : memref<9x8x8xbf16, #tpu.memory_space<vmem>>, vector<1x8x8xbf16>
    %50 = vector.shape_cast %49 : vector<1x8x8xbf16> to vector<8x8xbf16>
    %cst_21 = arith.constant dense<0.000000e+00> : vector<32x8xf32>
    %51 = tpu.matmul %48, %50, %cst_21 {dimension_numbers = #tpu.dot_dimension_numbers<[1], [0], [0], [1], [0, 0, 1, 1], [], []>} : vector<32x8xbf16>, vector<8x8xbf16>, vector<32x8xf32> -> vector<32x8xf32>
    %52 = arith.addf %45, %51 : vector<32x8xf32>
    %53 = vector.extract_strided_slice %30 {offsets = [1, 0, 0], sizes = [4, 8, 8], strides = [1, 1, 1]} : vector<6x10x8xf32> to vector<4x8x8xf32>
    %54 = vector.shape_cast %53 : vector<4x8x8xf32> to vector<32x8xf32>
    %55 = arith.truncf %54 : vector<32x8xf32> to vector<32x8xbf16>
    %c3 = arith.constant 3 : index
    %c0_22 = arith.constant 0 : index
    %c0_23 = arith.constant 0 : index
    %56 = vector.load %arg3[%c3, %c0_22, %c0_23] : memref<9x8x8xbf16, #tpu.memory_space<vmem>>, vector<1x8x8xbf16>
    %57 = vector.shape_cast %56 : vector<1x8x8xbf16> to vector<8x8xbf16>
    %cst_24 = arith.constant dense<0.000000e+00> : vector<32x8xf32>
    %58 = tpu.matmul %55, %57, %cst_24 {dimension_numbers = #tpu.dot_dimension_numbers<[1], [0], [0], [1], [0, 0, 1, 1], [], []>} : vector<32x8xbf16>, vector<8x8xbf16>, vector<32x8xf32> -> vector<32x8xf32>
    %59 = arith.addf %52, %58 : vector<32x8xf32>
    %60 = vector.extract_strided_slice %30 {offsets = [1, 1, 0], sizes = [4, 8, 8], strides = [1, 1, 1]} : vector<6x10x8xf32> to vector<4x8x8xf32>
    %61 = vector.shape_cast %60 : vector<4x8x8xf32> to vector<32x8xf32>
    %62 = arith.truncf %61 : vector<32x8xf32> to vector<32x8xbf16>
    %c4 = arith.constant 4 : index
    %c0_25 = arith.constant 0 : index
    %c0_26 = arith.constant 0 : index
    %63 = vector.load %arg3[%c4, %c0_25, %c0_26] : memref<9x8x8xbf16, #tpu.memory_space<vmem>>, vector<1x8x8xbf16>
    %64 = vector.shape_cast %63 : vector<1x8x8xbf16> to vector<8x8xbf16>
    %cst_27 = arith.constant dense<0.000000e+00> : vector<32x8xf32>
    %65 = tpu.matmul %62, %64, %cst_27 {dimension_numbers = #tpu.dot_dimension_numbers<[1], [0], [0], [1], [0, 0, 1, 1], [], []>} : vector<32x8xbf16>, vector<8x8xbf16>, vector<32x8xf32> -> vector<32x8xf32>
    %66 = arith.addf %59, %65 : vector<32x8xf32>
    %67 = vector.extract_strided_slice %30 {offsets = [1, 2, 0], sizes = [4, 8, 8], strides = [1, 1, 1]} : vector<6x10x8xf32> to vector<4x8x8xf32>
    %68 = vector.shape_cast %67 : vector<4x8x8xf32> to vector<32x8xf32>
    %69 = arith.truncf %68 : vector<32x8xf32> to vector<32x8xbf16>
    %c5 = arith.constant 5 : index
    %c0_28 = arith.constant 0 : index
    %c0_29 = arith.constant 0 : index
    %70 = vector.load %arg3[%c5, %c0_28, %c0_29] : memref<9x8x8xbf16, #tpu.memory_space<vmem>>, vector<1x8x8xbf16>
    %71 = vector.shape_cast %70 : vector<1x8x8xbf16> to vector<8x8xbf16>
    %cst_30 = arith.constant dense<0.000000e+00> : vector<32x8xf32>
    %72 = tpu.matmul %69, %71, %cst_30 {dimension_numbers = #tpu.dot_dimension_numbers<[1], [0], [0], [1], [0, 0, 1, 1], [], []>} : vector<32x8xbf16>, vector<8x8xbf16>, vector<32x8xf32> -> vector<32x8xf32>
    %73 = arith.addf %66, %72 : vector<32x8xf32>
    %74 = vector.extract_strided_slice %30 {offsets = [2, 0, 0], sizes = [4, 8, 8], strides = [1, 1, 1]} : vector<6x10x8xf32> to vector<4x8x8xf32>
    %75 = vector.shape_cast %74 : vector<4x8x8xf32> to vector<32x8xf32>
    %76 = arith.truncf %75 : vector<32x8xf32> to vector<32x8xbf16>
    %c6 = arith.constant 6 : index
    %c0_31 = arith.constant 0 : index
    %c0_32 = arith.constant 0 : index
    %77 = vector.load %arg3[%c6, %c0_31, %c0_32] : memref<9x8x8xbf16, #tpu.memory_space<vmem>>, vector<1x8x8xbf16>
    %78 = vector.shape_cast %77 : vector<1x8x8xbf16> to vector<8x8xbf16>
    %cst_33 = arith.constant dense<0.000000e+00> : vector<32x8xf32>
    %79 = tpu.matmul %76, %78, %cst_33 {dimension_numbers = #tpu.dot_dimension_numbers<[1], [0], [0], [1], [0, 0, 1, 1], [], []>} : vector<32x8xbf16>, vector<8x8xbf16>, vector<32x8xf32> -> vector<32x8xf32>
    %80 = arith.addf %73, %79 : vector<32x8xf32>
    %81 = vector.extract_strided_slice %30 {offsets = [2, 1, 0], sizes = [4, 8, 8], strides = [1, 1, 1]} : vector<6x10x8xf32> to vector<4x8x8xf32>
    %82 = vector.shape_cast %81 : vector<4x8x8xf32> to vector<32x8xf32>
    %83 = arith.truncf %82 : vector<32x8xf32> to vector<32x8xbf16>
    %c7 = arith.constant 7 : index
    %c0_34 = arith.constant 0 : index
    %c0_35 = arith.constant 0 : index
    %84 = vector.load %arg3[%c7, %c0_34, %c0_35] : memref<9x8x8xbf16, #tpu.memory_space<vmem>>, vector<1x8x8xbf16>
    %85 = vector.shape_cast %84 : vector<1x8x8xbf16> to vector<8x8xbf16>
    %cst_36 = arith.constant dense<0.000000e+00> : vector<32x8xf32>
    %86 = tpu.matmul %83, %85, %cst_36 {dimension_numbers = #tpu.dot_dimension_numbers<[1], [0], [0], [1], [0, 0, 1, 1], [], []>} : vector<32x8xbf16>, vector<8x8xbf16>, vector<32x8xf32> -> vector<32x8xf32>
    %87 = arith.addf %80, %86 : vector<32x8xf32>
    %88 = vector.extract_strided_slice %30 {offsets = [2, 2, 0], sizes = [4, 8, 8], strides = [1, 1, 1]} : vector<6x10x8xf32> to vector<4x8x8xf32>
    %89 = vector.shape_cast %88 : vector<4x8x8xf32> to vector<32x8xf32>
    %90 = arith.truncf %89 : vector<32x8xf32> to vector<32x8xbf16>
    %c8 = arith.constant 8 : index
    %c0_37 = arith.constant 0 : index
    %c0_38 = arith.constant 0 : index
    %91 = vector.load %arg3[%c8, %c0_37, %c0_38] : memref<9x8x8xbf16, #tpu.memory_space<vmem>>, vector<1x8x8xbf16>
    %92 = vector.shape_cast %91 : vector<1x8x8xbf16> to vector<8x8xbf16>
    %cst_39 = arith.constant dense<0.000000e+00> : vector<32x8xf32>
    %93 = tpu.matmul %90, %92, %cst_39 {dimension_numbers = #tpu.dot_dimension_numbers<[1], [0], [0], [1], [0, 0, 1, 1], [], []>} : vector<32x8xbf16>, vector<8x8xbf16>, vector<32x8xf32> -> vector<32x8xf32>
    %94 = arith.addf %87, %93 : vector<32x8xf32>
    %c0_40 = arith.constant 0 : index
    %c0_41 = arith.constant 0 : index
    %95 = vector.load %arg6[%c0_40, %c0_41] : memref<1x8xf32, #tpu.memory_space<vmem>>, vector<1x8xf32>
    %96 = vector.broadcast %95 : vector<1x8xf32> to vector<32x8xf32>
    %97 = arith.mulf %94, %96 : vector<32x8xf32>
    %c0_42 = arith.constant 0 : index
    %c0_43 = arith.constant 0 : index
    %98 = vector.load %arg7[%c0_42, %c0_43] : memref<1x8xf32, #tpu.memory_space<vmem>>, vector<1x8xf32>
    %99 = vector.broadcast %98 : vector<1x8xf32> to vector<32x8xf32>
    %100 = arith.addf %97, %99 : vector<32x8xf32>
    %cst_44 = arith.constant 0.000000e+00 : f32
    %101 = vector.broadcast %cst_44 : f32 to vector<32x8xf32>
    %102 = arith.maximumf %100, %101 : vector<32x8xf32>
    %103 = arith.truncf %102 : vector<32x8xf32> to vector<32x8xbf16>
    %c0_45 = arith.constant 0 : index
    %c0_46 = arith.constant 0 : index
    %104 = vector.load %arg8[%c0_45, %c0_46] : memref<32x8xbf16, #tpu.memory_space<vmem>>, vector<32x8xbf16>
    tpu.vector_store %arg8[%c0_45, %c0_46], %103 {strides = array<i32>} : memref<32x8xbf16, #tpu.memory_space<vmem>>, vector<32x8xbf16>,
    return
  }
  func.func @transform_0(%arg0: i32, %arg1: i32) -> (i32, i32, i32, i32) {
    %c0_i32 = arith.constant 0 : i32
    %c0_i32_0 = arith.constant 0 : i32
    %c0_i32_1 = arith.constant 0 : i32
    %c0_i32_2 = arith.constant 0 : i32
    return %arg0, %c0_i32, %c0_i32_0, %c0_i32_1 : i32, i32, i32, i32
  }
  func.func @transform_1(%arg0: i32, %arg1: i32) -> (i32, i32, i32) {
    %c0_i32 = arith.constant 0 : i32
    %c0_i32_0 = arith.constant 0 : i32
    %c0_i32_1 = arith.constant 0 : i32
    %c0_i32_2 = arith.constant 0 : i32
    return %c0_i32, %c0_i32_0, %c0_i32_1 : i32, i32, i32
  }
  func.func @transform_2(%arg0: i32, %arg1: i32) -> (i32, i32, i32) {
    %c0_i32 = arith.constant 0 : i32
    %c0_i32_0 = arith.constant 0 : i32
    %c0_i32_1 = arith.constant 0 : i32
    %c0_i32_2 = arith.constant 0 : i32
    return %c0_i32, %c0_i32_0, %c0_i32_1 : i32, i32, i32
  }
  func.func @transform_3(%arg0: i32, %arg1: i32) -> (i32, i32, i32) {
    %c0_i32 = arith.constant 0 : i32
    %c0_i32_0 = arith.constant 0 : i32
    %c0_i32_1 = arith.constant 0 : i32
    %c0_i32_2 = arith.constant 0 : i32
    return %c0_i32, %c0_i32_0, %c0_i32_1 : i32, i32, i32
  }
  func.func @transform_4(%arg0: i32, %arg1: i32) -> (i32, i32) {
    %c0_i32 = arith.constant 0 : i32
    %c0_i32_0 = arith.constant 0 : i32
    %c0_i32_1 = arith.constant 0 : i32
    return %c0_i32, %c0_i32_0 : i32, i32
  }
  func.func @transform_5(%arg0: i32, %arg1: i32) -> (i32, i32) {
    %c0_i32 = arith.constant 0 : i32
    %c0_i32_0 = arith.constant 0 : i32
    %c0_i32_1 = arith.constant 0 : i32
    return %c0_i32, %c0_i32_0 : i32, i32
  }
  func.func @transform_6(%arg0: i32, %arg1: i32) -> (i32, i32) {
    %c2_i32 = arith.constant 2 : i32
    %0 = arith.muli %arg0, %c2_i32 : i32
    %1 = arith.addi %0, %arg1 : i32
    %c0_i32 = arith.constant 0 : i32
    %c0_i32_0 = arith.constant 0 : i32
    return %1, %c0_i32 : i32, i32
  }
}

</mosaic_0001>

<bundles_post_ra>
// kernel: tile.13
= control target key start
LH: loop header
LB: loop body
LE: loop exit
PB: predicated region body
PF: predicated region fallthrough
CT: control target
= control target key end

     0   :  { %s22_s0 = inlined_call_operand.vmem [shape: f32[4], index: 0, kind: input, shape index: {}]   ;;  %s23_s1 = inlined_call_operand.vmem [shape: f32[4,4], index: 1, kind: output, shape index: {}]  }
   0x1   :  { %v4_v0 = vld [vmem:[%s22_s0] ss:$0 sm:$0xff] }
   0x2   :  { %5 = vst [vmem:[%s23_s1] sm:$0xf] %v4_v0 }

// kernel: tile.14
= control target key start
LH: loop header
LB: loop body
LE: loop exit
PB: predicated region body
PF: predicated region fallthrough
CT: control target
= control target key end

     0   :  { %vm8_vm0 = vcmask 31744   ;;  %s40_s8 = smov 4   ;;  %s41_s9 = smov 8   ;;  %vm14_vm1 = vcmask 130144   ;;  %vm20_vm2 = vcmask 97344   ;;  %vm26_vm3 = vcmask 64544   ;;  %s58_s0 = inlined_call_operand.vmem [shape: f32[4,4], index: 0, kind: input, shape index: {}]   ;;  %s59_s1 = inlined_call_operand.vmem [shape: f32[1,1,16], index: 1, kind: output, shape index: {}]  }
   0x1   :  { %v5_v0 = vld [vmem:[%s58_s0] sm:$0xf]  ;;  %s39_s0 = smov 12  }
   0x2   :  { %6 = vst [vmem:[#allocation1] sm:$0xf] %v5_v0 }
   0x9   :  { %v11_v1 = vld [vmem:[#allocation1 + $0x3] sm:$0x1]   ;;  %v23_v2 = vld [vmem:[#allocation1 + $0x1] sm:$0x1]   ;;  %v7_v3 = vld [vmem:[#allocation1] sm:$0x1]  }
   0xa   :  { %12 = vrot.lane.b32.xlu0 %v11_v1, %s39_s0  ;;  %24 = vrot.lane.b32.xlu1 %v23_v2, %s40_s8  ;;  %v17_v4 = vld [vmem:[#allocation1 + $0x2] sm:$0x1]   ;;  %9 = vst.msk [vmem:[#allocation0] sm:$0x1] %vm8_vm0, %v7_v3  }
   0xe   :  { %18 = vrot.lane.b32.xlu0 %v17_v4, %s41_s9 }
  0x7c   :  { %v13_v5 = vpop.permute.xlu0 %12   ;;  %v25_v6 = vpop.permute.xlu1 %24  }
  0x7d   :  { %15 = vst.msk [vmem:[#allocation0] sm:$0x1] %vm14_vm1, %v13_v5  }
  0x80   :  { %v19_v7 = vpop.permute.xlu0 %18  }
  0x81   :  { %21 = vst.msk [vmem:[#allocation0] sm:$0x1] %vm20_vm2, %v19_v7  }
  0x82   :  { %27 = vst.msk [vmem:[#allocation0] sm:$0x1] %vm26_vm3, %v25_v6  }
  0x89   :  { %v32_v8 = vld [vmem:[#allocation0] sm:$0x1] }
  0x8a   :  { %35 = vst [vmem:[%s59_s1] sm:$0x1] %v32_v8 }

// kernel: network_block_forward.5
= control target key start
LH: loop header
LB: loop body
LE: loop exit
PB: predicated region body
PF: predicated region fallthrough
CT: control target
= control target key end

     0   :  { %s1259_s12 = smov 0   ;;  %s1261_s13 = smov 0   ;;  %s1433_s0 = inlined_call_operand.vmem [shape: bf16[2,10,10,8], index: 0, kind: input, shape index: {}]   ;;  %s1434_s1 = inlined_call_operand.vmem [shape: bf16[9,8,8], index: 1, kind: input, shape index: {}]   ;;  %s1435_s2 = inlined_call_operand.vmem [shape: bf16[128,8], index: 2, kind: input, shape index: {}]   ;;  %s1436_s3 = inlined_call_operand.vmem [shape: f32[128,8], index: 3, kind: output, shape index: {}]  }
   0x1   :  { %s1263_s14 = smov 0   ;;  %s1265_s15 = smov 0  }
   0x2   :  { %s1267_s16 = smov 0  }
   0x3 LB: > { %s22_s17 = sadd.s32 1, %s1229_s14  ;;  %s25_s18 = sadd.s32 1, %s1233_s15  ;;  %s1237_s16 = sphi %s1267_s16, %s13_s16   ;;  %s1233_s15 = sphi %s1265_s15, %s1440_s15   ;;  %s1229_s14 = sphi %s1263_s14, %s1439_s14   ;;  %s1225_s13 = sphi %s1261_s13, %s1438_s13   ;;  %s1221_s12 = sphi %s1259_s12, %s1437_s12  }
   0x4   : > { %p23_p0 = scmp.ge.s32.totalorder %s22_s17, 2  ;;  %p1008_p1 = scmp.ge.s32.totalorder %s1237_s16, 1 }
   0x5   : > { %p172_p2 = scmp.lt.s32.totalorder %s1237_s16, 5 }
   0x6   : > { %s1442_s17 = smov (%p23_p0, %s22_s17), 0  ;;  %s1444_s18 = smov (!%p23_p0, %s25_s18), %s1233_s15 }
   0x7   : > { %p173_p3 = pnand %p1008_p1, %p172_p2  ;;  %p27_p4 = scmp.ge.s32.totalorder %s1444_s18, 2 }
   0x8   : > { %p205_p5 = scmp.lt.s32.totalorder (!%p173_p3), %s1225_s13, 1  ;;  %s1053_s29 = sshll.u32 (!%p173_p3), %s1221_s12, 5 }
   0x9   : > { %s1446_s18 = smov (%p27_p4, %s1444_s18), 0  ;;  %176 = sbr.rel (%p173_p3) target bundleno = 267 (0x10b), region = 32 }
   0xa   : > { %s1010_s24 = sshll.u32 (!%p173_p3), %s1225_s13, 1 }
   0xb   : > { %s211_s25 = sadd.s32 (!%p173_p3), %s1221_s12, %s1010_s24 }
   0xc   : > { %s1011_s26 = sshll.u32 (!%p173_p3), %s211_s25, 2 }
   0xd   : > { %p213_p6 = scmp.lt.s32.totalorder (!%p173_p3), %s1011_s26, 15 }
   0xe   : > { %v1021_v0 = vld [vmem:[%s1434_s1 + $0x4] sm:$0xf]  ;;  %vm298_vm0 = vcmask 1043456   ;;  %v261_v1 = vld [vmem:[%s1434_s1] sm:$0xf]  ;;  %s206_s23 = scalar_select %p205_p5, %s1225_s13, 1 }
   0xf   : > { %1144 = vmatprep.subr.msk.bf16.mxu0 %vm298_vm0, %v1021_v0  ;;  %v300_v2 = vsel %vm298_vm0, %v1021_v0, 0  ;;  %1145 = vmatprep.subr.msk.bf16.mxu1 %vm298_vm0, %v261_v1  ;;  %v358_v3 = vsel %vm298_vm0, %v261_v1, 0  ;;  %v1026_v4 = vld [vmem:[%s1434_s1 + $0x8] sm:$0xf]  ;;  %v1031_v5 = vld [vmem:[%s1434_s1 + $0xc] sm:$0xf] }
  0x10   : > { %1091 = vmatpush3.bf16.msra.mxu0 %v300_v2  ;;  %1097 = vmatpush3.bf16.msra.mxu1 %v358_v3  ;;  %s1153_s28 = smul.u32 80, %s206_s23  ;;  %vm270_vm1 = vcmask 1046528   ;;  %vm291_vm2 = vcmask 64512   ;;  %vm409_vm3 = vcmask 1045504   ;;  %v503_v27 = vsel %vm298_vm0, %v1031_v5, 0  ;;  %s1448_s26 = smov (!%p213_p6, %s1011_s26), 15 }
  0x11   : > { %1146 = vmatprep.subr.msk.bf16.mxu0 %vm298_vm0, %v1026_v4  ;;  %1147 = vmatprep.subr.msk.bf16.mxu1 %vm298_vm0, %v1031_v5  ;;  %v437_v31 = vsel %vm298_vm0, %v1026_v4, 0  ;;  %v1037_v32 = vld [vmem:[%s1434_s1 + $0x14] sm:$0xf]  ;;  %v1034_v54 = vld [vmem:[%s1434_s1 + $0x10] sm:$0xf]  ;;  %s1012_s12 = sshll.u32 %s1448_s26, 2 }
  0x12   : > { %s209_s5 = scalar_lea.vmem %s1433_s0, %s1153_s28  ;;  %v645_v1 = vsel %vm298_vm0, %v1037_v32, 0  ;;  %v1044_v4 = vld [vmem:[%s1434_s1 + $0x1c] sm:$0xf]  ;;  %s216_s28 = scalar_lea.vmem %s1435_s2, %s1012_s12 }
  0x13   : > { %s1317_s6 = scalar_lea.vmem %s209_s5, %s1053_s29  ;;  %s1015_s29 = sshll.u32 %s1448_s26, 3 }
  0x14   : > { %v235_v6 = vld [vmem:[%s1317_s6] sm:$0xf]  ;;  %v236_v7 = vld [vmem:[%s1317_s6 + $0x4] sm:$0x1]  ;;  %v237_v8 = vld [vmem:[%s1317_s6 + $0x8] sm:$0xf]  ;;  %s226_s5 = scalar_lea.vmem %s1436_s3, %s1015_s29 }
  0x15   : > { %v238_v9 = vld [vmem:[%s1317_s6 + $0xc] sm:$0x1]  ;;  %v239_v10 = vld [vmem:[%s1317_s6 + $0x10] sm:$0xf]  ;;  %v240_v11 = vld [vmem:[%s1317_s6 + $0x14] sm:$0x1]  ;;  %v247_v12 = vunpack.c.l.bf16 %v235_v6  ;;  %v248_v13 = vunpack.c.l.bf16 %v236_v7  ;;  %v249_v14 = vunpack.c.l.bf16 %v237_v8  ;;  %v1019_v15 = vcombine.low %v235_v6, %v237_v8 }
  0x16   : > { %v1326_v16 = vld [vmem:[%s1317_s6 + $0x18] sm:$0xf]  ;;  %v242_v17 = vld [vmem:[%s1317_s6 + $0x1c] sm:$0x1]  ;;  %v250_v18 = vunpack.c.l.bf16 %v238_v9  ;;  %v251_v19 = vunpack.c.l.bf16 %v239_v10  ;;  %v252_v20 = vunpack.c.l.bf16 %v240_v11  ;;  %v1029_v21 = vcombine.low %v237_v8, %v239_v10  ;;  %v1330_v22 = vld [vmem:[%s1317_s6 + $0x20] sm:$0xf] }
  0x17   : > { %v244_v23 = vld [vmem:[%s1317_s6 + $0x24] sm:$0x1]  ;;  %v253_v24 = vunpack.c.l.bf16 %v1326_v16  ;;  %v254_v25 = vunpack.c.l.bf16 %v242_v17  ;;  %1098 = vmatprep.mubr.msk.bf16.mxu1 %vm291_vm2, %v1019_v15  ;;  %v1336_v26 = vcombine.low %v239_v10, %v1326_v16  ;;  %v255_v28 = vunpack.c.l.bf16 %v1330_v22  ;;  %v245_v62 = vld [vmem:[%s1317_s6 + $0x28] sm:$0xf]  ;;  %v246_v63 = vld [vmem:[%s1317_s6 + $0x2c] sm:$0x1] }
  0x18   : > { %v256_v29 = vunpack.c.l.bf16 %v244_v23  ;;  %v271_v30 = vrot.slane %v247_v12, 1  ;;  %v272_v33 = vrot.slane %v248_v13, 1  ;;  %v274_v34 = vrot.slane %v249_v14, 1 }
  0x19   : > { %v275_v35 = vrot.slane %v250_v18, 1  ;;  %v277_v36 = vrot.slane %v251_v19, 1  ;;  %1099 = vmatmul.mubr.msk.bf16.vlgmr.msra.gmra.mxu1 %vm291_vm2, %v1336_v26  ;;  %v278_v37 = vrot.slane %v252_v20, 1  ;;  %v280_v38 = vrot.slane %v253_v24, 1 }
  0x1a   : > { %v281_v39 = vrot.slane %v254_v25, 1  ;;  %v410_v40 = vrot.slane %v247_v12, 2  ;;  %1109 = vmatpush3.bf16.msra.mxu1 %v503_v27  ;;  %1110 = vmatprep.mubr.msk.bf16.mxu1 %vm291_vm2, %v1029_v21  ;;  %v273_v41 = vsel %vm270_vm1, %v271_v30, %v272_v33  ;;  %v411_v43 = vrot.slane %v248_v13, 2  ;;  %v1041_v12 = vld [vmem:[%s1434_s1 + $0x18] sm:$0xf] }
  0x1b   : > { %v276_v42 = vsel %vm270_vm1, %v274_v34, %v275_v35  ;;  %v413_v44 = vrot.slane %v249_v14, 2  ;;  %1149 = vmatprep.subr.msk.bf16.mxu1 %vm298_vm0, %v1037_v32  ;;  %v279_v45 = vsel %vm270_vm1, %v277_v36, %v278_v37  ;;  %v414_v48 = vrot.slane %v250_v18, 2  ;;  %v1047_v21 = vld [vmem:[%s1434_s1 + $0x20] sm:$0xf] }
  0x1c   : > { %v282_v46 = vsel %vm270_vm1, %v280_v38, %v281_v39  ;;  %v287_v47 = vpack.c.bf16 %v276_v42, %v273_v41  ;;  %v416_v50 = vrot.slane %v251_v19, 2  ;;  %v417_v51 = vrot.slane %v252_v20, 2 }
  0x1d   : > { %v288_v49 = vpack.c.bf16 %v282_v46, %v279_v45  ;;  %v419_v52 = vrot.slane %v253_v24, 2  ;;  %v420_v53 = vrot.slane %v254_v25, 2  ;;  %v412_v55 = vsel %vm409_vm3, %v410_v40, %v411_v43 }
  0x1e   : > { %1092 = vmatprep.mubr.msk.bf16.mxu0 %vm291_vm2, %v287_v47  ;;  %v415_v56 = vsel %vm409_vm3, %v413_v44, %v414_v48  ;;  %v418_v57 = vsel %vm409_vm3, %v416_v50, %v417_v51  ;;  %v630_v58 = vrot.slane %v255_v28, 2  ;;  %v631_v59 = vrot.slane %v256_v29, 2 }
  0x1f   : > { %1093 = vmatmul.mubr.msk.bf16.vlgmr.msra.gmra.mxu0 %vm291_vm2, %v288_v49  ;;  %v426_v60 = vpack.c.bf16 %v415_v56, %v412_v55  ;;  %v421_v61 = vsel %vm409_vm3, %v419_v52, %v420_v53  ;;  %v1030_v0 = vcombine.low %v1326_v16, %v1330_v22  ;;  %v634_v2 = vpack.c.bf16 %v418_v57, %v415_v56 }
  0x20   : > { %1103 = vmatpush3.bf16.msra.mxu0 %v437_v31  ;;  %v427_v3 = vpack.c.bf16 %v421_v61, %v418_v57  ;;  %v560_v5 = vrot.slane %v255_v28, 1  ;;  %v561_v6 = vrot.slane %v256_v29, 1  ;;  %v564_v7 = vpack.c.bf16 %v279_v45, %v276_v42 }
  0x21   : > { %1148 = vmatprep.subr.msk.bf16.mxu0 %vm298_vm0, %v1034_v54  ;;  %1104 = vmatprep.mubr.msk.bf16.mxu0 %vm291_vm2, %v426_v60  ;;  %v257_v8 = vunpack.c.l.bf16 %v245_v62  ;;  %v258_v9 = vunpack.c.l.bf16 %v246_v63  ;;  %v575_v10 = vsel %vm298_vm0, %v1034_v54, 0  ;;  %v632_v11 = vsel %vm409_vm3, %v630_v58, %v631_v59 }
  0x22   : > { %1111 = vmatmul.mubr.msk.bf16.vlgmr.msra.gmra.mxu1 %vm291_vm2, %v1030_v0  ;;  %v562_v13 = vsel %vm270_vm1, %v560_v5, %v561_v6  ;;  %v635_v14 = vpack.c.bf16 %v632_v11, %v421_v61  ;;  %v775_v17 = vsel %vm298_vm0, %v1044_v4, 0  ;;  %v707_v20 = vsel %vm298_vm0, %v1041_v12, 0 }
  0x23   : > { %1121 = vmatpush3.bf16.msra.mxu1 %v645_v1  ;;  %1122 = vmatprep.mubr.msk.bf16.mxu1 %vm291_vm2, %v634_v2  ;;  %v764_v15 = vrot.slane %v257_v8, 1  ;;  %v765_v16 = vrot.slane %v258_v9, 1  ;;  %v565_v18 = vpack.c.bf16 %v562_v13, %v282_v46  ;;  %v1040_v24 = vcombine.low %v1330_v22, %v245_v62 }
  0x24   : > { %1151 = vmatprep.subr.msk.bf16.mxu1 %vm298_vm0, %v1044_v4  ;;  %v830_v25 = vrot.slane %v257_v8, 2  ;;  %v831_v27 = vrot.slane %v258_v9, 2  ;;  %v841_v28 = vsel %vm298_vm0, %v1047_v21, 0 }
  0x25   : > { %v766_v19 = vsel %vm270_vm1, %v764_v15, %v765_v16 }
  0x26   : > { %v768_v23 = vpack.c.bf16 %v766_v19, %v562_v13  ;;  %v832_v29 = vsel %vm409_vm3, %v830_v25, %v831_v27  ;;  %v1062_v13 = vld [vmem:[%s216_s28 + $0x8] sm:$0xff]  }
  0x27   : > { %1105 = vmatmul.mubr.msk.bf16.vlgmr.msra.gmra.mxu0 %vm291_vm2, %v427_v3 }
  0x28   : > { %1115 = vmatpush3.bf16.msra.mxu0 %v575_v10  ;;  %1116 = vmatprep.mubr.msk.bf16.mxu0 %vm291_vm2, %v564_v7 }
  0x29   : > { %1150 = vmatprep.subr.msk.bf16.mxu0 %vm298_vm0, %v1041_v12 }
  0x2a   : > { %1123 = vmatmul.mubr.msk.bf16.vlgmr.msra.gmra.mxu1 %vm291_vm2, %v635_v14 }
  0x2b   : > { %1133 = vmatpush3.bf16.msra.mxu1 %v775_v17  ;;  %1134 = vmatprep.mubr.msk.bf16.mxu1 %vm291_vm2, %v288_v49  ;;  %v1055_v17 = vld [vmem:[%s216_s28] sm:$0xff]  }
  0x2f   : > { %1117 = vmatmul.mubr.msk.bf16.vlgmr.msra.gmra.mxu0 %vm291_vm2, %v565_v18 }
  0x30   : > { %1127 = vmatpush3.bf16.msra.mxu0 %v707_v20  ;;  %1128 = vmatprep.mubr.msk.bf16.mxu0 %vm291_vm2, %v1336_v26  ;;  %v834_v26 = vpack.c.bf16 %v832_v29, %v632_v11  ;;  %v1056_v29 = vunpack.c.l.bf16 %v1055_v17 }
  0x31   : > { %1152 = vmatprep.subr.msk.bf16.mxu0 %vm298_vm0, %v1047_v21  ;;  %v1060_v21 = vunpack.c.l.bf16 %v1062_v13 }
  0x32   : > { %1135 = vmatmul.mubr.msk.bf16.vlgmr.msra.gmra.mxu1 %vm291_vm2, %v768_v23 }
  0x37   : > { %1129 = vmatmul.mubr.msk.bf16.vlgmr.msra.gmra.mxu0 %vm291_vm2, %v1040_v24 }
  0x38   : > { %1139 = vmatpush3.bf16.msra.mxu0 %v841_v28  ;;  %1140 = vmatprep.mubr.msk.bf16.mxu0 %vm291_vm2, %v427_v3 }
  0x3f   : > { %1141 = vmatmul.mubr.msk.bf16.vlgmr.msra.gmra.mxu0 %vm291_vm2, %v834_v26 }
  0xd9   : > { %v1100_v30 = vpop.f32.mrf.mxu1 }
  0xdb   : > { %v394_v22 = vpop.f32.mrf.mxu1 }
  0xdd   : > { %v1101_v31 = vpop.f32.mrf.mxu1 }
  0xdf   : > { %v1094_v32 = vpop.f32.mrf.mxu0  ;;  %v397_v33 = vpop.f32.mrf.mxu1 }
  0xe0   : > { %v403_v44 = vadd.f32 %v1100_v30, %v1094_v32  ;;  %v1061_v32 = vunpack.c.h.bf16 %v1062_v13 }
  0xe1   : > { %v336_v34 = vpop.f32.mrf.mxu0 }
  0xe2   : > { %v1112_v36 = vpop.f32.mrf.mxu1  ;;  %v395_v47 = vadd.f32 %v394_v22, %v336_v34 }
  0xe3   : > { %v1095_v35 = vpop.f32.mrf.mxu0 }
  0xe4   : > { %v539_v38 = vpop.f32.mrf.mxu1  ;;  %v406_v51 = vadd.f32 %v1101_v31, %v1095_v35 }
  0xe5   : > { %v339_v37 = vpop.f32.mrf.mxu0 }
  0xe6   : > { %v1113_v40 = vpop.f32.mrf.mxu1  ;;  %v398_v55 = vadd.f32 %v397_v33, %v339_v37 }
  0xe7   : > { %v1106_v39 = vpop.f32.mrf.mxu0 }
  0xe8   : > { %v542_v42 = vpop.f32.mrf.mxu1  ;;  %v490_v48 = vadd.f32 %v1106_v39, %v403_v44 }
  0xe9   : > { %v473_v41 = vpop.f32.mrf.mxu0 }
  0xea   : > { %v1124_v45 = vpop.f32.mrf.mxu1  ;;  %v488_v52 = vadd.f32 %v473_v41, %v395_v47  ;;  %v556_v56 = vadd.f32 %v1112_v36, %v490_v48 }
  0xeb   : > { %v1107_v43 = vpop.f32.mrf.mxu0 }
  0xec   : > { %v681_v49 = vpop.f32.mrf.mxu1  ;;  %v491_v57 = vadd.f32 %v1107_v43, %v406_v51  ;;  %v554_v60 = vadd.f32 %v539_v38, %v488_v52  ;;  %v1057_v38 = vunpack.c.h.bf16 %v1055_v17 }
  0xed   : > { %v476_v46 = vpop.f32.mrf.mxu0 }
  0xee   : > { %v1125_v53 = vpop.f32.mrf.mxu1  ;;  %v489_v61 = vadd.f32 %v476_v46, %v398_v55  ;;  %v557_v0 = vadd.f32 %v1113_v40, %v491_v57 }
  0xef   : > { %v1118_v50 = vpop.f32.mrf.mxu0 }
  0xf0   : > { %v684_v59 = vpop.f32.mrf.mxu1  ;;  %v628_v62 = vadd.f32 %v1118_v50, %v556_v56  ;;  %v555_v4 = vadd.f32 %v542_v42, %v489_v61 }
  0xf1   : > { %v611_v54 = vpop.f32.mrf.mxu0 }
  0xf2   : > { %v626_v1 = vadd.f32 %v611_v54, %v554_v60  ;;  %v1136_v3 = vpop.f32.mrf.mxu1  ;;  %v698_v5 = vadd.f32 %v1124_v45, %v628_v62 }
  0xf3   : > { %v1119_v58 = vpop.f32.mrf.mxu0 }
  0xf4   : > { %v629_v6 = vadd.f32 %v1119_v58, %v557_v0  ;;  %v696_v8 = vadd.f32 %v681_v49, %v626_v1  ;;  %v811_v11 = vpop.f32.mrf.mxu1 }
  0xf5   : > { %v614_v63 = vpop.f32.mrf.mxu0 }
  0xf6   : > { %v627_v9 = vadd.f32 %v614_v63, %v555_v4  ;;  %v699_v14 = vadd.f32 %v1125_v53, %v629_v6  ;;  %v1137_v23 = vpop.f32.mrf.mxu1 }
  0xf7   : > { %v1130_v2 = vpop.f32.mrf.mxu0 }
  0xf8   : > { %v760_v10 = vadd.f32 %v1130_v2, %v698_v5  ;;  %v697_v18 = vadd.f32 %v684_v59, %v627_v9  ;;  %v814_v33 = vpop.f32.mrf.mxu1 }
  0xf9   : > { %v743_v7 = vpop.f32.mrf.mxu0 }
  0xfa   : > { %v758_v15 = vadd.f32 %v743_v7, %v696_v8  ;;  %v828_v19 = vadd.f32 %v1136_v3, %v760_v10 }
  0xfb   : > { %v1131_v12 = vpop.f32.mrf.mxu0 }
  0xfc   : > { %v761_v20 = vadd.f32 %v1131_v12, %v699_v14  ;;  %v826_v25 = vadd.f32 %v811_v11, %v758_v15 }
  0xfd   : > { %v746_v16 = vpop.f32.mrf.mxu0 }
  0xfe   : > { %v759_v27 = vadd.f32 %v746_v16, %v697_v18  ;;  %v829_v30 = vadd.f32 %v1137_v23, %v761_v20 }
  0xff   : > { %v1142_v24 = vpop.f32.mrf.mxu0 }
 0x100   : > { %v894_v28 = vadd.f32 %v1142_v24, %v828_v19  ;;  %v827_v35 = vadd.f32 %v814_v33, %v759_v27 }
 0x101   : > { %v877_v26 = vpop.f32.mrf.mxu0 }
 0x102   : > { %v906_v22 = vadd.f32 %v1060_v21, %v894_v28  ;;  %v892_v31 = vadd.f32 %v877_v26, %v826_v25 }
 0x103   : > { %v1143_v34 = vpop.f32.mrf.mxu0 }
 0x104   : > { %910 = vst.msk [vmem:[%s226_s5 + $0x10] sm:$0xff] %vm291_vm2, %v906_v22  ;;  %v904_v36 = vadd.f32 %v1056_v29, %v892_v31  ;;  %v895_v37 = vadd.f32 %v1143_v34, %v829_v30 }
 0x105   : > { %v880_v39 = vpop.f32.mrf.mxu0 }
 0x106   : > { %908 = vst.msk [vmem:[%s226_s5] sm:$0xff] %vm291_vm2, %v904_v36  ;;  %v907_v40 = vadd.f32 %v1061_v32, %v895_v37  ;;  %v893_v41 = vadd.f32 %v880_v39, %v827_v35 }
 0x108   : > { %911 = vst.msk [vmem:[%s226_s5 + $0x18] sm:$0xff] %vm291_vm2, %v907_v40  ;;  %v905_v42 = vadd.f32 %v1057_v38, %v893_v41 }
 0x10a   : > { %909 = vst.msk [vmem:[%s226_s5 + $0x8] sm:$0xff] %vm291_vm2, %v905_v42 }
 0x10b PF: > { %s13_s16 = sadd.s32 1, %s1237_s16   ;;  %s1437_s12 = smov %s1229_s14 }
 0x10c   : > { %p10_p7 = scmp.ge.s32.totalorder %s13_s16, 6   ;;  %s1438_s13 = smov %s1233_s15 }
 0x10d   : > { %s1439_s14 = smov %s1442_s17  ;;  %s1440_s15 = smov %s1446_s18 }
 0x10e   :  { %12 = sbr.rel (!%p10_p7) target bundleno = 3 (0x3), region = 74 }

// kernel: network_block_forward.4
= control target key start
LH: loop header
LB: loop body
LE: loop exit
PB: predicated region body
PF: predicated region fallthrough
CT: control target
= control target key end

     0   :  { %s1280_s27 = smov 0   ;;  %s1282_s28 = smov 0   ;;  %s1648_s0 = inlined_call_operand.vmem [shape: bf16[2,9,9,16], index: 0, kind: input, shape index: {}]   ;;  %s1649_s1 = inlined_call_operand.vmem [shape: bf16[4,16,8], index: 1, kind: input, shape index: {}]   ;;  %s1650_s2 = inlined_call_operand.vmem [shape: f32[1,1,16], index: 2, kind: input, shape index: {}]   ;;  %s1651_s3 = inlined_call_operand.vmem [shape: f32[1,1,16], index: 3, kind: input, shape index: {}]   ;;  %s1652_s4 = inlined_call_operand.vmem [shape: bf16[16,8], index: 4, kind: input, shape index: {}]   ;;  %s1653_s5 = inlined_call_operand.vmem [shape: f32[1,8], index: 5, kind: input, shape index: {}]   ;;  %s1654_s6 = inlined_call_operand.vmem [shape: f32[1,8], index: 6, kind: input, shape index: {}]   ;;  %s1655_s7 = inlined_call_operand.vmem [shape: bf16[128,8], index: 7, kind: output, shape index: {0}]   ;;  %s1656_s8 = inlined_call_operand.vmem [shape: bf16[128,8], index: 8, kind: output, shape index: {1}]  }
   0x1   :  { %s1284_s29 = smov 0   ;;  %s1286_s30 = smov 0  }
   0x2   :  { %s1288_s9 = smov 0  }
   0x3 LB: > { %s28_s10 = sadd.s32 1, %s1224_s29  ;;  %s31_s11 = sadd.s32 1, %s1228_s30  ;;  %s1232_s9 = sphi %s1288_s9, %s19_s9   ;;  %s1228_s30 = sphi %s1286_s30, %s1710_s30   ;;  %s1224_s29 = sphi %s1284_s29, %s1709_s29   ;;  %s1220_s28 = sphi %s1282_s28, %s1708_s28   ;;  %s1216_s27 = sphi %s1280_s27, %s1707_s27  }
   0x4   : > { %p29_p0 = scmp.ge.s32.totalorder %s28_s10, 2  ;;  %p1046_p1 = scmp.ge.s32.totalorder %s1232_s9, 1 }
   0x5   : > { %p285_p2 = scmp.lt.s32.totalorder %s1232_s9, 5 }
   0x6   : > { %s1712_s10 = smov (%p29_p0, %s28_s10), 0  ;;  %s1714_s11 = smov (!%p29_p0, %s31_s11), %s1228_s30 }
   0x7   : > { %p286_p3 = pnand %p1046_p1, %p285_p2  ;;  %p33_p4 = scmp.ge.s32.totalorder %s1714_s11, 2 }
   0x8   : > { %p328_p5 = scmp.lt.s32.totalorder (!%p286_p3), %s1220_s28, 1  ;;  %s1054_s14 = sshll.u32 (!%p286_p3), %s1216_s27, 2 }
   0x9   : > { %s1716_s11 = smov (%p33_p4, %s1714_s11), 0  ;;  %289 = sbr.rel (%p286_p3) target bundleno = 279 (0x117), region = 48 }
   0xa   : > { %s1093_s16 = sshll.u32 (!%p286_p3), %s1216_s27, 5  ;;  %s1048_s19 = sshll.u32 (!%p286_p3), %s1220_s28, 1 }
   0xb   : > { %s334_s20 = sadd.s32 (!%p286_p3), %s1216_s27, %s1048_s19 }
   0xc   : > { %s1049_s21 = sshll.u32 (!%p286_p3), %s334_s20, 2 }
   0xd   : > { %p336_p6 = scmp.lt.s32.totalorder (!%p286_p3), %s1049_s21, 15 }
   0xe   : > { %v1189_v0 = vld [vmem:[%s1652_s4] sm:$0xff]   ;;  %v427_v1 = vlaneseq  ;;  %s329_s15 = scalar_select %p328_p5, %s1220_s28, 1  ;;  %v1320_v2 = vstv %s1054_s14  ;;  %v1190_v6 = vld [vmem:[%s1649_s1 + $0x8] sm:$0xff]   ;;  %vm1234_vm7 = vmmov 1   ;;  %v1412_v30 = vld [vmem:[%s1649_s1 + $0x10] sm:$0xff]  }
   0xf   : > { %1117 = vmatprep.subr.bf16.mxu0 %v1189_v0  ;;  %v423_v4 = vadd.s32 1, %v1320_v2  ;;  %v424_v5 = vadd.s32 2, %v1320_v2  ;;  %v1344_v8 = vld [vmem:[%s1650_s2] ss:$0 sm:$0xff]  ;;  %vm438_vm5 = vcmp.eq.s32.totalorder %v1320_v2, 0  ;;  %1123 = vmatprep.subr.bf16.mxu1 %v1190_v6  ;;  %vm449_vm12 = vcmp.eq.s32.totalorder %v1320_v2, 8 }
  0x10   : > { %v1322_v3 = vand.u32 127, %v427_v1  ;;  %1118 = vmatpush3.bf16.msra.mxu0 %v1189_v0  ;;  %s1147_s17 = smul.u32 72, %s329_s15  ;;  %v1359_v10 = vld [vmem:[%s1649_s1] sm:$0xff]   ;;  %1124 = vmatpush3.bf16.msra.mxu1 %v1190_v6  ;;  %v428_v13 = vshrl.u32 %v427_v1, 7  ;;  %v425_v46 = vadd.s32 3, %v1320_v2  ;;  %v426_v58 = vadd.s32 4, %v1320_v2 }
  0x11   : > { %vm439_vm6 = vcmp.eq.s32.totalorder %v423_v4, 0  ;;  %vm440_vm10 = vcmp.eq.s32.totalorder %v424_v5, 0  ;;  %1129 = vmatprep.subr.bf16.mxu0 %v1359_v10  ;;  %vm450_vm14 = vcmp.eq.s32.totalorder %v423_v4, 8  ;;  %v1393_v25 = vld [vmem:[%s1651_s3] ss:$0 sm:$0xff]  ;;  %1135 = vmatprep.subr.bf16.mxu1 %v1412_v30  ;;  %s1718_s21 = smov (!%p336_p6, %s1049_s21), 15 }
  0x12   : > { %vm1657_vm0 = vcmp.ge.s32.totalorder %v1322_v3, 8  ;;  %vm433_vm1 = vcmp.ge.s32.totalorder %v1322_v3, 4  ;;  %vm434_vm2 = vcmp.lt.s32.totalorder %v1322_v3, 8  ;;  %vm436_vm4 = vcmp.ge.s32.totalorder %v1322_v3, 12  ;;  %s332_s22 = scalar_lea.vmem %s1648_s0, %s1147_s17 }
  0x13   : > { %vm1333_vm3 = vmand %vm433_vm1, %vm434_vm2  ;;  %s1347_s25 = scalar_lea.vmem %s332_s22, %s1093_s16  ;;  %vm451_vm1 = vcmp.eq.s32.totalorder %v424_v5, 8  ;;  %v429_v31 = vadd.s32 8, %v428_v13  ;;  %s1050_s22 = sshll.u32 %s1718_s21, 2 }
  0x14   : > { %vm1352_vm8 = vmxor %vm1657_vm0, %vm1234_vm7  ;;  %v358_v11 = vld [vmem:[%s1347_s25] ss:$8 sps:$4 sm:$0xff]   ;;  %v359_v12 = vld [vmem:[%s1347_s25 + $0x4] sm:$0x1]  ;;  %s339_s15 = scalar_lea.vmem %s1655_s7, %s1050_s22 }
  0x15   : > { %vm1365_vm9 = vmor %vm1333_vm3, %vm436_vm4  ;;  %v362_v15 = vld [vmem:[%s1347_s25 + $0x10] ss:$8 sps:$4 sm:$0xff]   ;;  %v368_v16 = vunpack.c.l.bf16 %v358_v11  ;;  %v369_v17 = vunpack.c.l.bf16 %v359_v12  ;;  %v370_v18 = vunpack.c.h.bf16 %v358_v11  ;;  %v361_v20 = vld [vmem:[%s1347_s25 + $0xc] sm:$0x1] }
  0x16   : > { %vm1374_vm11 = vmand %vm438_vm5, %vm1352_vm8  ;;  %v371_v22 = vunpack.c.l.bf16 %v361_v20  ;;  %v372_v27 = vunpack.c.l.bf16 %v362_v15  ;;  %v374_v35 = vunpack.c.h.bf16 %v362_v15  ;;  %v363_v38 = vld [vmem:[%s1347_s25 + $0x14] sm:$0x1]  ;;  %v365_v41 = vld [vmem:[%s1347_s25 + $0x1c] sm:$0x1] }
  0x17   : > { %vm1384_vm13 = vmand %vm439_vm6, %vm1352_vm8  ;;  %v385_v23 = vmul.f32 %v1344_v8, %v368_v16  ;;  %v386_v24 = vmul.f32 %v1344_v8, %v369_v17  ;;  %v387_v28 = vmul.f32 %v1344_v8, %v370_v18  ;;  %v366_v42 = vld [vmem:[%s1347_s25 + $0x20] sm:$0xf]  ;;  %v367_v47 = vld [vmem:[%s1347_s25 + $0x24] sm:$0x1]  ;;  %v373_v48 = vunpack.c.l.bf16 %v363_v38  ;;  %s349_s25 = scalar_lea.vmem %s1656_s8, %s1050_s22 }
  0x18   : > { %vm1398_vm15 = vmand %vm440_vm10, %vm1352_vm8  ;;  %v388_v36 = vmul.f32 %v1344_v8, %v371_v22  ;;  %v389_v39 = vmul.f32 %v1344_v8, %v372_v27  ;;  %vm464_vm10 = vcmp.eq.s32.totalorder %v428_v13, 0  ;;  %v391_v45 = vmul.f32 %v1344_v8, %v374_v35 }
  0x19   : > { %vm1405_vm2 = vmand %vm449_vm12, %vm1657_vm0  ;;  %v402_v33 = vadd.f32 %v1393_v25, %v385_v23  ;;  %v403_v37 = vadd.f32 %v1393_v25, %v386_v24  ;;  %v404_v40 = vadd.f32 %v1393_v25, %v387_v28  ;;  %v375_v51 = vunpack.c.l.bf16 %v365_v41 }
  0x1a   : > { %vm1416_vm3 = vmand %vm450_vm14, %vm1657_vm0  ;;  %vm470_vm14 = vcmp.eq.s32.totalorder %v429_v31, 8  ;;  %v405_v43 = vadd.f32 %v1393_v25, %v388_v36  ;;  %v406_v52 = vadd.f32 %v1393_v25, %v389_v39  ;;  %v376_v55 = vunpack.c.l.bf16 %v366_v42 }
  0x1b   : > { %vm1423_vm4 = vmand %vm451_vm1, %vm1657_vm0  ;;  %v412_v44 = vmax.f32 %v402_v33, 0.0  ;;  %v413_v49 = vmax.f32 %v403_v37, 0.0  ;;  %v414_v53 = vmax.f32 %v404_v40, 0.0  ;;  %v377_v56 = vunpack.c.l.bf16 %v367_v47 }
  0x1c   : > { %vm459_vm5 = vmor %vm1374_vm11, %vm1405_vm2  ;;  %v415_v57 = vmax.f32 %v405_v43, 0.0  ;;  %v408_v60 = vadd.f32 %v1393_v25, %v391_v45  ;;  %v390_v61 = vmul.f32 %v1344_v8, %v373_v48  ;;  %v392_v0 = vmul.f32 %v1344_v8, %v375_v51 }
  0x1d   : > { %vm460_vm6 = vmor %vm1384_vm13, %vm1416_vm3  ;;  %v416_v1 = vmax.f32 %v406_v52, 0.0  ;;  %v393_v5 = vmul.f32 %v1344_v8, %v376_v55  ;;  %v394_v11 = vmul.f32 %v1344_v8, %v377_v56  ;;  %vm1683_vm3 = vcmask 1046528  }
  0x1e   : > { %vm466_vm1 = vmxor %vm1365_vm9, %vm1234_vm7  ;;  %v418_v13 = vmax.f32 %v408_v60, 0.0  ;;  %v407_v15 = vadd.f32 %v1393_v25, %v390_v61  ;;  %v409_v18 = vadd.f32 %v1393_v25, %v392_v0 }
  0x1f   : > { %vm1454_vm0 = vmand %vm464_vm10, %vm466_vm1  ;;  %vm452_vm1 = vcmp.eq.s32.totalorder %v425_v46, 8  ;;  %v410_v21 = vadd.f32 %v1393_v25, %v393_v5  ;;  %v411_v22 = vadd.f32 %v1393_v25, %v394_v11  ;;  %v1193_v25 = vld [vmem:[%s1649_s1 + $0x18] sm:$0xff]   ;;  %v1080_v11 = vld [vmem:[%s1653_s5] ss:$0 sm:$0xff] }
  0x20   : > { %vm1461_vm12 = vmand %vm470_vm14, %vm1365_vm9  ;;  %vm441_vm14 = vcmp.eq.s32.totalorder %v425_v46, 0  ;;  %v417_v27 = vmax.f32 %v407_v15, 0.0  ;;  %v419_v31 = vmax.f32 %v409_v18, 0.0 }
  0x21   : > { %vm475_vm10 = vmor %vm459_vm5, %vm1454_vm0  ;;  %v420_v9 = vmax.f32 %v410_v21, 0.0  ;;  %v421_v33 = vmax.f32 %v411_v22, 0.0 }
  0x22   : > { %vm476_vm9 = vmor %vm459_vm5, %vm1461_vm12  ;;  %v485_v59 = vsel %vm475_vm10, 0.0, %v412_v44 }
  0x23   : > { %vm477_vm7 = vmor %vm460_vm6, %vm1454_vm0  ;;  %v486_v62 = vsel %vm476_vm9, 0.0, %v413_v49  ;;  %v572_v63 = vrot.slane %v485_v59, 1  ;;  %vm442_vm9 = vcmp.eq.s32.totalorder %v426_v58, 0 }
  0x24   : > { %vm478_vm11 = vmor %vm460_vm6, %vm1461_vm12  ;;  %v1497_v2 = vsel %vm477_vm7, 0.0, %v414_v53  ;;  %v573_v4 = vrot.slane %v486_v62, 1  ;;  %vm1684_vm6 = vcmask 130048   ;;  %vm1685_vm7 = vcmp.ge.s32.totalorder %v1322_v3, 8 }
  0x25   : > { %vm1680_vm2 = vmor %vm1398_vm15, %vm1423_vm4  ;;  %v495_v6 = vpack.c.bf16 %v1497_v2, %v485_v59  ;;  %v575_v7 = vrot.slane %v1497_v2, 1  ;;  %v488_v12 = vsel %vm478_vm11, 0.0, %v415_v57  ;;  %vm453_vm11 = vcmp.eq.s32.totalorder %v426_v58, 8 }
  0x26   : > { %vm479_vm5 = vmor %vm1680_vm2, %vm1454_vm0  ;;  %v574_v16 = vsel %vm1683_vm3, %v572_v63, %v573_v4  ;;  %v576_v17 = vrot.slane %v488_v12, 1 }
  0x27   : > { %vm1513_vm13 = vmand %vm441_vm14, %vm1352_vm8  ;;  %1119 = vmatprep.mubr.msk.bf16.mxu0 %vm1684_vm6, %v495_v6  ;;  %v489_v19 = vsel %vm479_vm5, 0.0, %v416_v1 }
  0x28   : > { %vm1523_vm10 = vmand %vm452_vm1, %vm1685_vm7  ;;  %v578_v3 = vrot.slane %v489_v19, 1  ;;  %v709_v43 = vpack.c.bf16 %v489_v19, %v1497_v2 }
  0x29   : > { %vm462_vm14 = vmor %vm1513_vm13, %vm1523_vm10  ;;  %vm1698_vm13 = vcmask 1046528  }
  0x2a   : > { %vm1688_vm2 = vmmov %vm1683_vm3 }
  0x2b   : > { %v577_v20 = vsel %vm1688_vm2, %v575_v7, %v576_v17  ;;  %vm481_vm1 = vmor %vm462_vm14, %vm1454_vm0  ;;  %v1081_v17 = vld [vmem:[%s1654_s6] ss:$0 sm:$0xff] }
  0x2c   : > { %v588_v23 = vpack.c.bf16 %v577_v20, %v574_v16  ;;  %v491_v24 = vsel %vm481_vm1, 0.0, %v418_v13  ;;  %vm1544_vm5 = vmand %vm442_vm9, %vm1352_vm8 }
  0x2d   : > { %v496_v29 = vpack.c.bf16 %v491_v24, %v489_v19  ;;  %vm1691_vm3 = vmmov %vm1685_vm7  ;;  %vm1694_vm7 = vcmask 130048   ;;  %v581_v36 = vrot.slane %v491_v24, 1 }
  0x2e   : > { %vm1550_vm6 = vmand %vm453_vm11, %vm1691_vm3  ;;  %1125 = vmatprep.mubr.msk.bf16.mxu1 %vm1694_vm7, %v588_v23 }
  0x2f   : > { %vm463_vm8 = vmor %vm1544_vm5, %vm1550_vm6 }
  0x30   : > { %vm1695_vm9 = vmmov %vm1694_vm7 }
  0x31   : > { %1120 = vmatmul.mubr.msk.bf16.vlgmr.msra.gmra.mxu0 %vm1695_vm9, %v496_v29  ;;  %vm1696_vm11 = vmor %vm1398_vm15, %vm1423_vm4  ;;  %vm897_vm9 = vcmask 60416  }
  0x32   : > { %vm480_vm2 = vmor %vm1696_vm11, %vm1461_vm12  ;;  %1130 = vmatpush3.bf16.msra.mxu0 %v1359_v10 }
  0x33   : > { %vm482_vm1 = vmor %vm462_vm14, %vm1461_vm12  ;;  %v490_v35 = vsel %vm480_vm2, 0.0, %v417_v27  ;;  %1141 = vmatprep.subr.bf16.mxu0 %v1193_v25 }
  0x34   : > { %vm1697_vm3 = vmmov %vm1694_vm7  ;;  %v492_v10 = vsel %vm482_vm1, 0.0, %v419_v31  ;;  %v579_v26 = vrot.slane %v490_v35, 1 }
  0x35   : > { %1131 = vmatprep.mubr.msk.bf16.mxu0 %vm1697_vm3, %v495_v6  ;;  %vm483_vm15 = vmor %vm463_vm8, %vm1454_vm0  ;;  %v582_v34 = vrot.slane %v492_v10, 1 }
  0x36   : > { %vm484_vm4 = vmor %vm463_vm8, %vm1461_vm12  ;;  %v493_v37 = vsel %vm483_vm15, 0.0, %v420_v9  ;;  %v580_v39 = vsel %vm1698_vm13, %v578_v3, %v579_v26 }
  0x37   : > { %v494_v38 = vsel %vm484_vm4, 0.0, %v421_v33  ;;  %vm1699_vm10 = vmmov %vm1698_vm13  ;;  %v781_v41 = vrot.slane %v493_v37, 1  ;;  %v785_v45 = vpack.c.bf16 %v580_v39, %v577_v20  ;;  %v710_v48 = vpack.c.bf16 %v493_v37, %v491_v24 }
  0x38   : > { %v583_v40 = vsel %vm1699_vm10, %v581_v36, %v582_v34  ;;  %v782_v42 = vrot.slane %v494_v38, 1  ;;  %vm1700_vm0 = vmmov %vm1697_vm3 }
  0x39   : > { %v589_v44 = vpack.c.bf16 %v583_v40, %v580_v39  ;;  %vm1701_vm14 = vmmov %vm1700_vm0 }
  0x3a   : > { %1132 = vmatmul.mubr.msk.bf16.vlgmr.msra.gmra.mxu0 %vm1701_vm14, %v496_v29  ;;  %vm1702_vm12 = vmmov %vm1699_vm10 }
  0x3b   : > { %1126 = vmatmul.mubr.msk.bf16.vlgmr.msra.gmra.mxu1 %vm1700_vm0, %v589_v44  ;;  %v783_v46 = vsel %vm1702_vm12, %v781_v41, %v782_v42  ;;  %1142 = vmatpush3.bf16.msra.mxu0 %v1193_v25  ;;  %vm1703_vm5 = vmmov %vm1700_vm0 }
  0x3c   : > { %1136 = vmatpush3.bf16.msra.mxu1 %v1412_v30  ;;  %1137 = vmatprep.mubr.msk.bf16.mxu1 %vm1703_vm5, %v709_v43  ;;  %vm1704_vm6 = vmmov %vm1700_vm0  ;;  %v786_v47 = vpack.c.bf16 %v783_v46, %v583_v40 }
  0x3d   : > { %1143 = vmatprep.mubr.msk.bf16.mxu0 %vm1704_vm6, %v785_v45  ;;  %vm1705_vm7 = vmmov %vm1700_vm0 }
  0x3e   : > { %vm1706_vm8 = vmmov %vm1700_vm0 }
  0x42   : > { %1144 = vmatmul.mubr.msk.bf16.vlgmr.msra.gmra.mxu0 %vm1706_vm8, %v786_v47 }
  0x43   : > { %1138 = vmatmul.mubr.msk.bf16.vlgmr.msra.gmra.mxu1 %vm1705_vm7, %v710_v48 }
  0xf1   : > { %v1121_v30 = vpop.f32.mrf.mxu0 }
  0xf2   : > { %v1100_v49 = vpack.c.bf16 %v1121_v30, %v1121_v30 }
  0xf3   : > { %v548_v50 = vpop.f32.mrf.mxu0 }
  0xf4   : > { %920 = vst.msk [vmem:[%s349_s25 + $0x8] sm:$0xf] %vm897_vm9, %v1100_v49  ;;  %v1098_v51 = vpack.c.bf16 %v548_v50, %v548_v50 }
  0xf5   : > { %v1122_v52 = vpop.f32.mrf.mxu0 }
  0xf6   : > { %918 = vst.msk [vmem:[%s349_s25] sm:$0xf] %vm897_vm9, %v1098_v51  ;;  %v1101_v53 = vpack.c.bf16 %v1122_v52, %v1122_v52 }
  0xf7   : > { %v551_v54 = vpop.f32.mrf.mxu0 }
  0xf8   : > { %921 = vst.msk [vmem:[%s349_s25 + $0xc] sm:$0xf] %vm897_vm9, %v1101_v53  ;;  %v1099_v55 = vpack.c.bf16 %v551_v54, %v551_v54 }
  0xfa   : > { %v1133_v57 = vpop.f32.mrf.mxu0  ;;  %919 = vst.msk [vmem:[%s349_s25 + $0x4] sm:$0xf] %vm897_vm9, %v1099_v55 }
  0xfb   : > { %v1127_v56 = vpop.f32.mrf.mxu1 }
  0xfc   : > { %v694_v59 = vpop.f32.mrf.mxu0  ;;  %v703_v62 = vadd.f32 %v1133_v57, %v1127_v56 }
  0xfd   : > { %v639_v58 = vpop.f32.mrf.mxu1 }
  0xfe   : > { %v1134_v61 = vpop.f32.mrf.mxu0  ;;  %v695_v1 = vadd.f32 %v694_v59, %v639_v58 }
  0xff   : > { %v1128_v60 = vpop.f32.mrf.mxu1 }
 0x100   : > { %v697_v0 = vpop.f32.mrf.mxu0  ;;  %v706_v6 = vadd.f32 %v1134_v61, %v1128_v60 }
 0x101   : > { %v642_v63 = vpop.f32.mrf.mxu1 }
 0x102   : > { %v1145_v4 = vpop.f32.mrf.mxu0  ;;  %v698_v14 = vadd.f32 %v697_v0, %v642_v63 }
 0x103   : > { %v1139_v2 = vpop.f32.mrf.mxu1 }
 0x104   : > { %v777_v5 = vadd.f32 %v1139_v2, %v703_v62  ;;  %v836_v12 = vpop.f32.mrf.mxu0 }
 0x105   : > { %v760_v7 = vpop.f32.mrf.mxu1 }
 0x106   : > { %v775_v13 = vadd.f32 %v760_v7, %v695_v1  ;;  %v853_v15 = vadd.f32 %v1145_v4, %v777_v5  ;;  %v1146_v8 = vpop.f32.mrf.mxu0 }
 0x107   : > { %v1140_v16 = vpop.f32.mrf.mxu1 }
 0x108   : > { %v778_v18 = vadd.f32 %v1140_v16, %v706_v6  ;;  %v864_v19 = vmul.f32 %v1080_v11, %v853_v15  ;;  %v851_v20 = vadd.f32 %v836_v12, %v775_v13  ;;  %v839_v22 = vpop.f32.mrf.mxu0 }
 0x109   : > { %v763_v21 = vpop.f32.mrf.mxu1 }
 0x10a   : > { %v875_v23 = vadd.f32 %v1081_v17, %v864_v19  ;;  %v776_v24 = vadd.f32 %v763_v21, %v698_v14  ;;  %v862_v27 = vmul.f32 %v1080_v11, %v851_v20  ;;  %v854_v28 = vadd.f32 %v1146_v8, %v778_v18 }
 0x10c   : > { %v879_v29 = vmax.f32 %v875_v23, 0.0  ;;  %v873_v31 = vadd.f32 %v1081_v17, %v862_v27  ;;  %v865_v32 = vmul.f32 %v1080_v11, %v854_v28  ;;  %v852_v25 = vadd.f32 %v839_v22, %v776_v24 }
 0x10e   : > { %v1096_v9 = vpack.c.bf16 %v879_v29, %v879_v29  ;;  %v877_v33 = vmax.f32 %v873_v31, 0.0  ;;  %v876_v3 = vadd.f32 %v1081_v17, %v865_v32  ;;  %v863_v35 = vmul.f32 %v1080_v11, %v852_v25 }
 0x110   : > { %900 = vst.msk [vmem:[%s339_s15 + $0x8] sm:$0xf] %vm897_vm9, %v1096_v9  ;;  %v1094_v36 = vpack.c.bf16 %v877_v33, %v877_v33  ;;  %v880_v10 = vmax.f32 %v876_v3, 0.0  ;;  %v874_v26 = vadd.f32 %v1081_v17, %v863_v35 }
 0x112   : > { %898 = vst.msk [vmem:[%s339_s15] sm:$0xf] %vm897_vm9, %v1094_v36  ;;  %v1097_v34 = vpack.c.bf16 %v880_v10, %v880_v10  ;;  %v878_v37 = vmax.f32 %v874_v26, 0.0 }
 0x114   : > { %901 = vst.msk [vmem:[%s339_s15 + $0xc] sm:$0xf] %vm897_vm9, %v1097_v34  ;;  %v1095_v38 = vpack.c.bf16 %v878_v37, %v878_v37 }
 0x116   : > { %899 = vst.msk [vmem:[%s339_s15 + $0x4] sm:$0xf] %vm897_vm9, %v1095_v38 }
 0x117 PF: > { %s19_s9 = sadd.s32 1, %s1232_s9   ;;  %s1707_s27 = smov %s1224_s29 }
 0x118   : > { %p16_p7 = scmp.ge.s32.totalorder %s19_s9, 6   ;;  %s1708_s28 = smov %s1228_s30 }
 0x119   : > { %s1709_s29 = smov %s1712_s10  ;;  %s1710_s30 = smov %s1716_s11 }
 0x11a   :  { %18 = sbr.rel (!%p16_p7) target bundleno = 3 (0x3), region = 94 }

// kernel: network_block_forward.7
= control target key start
LH: loop header
LB: loop body
LE: loop exit
PB: predicated region body
PF: predicated region fallthrough
CT: control target
= control target key end

     0   :  { %s1246_s12 = smov 0   ;;  %s1248_s13 = smov 0   ;;  %s1419_s0 = inlined_call_operand.vmem [shape: bf16[2,10,10,8], index: 0, kind: input, shape index: {}]   ;;  %s1420_s1 = inlined_call_operand.vmem [shape: bf16[9,8,8], index: 1, kind: input, shape index: {}]   ;;  %s1421_s2 = inlined_call_operand.vmem [shape: f32[128,8], index: 2, kind: input, shape index: {}]   ;;  %s1422_s3 = inlined_call_operand.vmem [shape: f32[128,8], index: 3, kind: output, shape index: {}]  }
   0x1   :  { %s1250_s14 = smov 0   ;;  %s1252_s15 = smov 0  }
   0x2   :  { %s1254_s16 = smov 0  }
   0x3 LB: > { %s22_s17 = sadd.s32 1, %s1216_s14  ;;  %s25_s18 = sadd.s32 1, %s1220_s15  ;;  %s1224_s16 = sphi %s1254_s16, %s13_s16   ;;  %s1220_s15 = sphi %s1252_s15, %s1426_s15   ;;  %s1216_s14 = sphi %s1250_s14, %s1425_s14   ;;  %s1212_s13 = sphi %s1248_s13, %s1424_s13   ;;  %s1208_s12 = sphi %s1246_s12, %s1423_s12  }
   0x4   : > { %p23_p0 = scmp.ge.s32.totalorder %s22_s17, 2  ;;  %p1004_p1 = scmp.ge.s32.totalorder %s1224_s16, 1 }
   0x5   : > { %p172_p2 = scmp.lt.s32.totalorder %s1224_s16, 5 }
   0x6   : > { %s1428_s17 = smov (%p23_p0, %s22_s17), 0  ;;  %s1430_s18 = smov (!%p23_p0, %s25_s18), %s1220_s15 }
   0x7   : > { %p173_p3 = pnand %p1004_p1, %p172_p2  ;;  %p27_p4 = scmp.ge.s32.totalorder %s1430_s18, 2 }
   0x8   : > { %p205_p5 = scmp.lt.s32.totalorder (!%p173_p3), %s1212_s13, 1  ;;  %s1049_s29 = sshll.u32 (!%p173_p3), %s1208_s12, 5 }
   0x9   : > { %s1432_s18 = smov (%p27_p4, %s1430_s18), 0  ;;  %176 = sbr.rel (%p173_p3) target bundleno = 267 (0x10b), region = 32 }
   0xa   : > { %s1006_s24 = sshll.u32 (!%p173_p3), %s1212_s13, 1 }
   0xb   : > { %s211_s25 = sadd.s32 (!%p173_p3), %s1208_s12, %s1006_s24 }
   0xc   : > { %s1007_s26 = sshll.u32 (!%p173_p3), %s211_s25, 2 }
   0xd   : > { %p213_p6 = scmp.lt.s32.totalorder (!%p173_p3), %s1007_s26, 15 }
   0xe   : > { %v1017_v0 = vld [vmem:[%s1420_s1 + $0x4] sm:$0xf]  ;;  %vm298_vm0 = vcmask 1043456   ;;  %v261_v1 = vld [vmem:[%s1420_s1] sm:$0xf]  ;;  %s206_s23 = scalar_select %p205_p5, %s1212_s13, 1 }
   0xf   : > { %1131 = vmatprep.subr.msk.bf16.mxu0 %vm298_vm0, %v1017_v0  ;;  %v300_v2 = vsel %vm298_vm0, %v1017_v0, 0  ;;  %1132 = vmatprep.subr.msk.bf16.mxu1 %vm298_vm0, %v261_v1  ;;  %v358_v3 = vsel %vm298_vm0, %v261_v1, 0  ;;  %v1022_v4 = vld [vmem:[%s1420_s1 + $0x8] sm:$0xf]  ;;  %v1027_v5 = vld [vmem:[%s1420_s1 + $0xc] sm:$0xf] }
  0x10   : > { %1078 = vmatpush3.bf16.msra.mxu0 %v300_v2  ;;  %1084 = vmatpush3.bf16.msra.mxu1 %v358_v3  ;;  %s1140_s28 = smul.u32 80, %s206_s23  ;;  %vm270_vm1 = vcmask 1046528   ;;  %vm291_vm2 = vcmask 64512   ;;  %vm409_vm3 = vcmask 1045504   ;;  %v503_v27 = vsel %vm298_vm0, %v1027_v5, 0  ;;  %s1434_s26 = smov (!%p213_p6, %s1007_s26), 15 }
  0x11   : > { %1133 = vmatprep.subr.msk.bf16.mxu0 %vm298_vm0, %v1022_v4  ;;  %1134 = vmatprep.subr.msk.bf16.mxu1 %vm298_vm0, %v1027_v5  ;;  %v437_v31 = vsel %vm298_vm0, %v1022_v4, 0  ;;  %v1033_v32 = vld [vmem:[%s1420_s1 + $0x14] sm:$0xf]  ;;  %v1030_v54 = vld [vmem:[%s1420_s1 + $0x10] sm:$0xf]  ;;  %s1008_s12 = sshll.u32 %s1434_s26, 3 }
  0x12   : > { %s209_s5 = scalar_lea.vmem %s1419_s0, %s1140_s28  ;;  %v645_v1 = vsel %vm298_vm0, %v1033_v32, 0  ;;  %v1040_v4 = vld [vmem:[%s1420_s1 + $0x1c] sm:$0xf]  ;;  %s216_s28 = scalar_lea.vmem %s1421_s2, %s1008_s12 }
  0x13   : > { %s1304_s6 = scalar_lea.vmem %s209_s5, %s1049_s29  ;;  %s226_s4 = scalar_lea.vmem %s1422_s3, %s1008_s12 }
  0x14   : > { %v235_v6 = vld [vmem:[%s1304_s6] sm:$0xf]  ;;  %v236_v7 = vld [vmem:[%s1304_s6 + $0x4] sm:$0x1]  ;;  %v237_v8 = vld [vmem:[%s1304_s6 + $0x8] sm:$0xf] }
  0x15   : > { %v238_v9 = vld [vmem:[%s1304_s6 + $0xc] sm:$0x1]  ;;  %v239_v10 = vld [vmem:[%s1304_s6 + $0x10] sm:$0xf]  ;;  %v240_v11 = vld [vmem:[%s1304_s6 + $0x14] sm:$0x1]  ;;  %v247_v12 = vunpack.c.l.bf16 %v235_v6  ;;  %v248_v13 = vunpack.c.l.bf16 %v236_v7  ;;  %v249_v14 = vunpack.c.l.bf16 %v237_v8  ;;  %v1015_v15 = vcombine.low %v235_v6, %v237_v8 }
  0x16   : > { %v1313_v16 = vld [vmem:[%s1304_s6 + $0x18] sm:$0xf]  ;;  %v242_v17 = vld [vmem:[%s1304_s6 + $0x1c] sm:$0x1]  ;;  %v250_v18 = vunpack.c.l.bf16 %v238_v9  ;;  %v251_v19 = vunpack.c.l.bf16 %v239_v10  ;;  %v252_v20 = vunpack.c.l.bf16 %v240_v11  ;;  %v1025_v21 = vcombine.low %v237_v8, %v239_v10  ;;  %v1317_v22 = vld [vmem:[%s1304_s6 + $0x20] sm:$0xf] }
  0x17   : > { %v244_v23 = vld [vmem:[%s1304_s6 + $0x24] sm:$0x1]  ;;  %v253_v24 = vunpack.c.l.bf16 %v1313_v16  ;;  %v254_v25 = vunpack.c.l.bf16 %v242_v17  ;;  %1085 = vmatprep.mubr.msk.bf16.mxu1 %vm291_vm2, %v1015_v15  ;;  %v1323_v26 = vcombine.low %v239_v10, %v1313_v16  ;;  %v255_v28 = vunpack.c.l.bf16 %v1317_v22  ;;  %v245_v62 = vld [vmem:[%s1304_s6 + $0x28] sm:$0xf]  ;;  %v246_v63 = vld [vmem:[%s1304_s6 + $0x2c] sm:$0x1] }
  0x18   : > { %v256_v29 = vunpack.c.l.bf16 %v244_v23  ;;  %v271_v30 = vrot.slane %v247_v12, 1  ;;  %v272_v33 = vrot.slane %v248_v13, 1  ;;  %v274_v34 = vrot.slane %v249_v14, 1 }
  0x19   : > { %v275_v35 = vrot.slane %v250_v18, 1  ;;  %v277_v36 = vrot.slane %v251_v19, 1  ;;  %1086 = vmatmul.mubr.msk.bf16.vlgmr.msra.gmra.mxu1 %vm291_vm2, %v1323_v26  ;;  %v278_v37 = vrot.slane %v252_v20, 1  ;;  %v280_v38 = vrot.slane %v253_v24, 1 }
  0x1a   : > { %v281_v39 = vrot.slane %v254_v25, 1  ;;  %v410_v40 = vrot.slane %v247_v12, 2  ;;  %1096 = vmatpush3.bf16.msra.mxu1 %v503_v27  ;;  %1097 = vmatprep.mubr.msk.bf16.mxu1 %vm291_vm2, %v1025_v21  ;;  %v273_v41 = vsel %vm270_vm1, %v271_v30, %v272_v33  ;;  %v411_v43 = vrot.slane %v248_v13, 2  ;;  %v1037_v12 = vld [vmem:[%s1420_s1 + $0x18] sm:$0xf] }
  0x1b   : > { %v276_v42 = vsel %vm270_vm1, %v274_v34, %v275_v35  ;;  %v413_v44 = vrot.slane %v249_v14, 2  ;;  %1136 = vmatprep.subr.msk.bf16.mxu1 %vm298_vm0, %v1033_v32  ;;  %v279_v45 = vsel %vm270_vm1, %v277_v36, %v278_v37  ;;  %v414_v48 = vrot.slane %v250_v18, 2  ;;  %v1043_v21 = vld [vmem:[%s1420_s1 + $0x20] sm:$0xf] }
  0x1c   : > { %v282_v46 = vsel %vm270_vm1, %v280_v38, %v281_v39  ;;  %v287_v47 = vpack.c.bf16 %v276_v42, %v273_v41  ;;  %v416_v50 = vrot.slane %v251_v19, 2  ;;  %v417_v51 = vrot.slane %v252_v20, 2 }
  0x1d   : > { %v288_v49 = vpack.c.bf16 %v282_v46, %v279_v45  ;;  %v419_v52 = vrot.slane %v253_v24, 2  ;;  %v420_v53 = vrot.slane %v254_v25, 2  ;;  %v412_v55 = vsel %vm409_vm3, %v410_v40, %v411_v43 }
  0x1e   : > { %1079 = vmatprep.mubr.msk.bf16.mxu0 %vm291_vm2, %v287_v47  ;;  %v415_v56 = vsel %vm409_vm3, %v413_v44, %v414_v48  ;;  %v418_v57 = vsel %vm409_vm3, %v416_v50, %v417_v51  ;;  %v630_v58 = vrot.slane %v255_v28, 2  ;;  %v631_v59 = vrot.slane %v256_v29, 2 }
  0x1f   : > { %1080 = vmatmul.mubr.msk.bf16.vlgmr.msra.gmra.mxu0 %vm291_vm2, %v288_v49  ;;  %v426_v60 = vpack.c.bf16 %v415_v56, %v412_v55  ;;  %v421_v61 = vsel %vm409_vm3, %v419_v52, %v420_v53  ;;  %v1026_v0 = vcombine.low %v1313_v16, %v1317_v22  ;;  %v634_v2 = vpack.c.bf16 %v418_v57, %v415_v56 }
  0x20   : > { %1090 = vmatpush3.bf16.msra.mxu0 %v437_v31  ;;  %v427_v3 = vpack.c.bf16 %v421_v61, %v418_v57  ;;  %v560_v5 = vrot.slane %v255_v28, 1  ;;  %v561_v6 = vrot.slane %v256_v29, 1  ;;  %v564_v7 = vpack.c.bf16 %v279_v45, %v276_v42 }
  0x21   : > { %1135 = vmatprep.subr.msk.bf16.mxu0 %vm298_vm0, %v1030_v54  ;;  %1091 = vmatprep.mubr.msk.bf16.mxu0 %vm291_vm2, %v426_v60  ;;  %v257_v8 = vunpack.c.l.bf16 %v245_v62  ;;  %v258_v9 = vunpack.c.l.bf16 %v246_v63  ;;  %v575_v10 = vsel %vm298_vm0, %v1030_v54, 0  ;;  %v632_v11 = vsel %vm409_vm3, %v630_v58, %v631_v59 }
  0x22   : > { %1098 = vmatmul.mubr.msk.bf16.vlgmr.msra.gmra.mxu1 %vm291_vm2, %v1026_v0  ;;  %v562_v13 = vsel %vm270_vm1, %v560_v5, %v561_v6  ;;  %v635_v14 = vpack.c.bf16 %v632_v11, %v421_v61  ;;  %v775_v17 = vsel %vm298_vm0, %v1040_v4, 0  ;;  %v707_v20 = vsel %vm298_vm0, %v1037_v12, 0 }
  0x23   : > { %1108 = vmatpush3.bf16.msra.mxu1 %v645_v1  ;;  %1109 = vmatprep.mubr.msk.bf16.mxu1 %vm291_vm2, %v634_v2  ;;  %v764_v15 = vrot.slane %v257_v8, 1  ;;  %v765_v16 = vrot.slane %v258_v9, 1  ;;  %v565_v18 = vpack.c.bf16 %v562_v13, %v282_v46  ;;  %v1036_v24 = vcombine.low %v1317_v22, %v245_v62 }
  0x24   : > { %1138 = vmatprep.subr.msk.bf16.mxu1 %vm298_vm0, %v1040_v4  ;;  %v830_v25 = vrot.slane %v257_v8, 2  ;;  %v831_v27 = vrot.slane %v258_v9, 2  ;;  %v841_v28 = vsel %vm298_vm0, %v1043_v21, 0 }
  0x25   : > { %v766_v19 = vsel %vm270_vm1, %v764_v15, %v765_v16 }
  0x26   : > { %v768_v23 = vpack.c.bf16 %v766_v19, %v562_v13  ;;  %v832_v29 = vsel %vm409_vm3, %v830_v25, %v831_v27 }
  0x27   : > { %1092 = vmatmul.mubr.msk.bf16.vlgmr.msra.gmra.mxu0 %vm291_vm2, %v427_v3  ;;  %v834_v30 = vpack.c.bf16 %v832_v29, %v632_v11 }
  0x28   : > { %1102 = vmatpush3.bf16.msra.mxu0 %v575_v10  ;;  %1103 = vmatprep.mubr.msk.bf16.mxu0 %vm291_vm2, %v564_v7 }
  0x29   : > { %1137 = vmatprep.subr.msk.bf16.mxu0 %vm298_vm0, %v1037_v12 }
  0x2a   : > { %1110 = vmatmul.mubr.msk.bf16.vlgmr.msra.gmra.mxu1 %vm291_vm2, %v635_v14 }
  0x2b   : > { %1120 = vmatpush3.bf16.msra.mxu1 %v775_v17  ;;  %1121 = vmatprep.mubr.msk.bf16.mxu1 %vm291_vm2, %v288_v49 }
  0x2f   : > { %1104 = vmatmul.mubr.msk.bf16.vlgmr.msra.gmra.mxu0 %vm291_vm2, %v565_v18 }
  0x30   : > { %1114 = vmatpush3.bf16.msra.mxu0 %v707_v20  ;;  %1115 = vmatprep.mubr.msk.bf16.mxu0 %vm291_vm2, %v1323_v26 }
  0x31   : > { %1139 = vmatprep.subr.msk.bf16.mxu0 %vm298_vm0, %v1043_v21  ;;  %v898_v21 = vld [vmem:[%s216_s28 + $0x10] sm:$0xff] }
  0x32   : > { %1122 = vmatmul.mubr.msk.bf16.vlgmr.msra.gmra.mxu1 %vm291_vm2, %v768_v23 }
  0x37   : > { %1116 = vmatmul.mubr.msk.bf16.vlgmr.msra.gmra.mxu0 %vm291_vm2, %v1036_v24 }
  0x38   : > { %1126 = vmatpush3.bf16.msra.mxu0 %v841_v28  ;;  %1127 = vmatprep.mubr.msk.bf16.mxu0 %vm291_vm2, %v427_v3  ;;  %v896_v28 = vld [vmem:[%s216_s28] sm:$0xff] }
  0x3f   : > { %1128 = vmatmul.mubr.msk.bf16.vlgmr.msra.gmra.mxu0 %vm291_vm2, %v834_v30 }
  0xd9   : > { %v1087_v26 = vpop.f32.mrf.mxu1 }
  0xdb   : > { %v394_v22 = vpop.f32.mrf.mxu1 }
  0xdd   : > { %v1088_v31 = vpop.f32.mrf.mxu1 }
  0xdf   : > { %v1081_v32 = vpop.f32.mrf.mxu0  ;;  %v397_v33 = vpop.f32.mrf.mxu1 }
  0xe0   : > { %v403_v44 = vadd.f32 %v1087_v26, %v1081_v32  ;;  %v899_v32 = vld [vmem:[%s216_s28 + $0x18] sm:$0xff] }
  0xe1   : > { %v336_v34 = vpop.f32.mrf.mxu0 }
  0xe2   : > { %v1099_v36 = vpop.f32.mrf.mxu1  ;;  %v395_v47 = vadd.f32 %v394_v22, %v336_v34 }
  0xe3   : > { %v1082_v35 = vpop.f32.mrf.mxu0 }
  0xe4   : > { %v539_v38 = vpop.f32.mrf.mxu1  ;;  %v406_v51 = vadd.f32 %v1088_v31, %v1082_v35 }
  0xe5   : > { %v339_v37 = vpop.f32.mrf.mxu0 }
  0xe6   : > { %v1100_v40 = vpop.f32.mrf.mxu1  ;;  %v398_v55 = vadd.f32 %v397_v33, %v339_v37  ;;  %v897_v37 = vld [vmem:[%s216_s28 + $0x8] sm:$0xff] }
  0xe7   : > { %v1093_v39 = vpop.f32.mrf.mxu0 }
  0xe8   : > { %v542_v42 = vpop.f32.mrf.mxu1  ;;  %v490_v48 = vadd.f32 %v1093_v39, %v403_v44 }
  0xe9   : > { %v473_v41 = vpop.f32.mrf.mxu0 }
  0xea   : > { %v1111_v45 = vpop.f32.mrf.mxu1  ;;  %v488_v52 = vadd.f32 %v473_v41, %v395_v47  ;;  %v556_v56 = vadd.f32 %v1099_v36, %v490_v48 }
  0xeb   : > { %v1094_v43 = vpop.f32.mrf.mxu0 }
  0xec   : > { %v681_v49 = vpop.f32.mrf.mxu1  ;;  %v491_v57 = vadd.f32 %v1094_v43, %v406_v51  ;;  %v554_v60 = vadd.f32 %v539_v38, %v488_v52 }
  0xed   : > { %v476_v46 = vpop.f32.mrf.mxu0 }
  0xee   : > { %v1112_v53 = vpop.f32.mrf.mxu1  ;;  %v489_v61 = vadd.f32 %v476_v46, %v398_v55  ;;  %v557_v0 = vadd.f32 %v1100_v40, %v491_v57 }
  0xef   : > { %v1105_v50 = vpop.f32.mrf.mxu0 }
  0xf0   : > { %v684_v59 = vpop.f32.mrf.mxu1  ;;  %v628_v62 = vadd.f32 %v1105_v50, %v556_v56  ;;  %v555_v4 = vadd.f32 %v542_v42, %v489_v61 }
  0xf1   : > { %v611_v54 = vpop.f32.mrf.mxu0 }
  0xf2   : > { %v626_v1 = vadd.f32 %v611_v54, %v554_v60  ;;  %v1123_v3 = vpop.f32.mrf.mxu1  ;;  %v698_v5 = vadd.f32 %v1111_v45, %v628_v62 }
  0xf3   : > { %v1106_v58 = vpop.f32.mrf.mxu0 }
  0xf4   : > { %v629_v6 = vadd.f32 %v1106_v58, %v557_v0  ;;  %v696_v8 = vadd.f32 %v681_v49, %v626_v1  ;;  %v811_v11 = vpop.f32.mrf.mxu1 }
  0xf5   : > { %v614_v63 = vpop.f32.mrf.mxu0 }
  0xf6   : > { %v627_v9 = vadd.f32 %v614_v63, %v555_v4  ;;  %v699_v13 = vadd.f32 %v1112_v53, %v629_v6  ;;  %v1124_v19 = vpop.f32.mrf.mxu1 }
  0xf7   : > { %v1117_v2 = vpop.f32.mrf.mxu0 }
  0xf8   : > { %v760_v10 = vadd.f32 %v1117_v2, %v698_v5  ;;  %v697_v16 = vadd.f32 %v684_v59, %v627_v9  ;;  %v814_v22 = vpop.f32.mrf.mxu1 }
  0xf9   : > { %v743_v7 = vpop.f32.mrf.mxu0 }
  0xfa   : > { %v758_v14 = vadd.f32 %v743_v7, %v696_v8  ;;  %v828_v17 = vadd.f32 %v1123_v3, %v760_v10 }
  0xfb   : > { %v1118_v12 = vpop.f32.mrf.mxu0 }
  0xfc   : > { %v761_v18 = vadd.f32 %v1118_v12, %v699_v13  ;;  %v826_v23 = vadd.f32 %v811_v11, %v758_v14 }
  0xfd   : > { %v746_v15 = vpop.f32.mrf.mxu0 }
  0xfe   : > { %v759_v24 = vadd.f32 %v746_v15, %v697_v16  ;;  %v829_v29 = vadd.f32 %v1124_v19, %v761_v18 }
  0xff   : > { %v1129_v20 = vpop.f32.mrf.mxu0 }
 0x100   : > { %v894_v25 = vadd.f32 %v1129_v20, %v828_v17  ;;  %v827_v33 = vadd.f32 %v814_v22, %v759_v24 }
 0x101   : > { %v877_v27 = vpop.f32.mrf.mxu0 }
 0x102   : > { %v902_v30 = vadd.f32 %v898_v21, %v894_v25  ;;  %v892_v26 = vadd.f32 %v877_v27, %v826_v23 }
 0x103   : > { %v1130_v31 = vpop.f32.mrf.mxu0 }
 0x104   : > { %906 = vst.msk [vmem:[%s226_s4 + $0x10] sm:$0xff] %vm291_vm2, %v902_v30  ;;  %v900_v34 = vadd.f32 %v896_v28, %v892_v26  ;;  %v895_v35 = vadd.f32 %v1130_v31, %v829_v29 }
 0x105   : > { %v880_v36 = vpop.f32.mrf.mxu0 }
 0x106   : > { %904 = vst.msk [vmem:[%s226_s4] sm:$0xff] %vm291_vm2, %v900_v34  ;;  %v903_v38 = vadd.f32 %v899_v32, %v895_v35  ;;  %v893_v39 = vadd.f32 %v880_v36, %v827_v33 }
 0x108   : > { %907 = vst.msk [vmem:[%s226_s4 + $0x18] sm:$0xff] %vm291_vm2, %v903_v38  ;;  %v901_v40 = vadd.f32 %v897_v37, %v893_v39 }
 0x10a   : > { %905 = vst.msk [vmem:[%s226_s4 + $0x8] sm:$0xff] %vm291_vm2, %v901_v40 }
 0x10b PF: > { %s13_s16 = sadd.s32 1, %s1224_s16   ;;  %s1423_s12 = smov %s1216_s14 }
 0x10c   : > { %p10_p7 = scmp.ge.s32.totalorder %s13_s16, 6   ;;  %s1424_s13 = smov %s1220_s15 }
 0x10d   : > { %s1425_s14 = smov %s1428_s17  ;;  %s1426_s15 = smov %s1432_s18 }
 0x10e   :  { %12 = sbr.rel (!%p10_p7) target bundleno = 3 (0x3), region = 74 }

// kernel: network_block_forward.6
= control target key start
LH: loop header
LB: loop body
LE: loop exit
PB: predicated region body
PF: predicated region fallthrough
CT: control target
= control target key end

     0   :  { %s1433_s21 = smov 0   ;;  %s1435_s22 = smov 0   ;;  %s1806_s0 = inlined_call_operand.vmem [shape: bf16[2,10,10,8], index: 0, kind: input, shape index: {}]   ;;  %s1807_s1 = inlined_call_operand.vmem [shape: bf16[9,8,8], index: 1, kind: input, shape index: {}]   ;;  %s1808_s2 = inlined_call_operand.vmem [shape: f32[1,1,8], index: 2, kind: input, shape index: {}]   ;;  %s1809_s3 = inlined_call_operand.vmem [shape: f32[1,1,8], index: 3, kind: input, shape index: {}]   ;;  %s1810_s4 = inlined_call_operand.vmem [shape: f32[1,8], index: 4, kind: input, shape index: {}]   ;;  %s1811_s5 = inlined_call_operand.vmem [shape: f32[1,8], index: 5, kind: input, shape index: {}]   ;;  %s1812_s6 = inlined_call_operand.vmem [shape: bf16[128,8], index: 6, kind: output, shape index: {}]  }
   0x1   :  { %s1437_s23 = smov 0   ;;  %s1439_s24 = smov 0  }
   0x2   :  { %s1441_s25 = smov 0  }
   0x3 LB: > { %s25_s26 = sadd.s32 1, %s1388_s23  ;;  %s28_s27 = sadd.s32 1, %s1392_s24  ;;  %s1396_s25 = sphi %s1441_s25, %s16_s25   ;;  %s1392_s24 = sphi %s1439_s24, %s1834_s24   ;;  %s1388_s23 = sphi %s1437_s23, %s1833_s23   ;;  %s1384_s22 = sphi %s1435_s22, %s1832_s22   ;;  %s1380_s21 = sphi %s1433_s21, %s1831_s21  }
   0x4   : > { %p26_p0 = scmp.ge.s32.totalorder %s25_s26, 2  ;;  %p1177_p1 = scmp.ge.s32.totalorder %s1396_s25, 1 }
   0x5   : > { %p228_p2 = scmp.lt.s32.totalorder %s1396_s25, 5 }
   0x6   : > { %s1836_s26 = smov (%p26_p0, %s25_s26), 0  ;;  %s1838_s27 = smov (!%p26_p0, %s28_s27), %s1392_s24 }
   0x7   : > { %p229_p3 = pnand %p1177_p1, %p228_p2  ;;  %p30_p4 = scmp.ge.s32.totalorder %s1838_s27, 2 }
   0x8   : > { %p260_p5 = scmp.lt.s32.totalorder (!%p229_p3), %s1384_s22, 1  ;;  %s1182_s8 = sshll.u32 (!%p229_p3), %s1380_s21, 2 }
   0x9   : > { %s1840_s27 = smov (%p30_p4, %s1838_s27), 0  ;;  %232 = sbr.rel (%p229_p3) target bundleno = 283 (0x11b), region = 44 }
   0xa   : > { %s1222_s13 = sshll.u32 (!%p229_p3), %s1380_s21, 5  ;;  %s1179_s17 = sshll.u32 (!%p229_p3), %s1384_s22, 1 }
   0xe   : > { %v1187_v0 = vld [vmem:[%s1807_s1 + $0x4] sm:$0xf]  ;;  %vm450_vm0 = vcmask 1043456   ;;  %v413_v1 = vld [vmem:[%s1807_s1] sm:$0xf]  ;;  %v360_v2 = vlaneseq  ;;  %s261_s9 = scalar_select %p260_p5, %s1384_s22, 1  ;;  %v1480_v5 = vstv %s1182_s8 }
   0xf   : > { %1308 = vmatprep.subr.msk.bf16.mxu0 %vm450_vm0, %v1187_v0  ;;  %v452_v3 = vsel %vm450_vm0, %v1187_v0, 0  ;;  %1309 = vmatprep.subr.msk.bf16.mxu1 %vm450_vm0, %v413_v1  ;;  %v510_v4 = vsel %vm450_vm0, %v413_v1, 0  ;;  %v355_v7 = vadd.s32 1, %v1480_v5  ;;  %v356_v8 = vadd.s32 2, %v1480_v5  ;;  %v1490_v10 = vld [vmem:[%s1807_s1 + $0x8] sm:$0xf] }
  0x10   : > { %1255 = vmatpush3.bf16.msra.mxu0 %v452_v3  ;;  %1261 = vmatpush3.bf16.msra.mxu1 %v510_v4  ;;  %v1482_v6 = vshrl.u32 %v360_v2, 7  ;;  %v357_v9 = vadd.s32 3, %v1480_v5  ;;  %s1317_s12 = smul.u32 80, %s261_s9  ;;  %v1496_v11 = vadd.s32 4, %v1480_v5  ;;  %v1504_v13 = vld [vmem:[%s1807_s1 + $0xc] sm:$0xf] }
  0x11   : > { %1310 = vmatprep.subr.msk.bf16.mxu0 %vm450_vm0, %v1490_v10  ;;  %vm363_vm1 = vcmp.eq.s32.totalorder %v1480_v5, 0  ;;  %vm364_vm2 = vcmp.eq.s32.totalorder %v355_v7, 0  ;;  %vm365_vm3 = vcmp.eq.s32.totalorder %v356_v8, 0  ;;  %vm369_vm4 = vcmp.eq.s32.totalorder %v1480_v5, 9  ;;  %1311 = vmatprep.subr.msk.bf16.mxu1 %vm450_vm0, %v1504_v13  ;;  %v1518_v14 = vld [vmem:[%s1808_s2] ss:$0 sm:$0xff] }
  0x12   : > { %v1499_v12 = vadd.s32 8, %v1482_v6  ;;  %s264_s18 = scalar_lea.vmem %s1806_s0, %s1317_s12  ;;  %vm366_vm5 = vcmp.eq.s32.totalorder %v357_v9, 0  ;;  %vm370_vm6 = vcmp.eq.s32.totalorder %v355_v7, 9  ;;  %vm371_vm7 = vcmp.eq.s32.totalorder %v356_v8, 9  ;;  %vm1534_vm9 = vmor %vm363_vm1, %vm369_vm4  ;;  %v1547_v36 = vld [vmem:[%s1809_s3] ss:$0 sm:$0xff] }
  0x13   : > { %s1513_s19 = scalar_lea.vmem %s264_s18, %s1222_s13  ;;  %vm372_vm8 = vcmp.eq.s32.totalorder %v357_v9, 9  ;;  %vm381_vm10 = vcmp.eq.s32.totalorder %v1482_v6, 0  ;;  %vm1551_vm12 = vmor %vm364_vm2, %vm370_vm6  ;;  %vm422_vm15 = vcmask 1046528   ;;  %v1598_v57 = vadd.s32 5, %v1480_v5  ;;  %v1201_v55 = vld [vmem:[%s1807_s1 + $0x14] sm:$0xf]  ;;  %s266_s18 = sadd.s32 %s1380_s21, %s1179_s17 }
  0x14   : > { %v280_v15 = vld [vmem:[%s1513_s19] ss:$8 sps:$4 sm:$0xff]   ;;  %v281_v16 = vld [vmem:[%s1513_s19 + $0x4] sm:$0x1]  ;;  %v283_v17 = vld [vmem:[%s1513_s19 + $0xc] sm:$0x1] }
  0x15   : > { %v284_v18 = vld [vmem:[%s1513_s19 + $0x10] ss:$8 sps:$4 sm:$0xff]   ;;  %v285_v19 = vld [vmem:[%s1513_s19 + $0x14] sm:$0x1]  ;;  %v287_v20 = vld [vmem:[%s1513_s19 + $0x1c] sm:$0x1]  ;;  %v292_v21 = vunpack.c.l.bf16 %v280_v15  ;;  %v293_v22 = vunpack.c.l.bf16 %v281_v16  ;;  %v294_v23 = vunpack.c.h.bf16 %v280_v15  ;;  %v295_v24 = vunpack.c.l.bf16 %v283_v17 }
  0x16   : > { %v296_v25 = vunpack.c.l.bf16 %v284_v18  ;;  %v297_v26 = vunpack.c.l.bf16 %v285_v19  ;;  %v298_v27 = vunpack.c.h.bf16 %v284_v18  ;;  %v299_v28 = vunpack.c.l.bf16 %v287_v20  ;;  %v1527_v29 = vld [vmem:[%s1513_s19 + $0x20] ss:$8 sps:$4 sm:$0xff]   ;;  %v289_v30 = vld [vmem:[%s1513_s19 + $0x24] sm:$0x1]  ;;  %vm1561_vm13 = vmor %vm365_vm3, %vm371_vm7 }
  0x17   : > { %vm384_vm11 = vcmp.eq.s32.totalorder %v1499_v12, 9  ;;  %v311_v32 = vmul.f32 %v1518_v14, %v292_v21  ;;  %v312_v33 = vmul.f32 %v1518_v14, %v293_v22  ;;  %v313_v34 = vmul.f32 %v1518_v14, %v294_v23  ;;  %vm1568_vm14 = vmor %vm366_vm5, %vm372_vm8  ;;  %v291_v56 = vld [vmem:[%s1513_s19 + $0x2c] sm:$0x1]  ;;  %v1207_v6 = vld [vmem:[%s1807_s1 + $0x1c] sm:$0xf]  ;;  %s1180_s19 = sshll.u32 %s266_s18, 2 }
  0x18   : > { %v314_v35 = vmul.f32 %v1518_v14, %v295_v24  ;;  %v315_v38 = vmul.f32 %v1518_v14, %v296_v25  ;;  %v316_v39 = vmul.f32 %v1518_v14, %v297_v26  ;;  %v317_v40 = vmul.f32 %v1518_v14, %v298_v27  ;;  %vm1580_vm1 = vmor %vm1534_vm9, %vm381_vm10  ;;  %p268_p6 = scmp.lt.s32.totalorder %s1180_s19, 15 }
  0x19   : > { %v318_v41 = vmul.f32 %v1518_v14, %v299_v28  ;;  %v300_v43 = vunpack.c.l.bf16 %v1527_v29  ;;  %v301_v44 = vunpack.c.l.bf16 %v289_v30  ;;  %v330_v46 = vadd.f32 %v1547_v36, %v311_v32  ;;  %vm1592_vm2 = vmor %vm1534_vm9, %vm384_vm11 }
  0x1a   : > { %v331_v47 = vadd.f32 %v1547_v36, %v312_v33  ;;  %v332_v48 = vadd.f32 %v1547_v36, %v313_v34  ;;  %v333_v49 = vadd.f32 %v1547_v36, %v314_v35  ;;  %v334_v51 = vadd.f32 %v1547_v36, %v315_v38  ;;  %vm1606_vm5 = vmor %vm1551_vm12, %vm381_vm10  ;;  %s1842_s19 = smov (!%p268_p6, %s1180_s19), 15 }
  0x1b   : > { %v335_v52 = vadd.f32 %v1547_v36, %v316_v39  ;;  %v336_v53 = vadd.f32 %v1547_v36, %v317_v40  ;;  %v337_v54 = vadd.f32 %v1547_v36, %v318_v41  ;;  %vm367_vm3 = vcmp.eq.s32.totalorder %v1496_v11, 0  ;;  %vm390_vm7 = vmor %vm1551_vm12, %vm384_vm11  ;;  %s1181_s29 = sshll.u32 %s1842_s19, 2 }
  0x1c   : > { %vm373_vm4 = vcmp.eq.s32.totalorder %v1496_v11, 9  ;;  %vm443_vm6 = vcmask 64512   ;;  %v342_v59 = vmax.f32 %v330_v46, 0.0  ;;  %v343_v60 = vmax.f32 %v331_v47, 0.0  ;;  %vm391_vm8 = vmor %vm1561_vm13, %vm381_vm10  ;;  %s271_s8 = scalar_lea.vmem %s1812_s6, %s1181_s29 }
  0x1d   : > { %v344_v61 = vmax.f32 %v332_v48, 0.0  ;;  %v345_v62 = vmax.f32 %v333_v49, 0.0  ;;  %v346_v63 = vmax.f32 %v334_v51, 0.0  ;;  %v347_v0 = vmax.f32 %v335_v52, 0.0  ;;  %vm392_vm9 = vmor %vm1561_vm13, %vm384_vm11 }
  0x1e   : > { %v348_v1 = vmax.f32 %v336_v53, 0.0  ;;  %v349_v2 = vmax.f32 %v337_v54, 0.0  ;;  %v302_v3 = vunpack.c.h.bf16 %v1527_v29  ;;  %v303_v4 = vunpack.c.l.bf16 %v291_v56  ;;  %vm393_vm12 = vmor %vm1568_vm14, %vm381_vm10 }
  0x1f   : > { %v319_v5 = vmul.f32 %v1518_v14, %v300_v43  ;;  %v320_v7 = vmul.f32 %v1518_v14, %v301_v44  ;;  %v399_v8 = vsel %vm1580_vm1, 0.0, %v342_v59  ;;  %v400_v9 = vsel %vm1592_vm2, 0.0, %v343_v60  ;;  %vm394_vm13 = vmor %vm1568_vm14, %vm384_vm11 }
  0x20   : > { %v1635_v15 = vsel %vm1606_vm5, 0.0, %v344_v61  ;;  %v402_v16 = vsel %vm390_vm7, 0.0, %v345_v62  ;;  %v1641_v17 = vsel %vm391_vm8, 0.0, %v346_v63  ;;  %v404_v18 = vsel %vm392_vm9, 0.0, %v347_v0  ;;  %vm379_vm1 = vmor %vm367_vm3, %vm373_vm4 }
  0x21   : > { %v1643_v19 = vsel %vm393_vm12, 0.0, %v348_v1  ;;  %v423_v20 = vrot.slane %v399_v8, 1  ;;  %v406_v21 = vsel %vm394_vm13, 0.0, %v349_v2  ;;  %v424_v22 = vrot.slane %v400_v9, 1  ;;  %vm396_vm3 = vmor %vm379_vm1, %vm384_vm11 }
  0x22   : > { %v426_v23 = vrot.slane %v1635_v15, 1  ;;  %v427_v24 = vrot.slane %v402_v16, 1  ;;  %v339_v25 = vadd.f32 %v1547_v36, %v320_v7  ;;  %v429_v26 = vrot.slane %v1641_v17, 1  ;;  %vm1678_vm4 = vmor %vm379_vm1, %vm381_vm10  ;;  %v1204_v7 = vld [vmem:[%s1807_s1 + $0x18] sm:$0xf] }
  0x23   : > { %v430_v27 = vrot.slane %v404_v18, 1  ;;  %v432_v28 = vrot.slane %v1643_v19, 1  ;;  %v338_v29 = vadd.f32 %v1547_v36, %v319_v5  ;;  %v425_v30 = vsel %vm422_vm15, %v423_v20, %v424_v22 }
  0x24   : > { %v1652_v31 = vsel %vm422_vm15, %v426_v23, %v427_v24  ;;  %v433_v32 = vrot.slane %v406_v21, 1  ;;  %vm368_vm14 = vcmp.eq.s32.totalorder %v1598_v57, 0  ;;  %v321_v37 = vmul.f32 %v1518_v14, %v302_v3  ;;  %v1210_v24 = vld [vmem:[%s1807_s1 + $0x20] sm:$0xf] }
  0x25   : > { %v1655_v33 = vsel %vm422_vm15, %v429_v26, %v430_v27  ;;  %v439_v34 = vpack.c.bf16 %v1652_v31, %v425_v30  ;;  %v351_v38 = vmax.f32 %v339_v25, 0.0  ;;  %vm374_vm2 = vcmp.eq.s32.totalorder %v1598_v57, 9 }
  0x26   : > { %v1664_v35 = vsel %vm422_vm15, %v432_v28, %v433_v32  ;;  %v322_v40 = vmul.f32 %v1518_v14, %v303_v4  ;;  %v350_v41 = vmax.f32 %v338_v29, 0.0  ;;  %v562_v11 = vrot.slane %v399_v8, 2  ;;  %v1198_v14 = vld [vmem:[%s1807_s1 + $0x10] sm:$0xf]  ;;  %vm1727_vm7 = vmor %vm368_vm14, %vm374_vm2 }
  0x27   : > { %v1670_v39 = vpack.c.bf16 %v1664_v35, %v1655_v33  ;;  %1256 = vmatprep.mubr.msk.bf16.mxu0 %vm443_vm6, %v439_v34  ;;  %v563_v42 = vrot.slane %v400_v9, 2  ;;  %v566_v44 = vrot.slane %v402_v16, 2  ;;  %v568_v45 = vrot.slane %v1641_v17, 2  ;;  %vm397_vm8 = vmor %vm1727_vm7, %vm381_vm10 }
  0x28   : > { %v569_v46 = vrot.slane %v404_v18, 2  ;;  %v411_v47 = vpack.c.bf16 %v1635_v15, %v399_v8  ;;  %v572_v48 = vrot.slane %v406_v21, 2  ;;  %v1691_v49 = vpack.c.bf16 %v1643_v19, %v1641_v17  ;;  %vm398_vm9 = vmor %vm1727_vm7, %vm384_vm11 }
  0x29   : > { %1257 = vmatmul.mubr.msk.bf16.vlgmr.msra.gmra.mxu0 %vm443_vm6, %v1670_v39  ;;  %v589_v50 = vsel %vm450_vm0, %v1490_v10, 0  ;;  %v655_v51 = vsel %vm450_vm0, %v1504_v13, 0  ;;  %v340_v52 = vadd.f32 %v1547_v36, %v321_v37  ;;  %v408_v53 = vsel %vm396_vm3, 0.0, %v351_v38 }
  0x2a   : > { %1262 = vmatprep.mubr.msk.bf16.mxu1 %vm443_vm6, %v411_v47  ;;  %1267 = vmatpush3.bf16.msra.mxu0 %v589_v50  ;;  %vm561_vm5 = vcmask 1045504   ;;  %v565_v54 = vrot.slane %v1635_v15, 2  ;;  %v1705_v56 = vsel %vm1678_vm4, 0.0, %v350_v41  ;;  %v644_v13 = vpack.c.bf16 %v1641_v17, %v1635_v15 }
  0x2b   : > { %1263 = vmatmul.mubr.msk.bf16.vlgmr.msra.gmra.mxu1 %vm443_vm6, %v1691_v49  ;;  %v564_v10 = vsel %vm561_vm5, %v562_v11, %v563_v42  ;;  %1312 = vmatprep.subr.msk.bf16.mxu0 %vm450_vm0, %v1198_v14  ;;  %v571_v58 = vrot.slane %v1643_v19, 2  ;;  %v341_v59 = vadd.f32 %v1547_v36, %v322_v40  ;;  %v712_v60 = vrot.slane %v1705_v56, 1 }
  0x2c   : > { %1273 = vmatpush3.bf16.msra.mxu1 %v655_v51  ;;  %v567_v61 = vsel %vm561_vm5, %v565_v54, %v566_v44  ;;  %v570_v62 = vsel %vm561_vm5, %v568_v45, %v569_v46  ;;  %v713_v63 = vrot.slane %v408_v53, 1  ;;  %v716_v0 = vpack.c.bf16 %v1655_v33, %v1652_v31  ;;  %1274 = vmatprep.mubr.msk.bf16.mxu1 %vm443_vm6, %v644_v13 }
  0x2d   : > { %v578_v1 = vpack.c.bf16 %v567_v61, %v564_v10  ;;  %v573_v2 = vsel %vm561_vm5, %v571_v58, %v572_v48  ;;  %1313 = vmatprep.subr.msk.bf16.mxu1 %vm450_vm0, %v1201_v55  ;;  %v727_v4 = vsel %vm450_vm0, %v1198_v14, 0  ;;  %v645_v5 = vpack.c.bf16 %v1705_v56, %v1643_v19 }
  0x2e   : > { %v579_v3 = vpack.c.bf16 %v573_v2, %v570_v62  ;;  %v783_v8 = vrot.slane %v408_v53, 2  ;;  %v786_v57 = vpack.c.bf16 %v570_v62, %v567_v61  ;;  %v782_v9 = vrot.slane %v1705_v56, 2 }
  0x2f   : > { %1268 = vmatprep.mubr.msk.bf16.mxu0 %vm443_vm6, %v578_v1  ;;  %v352_v15 = vmax.f32 %v340_v52, 0.0  ;;  %v353_v16 = vmax.f32 %v341_v59, 0.0  ;;  %v714_v17 = vsel %vm422_vm15, %v712_v60, %v713_v63  ;;  %v797_v18 = vsel %vm450_vm0, %v1201_v55, 0 }
  0x30   : > { %v717_v19 = vpack.c.bf16 %v714_v17, %v1664_v35  ;;  %v784_v20 = vsel %vm561_vm5, %v782_v9, %v783_v8  ;;  %v859_v22 = vsel %vm450_vm0, %v1204_v7, 0  ;;  %v927_v27 = vsel %vm450_vm0, %v1207_v6, 0 }
  0x31   : > { %1269 = vmatmul.mubr.msk.bf16.vlgmr.msra.gmra.mxu0 %vm443_vm6, %v579_v3  ;;  %v409_v21 = vsel %vm397_vm8, 0.0, %v352_v15  ;;  %v410_v12 = vsel %vm398_vm9, 0.0, %v353_v16  ;;  %v787_v23 = vpack.c.bf16 %v784_v20, %v573_v2  ;;  %v993_v32 = vsel %vm450_vm0, %v1210_v24, 0 }
  0x32   : > { %1279 = vmatpush3.bf16.msra.mxu0 %v727_v4  ;;  %1280 = vmatprep.mubr.msk.bf16.mxu0 %vm443_vm6, %v716_v0  ;;  %v916_v25 = vrot.slane %v409_v21, 1  ;;  %v917_v26 = vrot.slane %v410_v12, 1  ;;  %v852_v29 = vpack.c.bf16 %v409_v21, %v1705_v56  ;;  %v983_v30 = vrot.slane %v410_v12, 2 }
  0x33   : > { %1314 = vmatprep.subr.msk.bf16.mxu0 %vm450_vm0, %v1204_v7  ;;  %1275 = vmatmul.mubr.msk.bf16.vlgmr.msra.gmra.mxu1 %vm443_vm6, %v645_v5  ;;  %v982_v31 = vrot.slane %v409_v21, 2 }
  0x34   : > { %1285 = vmatpush3.bf16.msra.mxu1 %v797_v18  ;;  %1286 = vmatprep.mubr.msk.bf16.mxu1 %vm443_vm6, %v786_v57  ;;  %v918_v28 = vsel %vm422_vm15, %v916_v25, %v917_v26 }
  0x35   : > { %1315 = vmatprep.subr.msk.bf16.mxu1 %vm450_vm0, %v1207_v6  ;;  %v920_v33 = vpack.c.bf16 %v918_v28, %v714_v17  ;;  %v984_v34 = vsel %vm561_vm5, %v982_v31, %v983_v30  ;;  %v1213_v28 = vld [vmem:[%s1810_s4] ss:$0 sm:$0xff] }
  0x36   : > { %v986_v35 = vpack.c.bf16 %v984_v34, %v784_v20 }
  0x39   : > { %1281 = vmatmul.mubr.msk.bf16.vlgmr.msra.gmra.mxu0 %vm443_vm6, %v717_v19 }
  0x3a   : > { %1291 = vmatpush3.bf16.msra.mxu0 %v859_v22  ;;  %1292 = vmatprep.mubr.msk.bf16.mxu0 %vm443_vm6, %v1691_v49 }
  0x3b   : > { %1316 = vmatprep.subr.msk.bf16.mxu0 %vm450_vm0, %v1210_v24  ;;  %1287 = vmatmul.mubr.msk.bf16.vlgmr.msra.gmra.mxu1 %vm443_vm6, %v787_v23  ;;  %vm1090_vm0 = vcmask 60416  }
  0x3c   : > { %1297 = vmatpush3.bf16.msra.mxu1 %v927_v27  ;;  %1298 = vmatprep.mubr.msk.bf16.mxu1 %vm443_vm6, %v1670_v39 }
  0x41   : > { %1293 = vmatmul.mubr.msk.bf16.vlgmr.msra.gmra.mxu0 %vm443_vm6, %v852_v29 }
  0x42   : > { %1303 = vmatpush3.bf16.msra.mxu0 %v993_v32  ;;  %1304 = vmatprep.mubr.msk.bf16.mxu0 %vm443_vm6, %v579_v3  ;;  %v1214_v32 = vld [vmem:[%s1811_s5] ss:$0 sm:$0xff] }
  0x43   : > { %1299 = vmatmul.mubr.msk.bf16.vlgmr.msra.gmra.mxu1 %vm443_vm6, %v920_v33 }
  0x49   : > { %1305 = vmatmul.mubr.msk.bf16.vlgmr.msra.gmra.mxu0 %vm443_vm6, %v986_v35 }
  0xe9   : > { %v1258_v37 = vpop.f32.mrf.mxu0 }
  0xeb   : > { %v488_v38 = vpop.f32.mrf.mxu0  ;;  %v1264_v39 = vpop.f32.mrf.mxu1 }
  0xec   : > { %v555_v14 = vadd.f32 %v1264_v39, %v1258_v37 }
  0xed   : > { %v1259_v40 = vpop.f32.mrf.mxu0  ;;  %v546_v41 = vpop.f32.mrf.mxu1 }
  0xee   : > { %v547_v50 = vadd.f32 %v546_v41, %v488_v38 }
  0xef   : > { %v491_v11 = vpop.f32.mrf.mxu0  ;;  %v1265_v42 = vpop.f32.mrf.mxu1 }
  0xf0   : > { %v558_v54 = vadd.f32 %v1265_v42, %v1259_v40 }
  0xf1   : > { %v1270_v43 = vpop.f32.mrf.mxu0  ;;  %v549_v44 = vpop.f32.mrf.mxu1 }
  0xf2   : > { %v642_v51 = vadd.f32 %v1270_v43, %v555_v14  ;;  %v550_v13 = vadd.f32 %v549_v44, %v491_v11 }
  0xf3   : > { %v625_v45 = vpop.f32.mrf.mxu0  ;;  %v1276_v46 = vpop.f32.mrf.mxu1 }
  0xf4   : > { %v640_v55 = vadd.f32 %v625_v45, %v547_v50  ;;  %v708_v58 = vadd.f32 %v1276_v46, %v642_v51 }
  0xf5   : > { %v1271_v47 = vpop.f32.mrf.mxu0  ;;  %v691_v48 = vpop.f32.mrf.mxu1 }
  0xf6   : > { %v643_v59 = vadd.f32 %v1271_v47, %v558_v54  ;;  %v706_v62 = vadd.f32 %v691_v48, %v640_v55 }
  0xf7   : > { %v628_v49 = vpop.f32.mrf.mxu0  ;;  %v1277_v52 = vpop.f32.mrf.mxu1 }
  0xf8   : > { %v641_v63 = vadd.f32 %v628_v49, %v550_v13  ;;  %v709_v36 = vadd.f32 %v1277_v52, %v643_v59 }
  0xf9   : > { %v1282_v53 = vpop.f32.mrf.mxu0  ;;  %v694_v56 = vpop.f32.mrf.mxu1 }
  0xfa   : > { %v780_v0 = vadd.f32 %v1282_v53, %v708_v58  ;;  %v707_v7 = vadd.f32 %v694_v56, %v641_v63 }
  0xfb   : > { %v763_v10 = vpop.f32.mrf.mxu0  ;;  %v1288_v60 = vpop.f32.mrf.mxu1 }
  0xfc   : > { %v778_v3 = vadd.f32 %v763_v10, %v706_v62  ;;  %v850_v8 = vadd.f32 %v1288_v60, %v780_v0 }
  0xfd   : > { %v1283_v61 = vpop.f32.mrf.mxu0  ;;  %v833_v1 = vpop.f32.mrf.mxu1 }
  0xfe   : > { %v781_v57 = vadd.f32 %v1283_v61, %v709_v36  ;;  %v848_v16 = vadd.f32 %v833_v1, %v778_v3 }
  0xff   : > { %v766_v2 = vpop.f32.mrf.mxu0  ;;  %v1289_v4 = vpop.f32.mrf.mxu1 }
 0x100   : > { %v779_v17 = vadd.f32 %v766_v2, %v707_v7  ;;  %v851_v20 = vadd.f32 %v1289_v4, %v781_v57 }
 0x101   : > { %v1294_v5 = vpop.f32.mrf.mxu0  ;;  %v836_v9 = vpop.f32.mrf.mxu1 }
 0x102   : > { %v912_v18 = vadd.f32 %v1294_v5, %v850_v8  ;;  %v849_v23 = vadd.f32 %v836_v9, %v779_v17 }
 0x103   : > { %v895_v15 = vpop.f32.mrf.mxu0  ;;  %v1300_v6 = vpop.f32.mrf.mxu1 }
 0x104   : > { %v910_v21 = vadd.f32 %v895_v15, %v848_v16  ;;  %v980_v24 = vadd.f32 %v1300_v6, %v912_v18 }
 0x105   : > { %v1295_v19 = vpop.f32.mrf.mxu0  ;;  %v963_v12 = vpop.f32.mrf.mxu1 }
 0x106   : > { %v913_v25 = vadd.f32 %v1295_v19, %v851_v20  ;;  %v978_v29 = vadd.f32 %v963_v12, %v910_v21 }
 0x107   : > { %v898_v22 = vpop.f32.mrf.mxu0  ;;  %v1301_v26 = vpop.f32.mrf.mxu1 }
 0x108   : > { %v911_v30 = vadd.f32 %v898_v22, %v849_v23  ;;  %v981_v34 = vadd.f32 %v1301_v26, %v913_v25 }
 0x109   : > { %v1306_v27 = vpop.f32.mrf.mxu0  ;;  %v966_v38 = vpop.f32.mrf.mxu1 }
 0x10a   : > { %v1046_v31 = vadd.f32 %v1306_v27, %v980_v24  ;;  %v979_v40 = vadd.f32 %v966_v38, %v911_v30 }
 0x10b   : > { %v1029_v33 = vpop.f32.mrf.mxu0 }
 0x10c   : > { %v1057_v35 = vmul.f32 %v1213_v28, %v1046_v31  ;;  %v1044_v37 = vadd.f32 %v1029_v33, %v978_v29 }
 0x10d   : > { %v1307_v39 = vpop.f32.mrf.mxu0 }
 0x10e   : > { %v1068_v41 = vadd.f32 %v1214_v32, %v1057_v35  ;;  %v1055_v11 = vmul.f32 %v1213_v28, %v1044_v37  ;;  %v1047_v42 = vadd.f32 %v1307_v39, %v981_v34 }
 0x10f   : > { %v1032_v43 = vpop.f32.mrf.mxu0 }
 0x110   : > { %v1072_v44 = vmax.f32 %v1068_v41, 0.0  ;;  %v1066_v45 = vadd.f32 %v1214_v32, %v1055_v11  ;;  %v1058_v46 = vmul.f32 %v1213_v28, %v1047_v42  ;;  %v1045_v47 = vadd.f32 %v1032_v43, %v979_v40 }
 0x112   : > { %v1225_v14 = vpack.c.bf16 %v1072_v44, %v1072_v44  ;;  %v1070_v48 = vmax.f32 %v1066_v45, 0.0  ;;  %v1069_v49 = vadd.f32 %v1214_v32, %v1058_v46  ;;  %v1056_v50 = vmul.f32 %v1213_v28, %v1045_v47 }
 0x114   : > { %1093 = vst.msk [vmem:[%s271_s8 + $0x8] sm:$0xf] %vm1090_vm0, %v1225_v14  ;;  %v1223_v51 = vpack.c.bf16 %v1070_v48, %v1070_v48  ;;  %v1073_v52 = vmax.f32 %v1069_v49, 0.0  ;;  %v1067_v53 = vadd.f32 %v1214_v32, %v1056_v50 }
 0x116   : > { %1091 = vst.msk [vmem:[%s271_s8] sm:$0xf] %vm1090_vm0, %v1223_v51  ;;  %v1226_v54 = vpack.c.bf16 %v1073_v52, %v1073_v52  ;;  %v1071_v55 = vmax.f32 %v1067_v53, 0.0 }
 0x118   : > { %1094 = vst.msk [vmem:[%s271_s8 + $0xc] sm:$0xf] %vm1090_vm0, %v1226_v54  ;;  %v1224_v56 = vpack.c.bf16 %v1071_v55, %v1071_v55 }
 0x11a   : > { %1092 = vst.msk [vmem:[%s271_s8 + $0x4] sm:$0xf] %vm1090_vm0, %v1224_v56 }
 0x11b PF: > { %s16_s25 = sadd.s32 1, %s1396_s25   ;;  %s1831_s21 = smov %s1388_s23 }
 0x11c   : > { %p13_p7 = scmp.ge.s32.totalorder %s16_s25, 6   ;;  %s1832_s22 = smov %s1392_s24 }
 0x11d   : > { %s1833_s23 = smov %s1836_s26  ;;  %s1834_s24 = smov %s1840_s27 }
 0x11e   :  { %15 = sbr.rel (!%p13_p7) target bundleno = 3 (0x3), region = 83 }

</bundles_post_ra>
